<compile_context>
chip_gen: v7x
topology: tpu7x:2x2x1
jax: 0.10.0
libtpu: 0.0.40
codegen_flags: <defaults>
</compile_context>

<pallas_src>
import math
import numpy as np
import jax
import jax.numpy as jnp
from jax.experimental import pallas as pl
from jax.experimental.pallas import tpu as pltpu

# ---- model hyper-parameters (small, consistent with the module's forward) ----
VOCAB = 64
D_MODEL = 32
N_HEADS = 4
HEAD_DIM = D_MODEL // N_HEADS
D_FF = 64
N_LAYERS = 2
CONTEXT_LEN = 16
BATCH = 2
SEQ = 8
EPS = 1e-5

VOCAB_PAD = 128          # lane-dense lm_head output; sliced back to VOCAB outside
NEG_INF = -1e30          # additive mask value
MXU_DTYPE = jnp.float32  # set jnp.bfloat16 on v6e/v7x for bf16 MXU inputs


# -----------------------------------------------------------------------------
# fused Pallas kernel (whole forward for the whole batch)
# -----------------------------------------------------------------------------
def _make_gpt_kernel(n_layers):
    def kernel(*refs):
        x_ref = refs[0]          # (B*S, D)       activations (already embedded)
        bias_ref = refs[1]       # (B*S, B*S)     block-diagonal causal additive bias
        params = refs[2:-1]      # flattened per-layer params + final norm/lm_head
        o_ref = refs[-1]         # (B*S, VOCAB_PAD)

        x = x_ref[...]
        bs, d = x.shape
        attn_bias = bias_ref[...]
        scale = 1.0 / math.sqrt(HEAD_DIM)

        # head lane-masks, computed once (comparisons only, no lane slicing)
        lane = jax.lax.broadcasted_iota(jnp.int32, (1, d), 1)
        head_masks = [
            jnp.logical_and(lane >= h * HEAD_DIM,
                            lane < (h + 1) * HEAD_DIM).astype(jnp.float32)
            for h in range(N_HEADS)
        ]

        def norm(v, k, b):
            # matches torch Normalization: (x-mean)/(std_unbiased+eps)*k + b
            mean = jnp.mean(v, axis=-1, keepdims=True)
            diff = v - mean
            var = jnp.sum(diff * diff, axis=-1, keepdims=True) * (1.0 / (d - 1))
            inv = pl.reciprocal(jnp.sqrt(var) + EPS, approx=True)
            return k * (diff * inv) + b

        def mm(a, b):
            return jnp.dot(a.astype(MXU_DTYPE), b.astype(MXU_DTYPE),
                           preferred_element_type=jnp.float32)

        def mm_t(a, b):  # a @ b.T without materializing the transpose
            return jax.lax.dot_general(
                a.astype(MXU_DTYPE), b.astype(MXU_DTYPE),
                (((1,), (1,)), ((), ())),
                preferred_element_type=jnp.float32)

        idx = 0
        for _ in range(n_layers):
            (k1, b1, wq, bq, wk, bk, wv, bv, wo, bo,
             k2, b2, w1, bw1, w2, bw2) = [r[...] for r in params[idx:idx + 16]]
            idx += 16

            # --- pre-attention norm + QKV projections (full batch, one matmul each)
            xn = norm(x, k1, b1)
            q = mm(xn, wq) + bq
            k = mm(xn, wk) + bk
            v = mm(xn, wv) + bv

            # --- multi-head causal attention via lane masks (no slicing/concat)
            acc = jnp.zeros((bs, d), jnp.float32)
            for hm in head_masks:
                s = mm_t(q * hm, k) * scale + attn_bias        # (BS, BS)
                s = s - jnp.max(s, axis=-1, keepdims=True)
                p = jnp.exp(s)
                p = p * pl.reciprocal(jnp.sum(p, axis=-1, keepdims=True),
                                      approx=True)
                acc = acc + mm(p, v * hm)                      # only head lanes

            x1 = x + mm(acc, wo) + bo

            # --- feed-forward (SiLU) + residual
            x1n = norm(x1, k2, b2)
            h1 = mm(x1n, w1) + bw1
            h1 = h1 * jax.nn.sigmoid(h1)
            x = x1 + mm(h1, w2) + bw2

        # --- final norm + lm_head (lane-padded output store)
        kf, bf, wh, bh = [r[...] for r in params[idx:idx + 4]]
        o_ref[...] = mm(norm(x, kf, bf), wh) + bh

    return kernel


# -----------------------------------------------------------------------------
# wrapper around pallas_call
# -----------------------------------------------------------------------------
def _vspec(shape):
    nd = len(shape)
    return pl.BlockSpec(shape, lambda i, _nd=nd: (0,) * _nd)


def gpt_forward_pallas(tokens, emb_scaled, pe, blocks, out_p):
    B, S = tokens.shape
    BS = B * S

    # glue: embedding gather (sqrt(d_model) already folded in) + positional add
    x = (emb_scaled[tokens] + pe[:S][None]).reshape(BS, D_MODEL)

    # block-diagonal causal additive bias, precomputed once on host
    row = np.arange(BS)[:, None]
    col = np.arange(BS)[None, :]
    keep = (row // S == col // S) & (col <= row)
    attn_bias = jnp.asarray(np.where(keep, 0.0, NEG_INF), dtype=jnp.float32)

    # lane-pad the lm_head to a dense 128-lane output
    kf, bf, wh, bh = out_p
    wh_pad = jnp.zeros((D_MODEL, VOCAB_PAD), jnp.float32).at[:, :VOCAB].set(wh)
    bh_pad = jnp.zeros((1, VOCAB_PAD), jnp.float32).at[:, :VOCAB].set(bh)

    flat = [p for blk in blocks for p in blk] + [kf, bf, wh_pad, bh_pad]

    out = pl.pallas_call(
        _make_gpt_kernel(len(blocks)),
        grid=(1,),
        in_specs=[_vspec(x.shape), _vspec(attn_bias.shape)]
                 + [_vspec(p.shape) for p in flat],
        out_specs=_vspec((BS, VOCAB_PAD)),
        out_shape=jax.ShapeDtypeStruct((BS, VOCAB_PAD), jnp.float32),
        compiler_params=pltpu.CompilerParams(dimension_semantics=("arbitrary",)),
    )(x, attn_bias, *flat)

    return out.reshape(B, S, VOCAB_PAD)[:, :, :VOCAB]


# -----------------------------------------------------------------------------
# deterministic parameter init (shapes mirror the nn.Module __init__)
# -----------------------------------------------------------------------------
def _linear(key, fan_in, fan_out):
    kw, kb = jax.random.split(key)
    bound = 1.0 / math.sqrt(fan_in)
    w = jax.random.uniform(kw, (fan_in, fan_out), jnp.float32, -bound, bound)
    b = jax.random.uniform(kb, (1, fan_out), jnp.float32, -bound, bound)
    return w, b


def init_params(key):
    keys = jax.random.split(key, 2 + N_LAYERS)
    emb = jax.random.normal(keys[0], (VOCAB, D_MODEL), jnp.float32)
    emb_scaled = emb * math.sqrt(D_MODEL)     # sqrt(d_model) folded into the table

    # positional encoding (same formula as the PyTorch module)
    pos = np.arange(CONTEXT_LEN, dtype=np.float32)[:, None]
    div = np.exp(np.arange(0, D_MODEL, 2, dtype=np.float32) *
                 (-math.log(10000.0) / D_MODEL))
    pe = np.zeros((CONTEXT_LEN, D_MODEL), dtype=np.float32)
    pe[:, 0::2] = np.sin(pos * div)
    pe[:, 1::2] = np.cos(pos * div)
    pe = jnp.asarray(pe)

    blocks = []
    for l in range(N_LAYERS):
        bk = jax.random.split(keys[2 + l], 6)
        k1 = jnp.ones((1, D_MODEL), jnp.float32)
        b1 = jnp.zeros((1, D_MODEL), jnp.float32)
        wq, bq = _linear(bk[0], D_MODEL, D_MODEL)
        wk, bk_ = _linear(bk[1], D_MODEL, D_MODEL)
        wv, bv = _linear(bk[2], D_MODEL, D_MODEL)
        wo, bo = _linear(bk[3], D_MODEL, D_MODEL)
        k2 = jnp.ones((1, D_MODEL), jnp.float32)
        b2 = jnp.zeros((1, D_MODEL), jnp.float32)
        w1, bw1 = _linear(bk[4], D_MODEL, D_FF)
        w2, bw2 = _linear(bk[5], D_FF, D_MODEL)
        blocks.append((k1, b1, wq, bq, wk, bk_, wv, bv, wo, bo,
                       k2, b2, w1, bw1, w2, bw2))

    kf = jnp.ones((1, D_MODEL), jnp.float32)
    bf = jnp.zeros((1, D_MODEL), jnp.float32)
    w_head, b_head = _linear(keys[1], D_MODEL, VOCAB)
    out_p = (kf, bf, w_head, b_head)
    return emb_scaled, pe, blocks, out_p


# -----------------------------------------------------------------------------
# pure-JAX reference (matches the PyTorch module semantics, f32, exact division)
# -----------------------------------------------------------------------------
def _norm_ref(x, k, b):
    mean = jnp.mean(x, axis=-1, keepdims=True)
    var = jnp.sum((x - mean) ** 2, axis=-1, keepdims=True) / (x.shape[-1] - 1)
    std = jnp.sqrt(var)
    return k * ((x - mean) / (std + EPS)) + b


def gpt_forward_ref(tokens, emb_scaled, pe, blocks, out_p):
    S = tokens.shape[1]
    x = emb_scaled[tokens] + pe[:S][None]
    row = np.arange(S)[:, None]
    col = np.arange(S)[None, :]
    causal = jnp.asarray(col <= row)
    scale = 1.0 / math.sqrt(HEAD_DIM)
    for (k1, b1, wq, bq, wk, bk, wv, bv, wo, bo,
         k2, b2, w1, bw1, w2, bw2) in blocks:
        xn = _norm_ref(x, k1, b1)
        q = xn @ wq + bq
        k = xn @ wk + bk
        v = xn @ wv + bv
        B = x.shape[0]
        qh = q.reshape(B, S, N_HEADS, HEAD_DIM).transpose(0, 2, 1, 3)
        kh = k.reshape(B, S, N_HEADS, HEAD_DIM).transpose(0, 2, 1, 3)
        vh = v.reshape(B, S, N_HEADS, HEAD_DIM).transpose(0, 2, 1, 3)
        s = jnp.einsum('bhqd,bhkd->bhqk', qh, kh) * scale
        s = jnp.where(causal, s, -jnp.inf)
        p = jax.nn.softmax(s, axis=-1)
        o = jnp.einsum('bhqk,bhkd->bhqd', p, vh).transpose(0, 2, 1, 3)
        o = o.reshape(B, S, D_MODEL) @ wo + bo
        x1 = x + o
        h = _norm_ref(x1, k2, b2) @ w1 + bw1
        h = h * jax.nn.sigmoid(h)
        x = x1 + (h @ w2 + bw2)
    kf, bf, wh, bh = out_p
    return _norm_ref(x, kf, bf) @ wh + bh


if __name__ == "__main__":
    key = jax.random.PRNGKey(0)
    kp, kt = jax.random.split(key)
    emb_scaled, pe, blocks, out_p = init_params(kp)
    tokens = jax.random.randint(kt, (BATCH, SEQ), 0, VOCAB, dtype=jnp.int32)

    logits = gpt_forward_pallas(tokens, emb_scaled, pe, blocks, out_p)
    logits = jax.block_until_ready(logits)

    ref = gpt_forward_ref(tokens, emb_scaled, pe, blocks, out_p)
    assert logits.shape == (BATCH, SEQ, VOCAB)
    if not np.allclose(np.asarray(logits), np.asarray(ref), atol=5e-2, rtol=5e-2):
        raise AssertionError("Pallas output does not match JAX reference")

    print("KERNEL_OK")
</pallas_src>

<mosaic_0001>
module attributes {stable_mosaic.version = 11 : i64} {
  func.func @kernel(%arg0: i32, %arg1: memref<16x32xf32, #tpu.memory_space<vmem>>, %arg2: memref<16x16xf32, #tpu.memory_space<vmem>>, %arg3: memref<1x32xf32, #tpu.memory_space<vmem>>, %arg4: memref<1x32xf32, #tpu.memory_space<vmem>>, %arg5: memref<32x32xf32, #tpu.memory_space<vmem>>, %arg6: memref<1x32xf32, #tpu.memory_space<vmem>>, %arg7: memref<32x32xf32, #tpu.memory_space<vmem>>, %arg8: memref<1x32xf32, #tpu.memory_space<vmem>>, %arg9: memref<32x32xf32, #tpu.memory_space<vmem>>, %arg10: memref<1x32xf32, #tpu.memory_space<vmem>>, %arg11: memref<32x32xf32, #tpu.memory_space<vmem>>, %arg12: memref<1x32xf32, #tpu.memory_space<vmem>>, %arg13: memref<1x32xf32, #tpu.memory_space<vmem>>, %arg14: memref<1x32xf32, #tpu.memory_space<vmem>>, %arg15: memref<32x64xf32, #tpu.memory_space<vmem>>, %arg16: memref<1x64xf32, #tpu.memory_space<vmem>>, %arg17: memref<64x32xf32, #tpu.memory_space<vmem>>, %arg18: memref<1x32xf32, #tpu.memory_space<vmem>>, %arg19: memref<1x32xf32, #tpu.memory_space<vmem>>, %arg20: memref<1x32xf32, #tpu.memory_space<vmem>>, %arg21: memref<32x32xf32, #tpu.memory_space<vmem>>, %arg22: memref<1x32xf32, #tpu.memory_space<vmem>>, %arg23: memref<32x32xf32, #tpu.memory_space<vmem>>, %arg24: memref<1x32xf32, #tpu.memory_space<vmem>>, %arg25: memref<32x32xf32, #tpu.memory_space<vmem>>, %arg26: memref<1x32xf32, #tpu.memory_space<vmem>>, %arg27: memref<32x32xf32, #tpu.memory_space<vmem>>, %arg28: memref<1x32xf32, #tpu.memory_space<vmem>>, %arg29: memref<1x32xf32, #tpu.memory_space<vmem>>, %arg30: memref<1x32xf32, #tpu.memory_space<vmem>>, %arg31: memref<32x64xf32, #tpu.memory_space<vmem>>, %arg32: memref<1x64xf32, #tpu.memory_space<vmem>>, %arg33: memref<64x32xf32, #tpu.memory_space<vmem>>, %arg34: memref<1x32xf32, #tpu.memory_space<vmem>>, %arg35: memref<1x32xf32, #tpu.memory_space<vmem>>, %arg36: memref<1x32xf32, #tpu.memory_space<vmem>>, %arg37: memref<32x128xf32, #tpu.memory_space<vmem>>, %arg38: memref<1x128xf32, #tpu.memory_space<vmem>>, %arg39: memref<16x128xf32, #tpu.memory_space<vmem>>) attributes {dimension_semantics = [#tpu.dimension_semantics<arbitrary>], iteration_bounds = array<i64: 1>, scalar_prefetch = 0 : i64, scratch_operands = 0 : i64, tpu.core_type = #tpu.core_type<tc>, window_params = [{pipeline_mode = #tpu.pipeline_mode<synchronous>, transform_indices = @transform_0, window_bounds = array<i64: 16, 32>}, {pipeline_mode = #tpu.pipeline_mode<synchronous>, transform_indices = @transform_1, window_bounds = array<i64: 16, 16>}, {pipeline_mode = #tpu.pipeline_mode<synchronous>, transform_indices = @transform_2, window_bounds = array<i64: 1, 32>}, {pipeline_mode = #tpu.pipeline_mode<synchronous>, transform_indices = @transform_3, window_bounds = array<i64: 1, 32>}, {pipeline_mode = #tpu.pipeline_mode<synchronous>, transform_indices = @transform_4, window_bounds = array<i64: 32, 32>}, {pipeline_mode = #tpu.pipeline_mode<synchronous>, transform_indices = @transform_5, window_bounds = array<i64: 1, 32>}, {pipeline_mode = #tpu.pipeline_mode<synchronous>, transform_indices = @transform_6, window_bounds = array<i64: 32, 32>}, {pipeline_mode = #tpu.pipeline_mode<synchronous>, transform_indices = @transform_7, window_bounds = array<i64: 1, 32>}, {pipeline_mode = #tpu.pipeline_mode<synchronous>, transform_indices = @transform_8, window_bounds = array<i64: 32, 32>}, {pipeline_mode = #tpu.pipeline_mode<synchronous>, transform_indices = @transform_9, window_bounds = array<i64: 1, 32>}, {pipeline_mode = #tpu.pipeline_mode<synchronous>, transform_indices = @transform_10, window_bounds = array<i64: 32, 32>}, {pipeline_mode = #tpu.pipeline_mode<synchronous>, transform_indices = @transform_11, window_bounds = array<i64: 1, 32>}, {pipeline_mode = #tpu.pipeline_mode<synchronous>, transform_indices = @transform_12, window_bounds = array<i64: 1, 32>}, {pipeline_mode = #tpu.pipeline_mode<synchronous>, transform_indices = @transform_13, window_bounds = array<i64: 1, 32>}, {pipeline_mode = #tpu.pipeline_mode<synchronous>, transform_indices = @transform_14, window_bounds = array<i64: 32, 64>}, {pipeline_mode = #tpu.pipeline_mode<synchronous>, transform_indices = @transform_15, window_bounds = array<i64: 1, 64>}, {pipeline_mode = #tpu.pipeline_mode<synchronous>, transform_indices = @transform_16, window_bounds = array<i64: 64, 32>}, {pipeline_mode = #tpu.pipeline_mode<synchronous>, transform_indices = @transform_17, window_bounds = array<i64: 1, 32>}, {pipeline_mode = #tpu.pipeline_mode<synchronous>, transform_indices = @transform_18, window_bounds = array<i64: 1, 32>}, {pipeline_mode = #tpu.pipeline_mode<synchronous>, transform_indices = @transform_19, window_bounds = array<i64: 1, 32>}, {pipeline_mode = #tpu.pipeline_mode<synchronous>, transform_indices = @transform_20, window_bounds = array<i64: 32, 32>}, {pipeline_mode = #tpu.pipeline_mode<synchronous>, transform_indices = @transform_21, window_bounds = array<i64: 1, 32>}, {pipeline_mode = #tpu.pipeline_mode<synchronous>, transform_indices = @transform_22, window_bounds = array<i64: 32, 32>}, {pipeline_mode = #tpu.pipeline_mode<synchronous>, transform_indices = @transform_23, window_bounds = array<i64: 1, 32>}, {pipeline_mode = #tpu.pipeline_mode<synchronous>, transform_indices = @transform_24, window_bounds = array<i64: 32, 32>}, {pipeline_mode = #tpu.pipeline_mode<synchronous>, transform_indices = @transform_25, window_bounds = array<i64: 1, 32>}, {pipeline_mode = #tpu.pipeline_mode<synchronous>, transform_indices = @transform_26, window_bounds = array<i64: 32, 32>}, {pipeline_mode = #tpu.pipeline_mode<synchronous>, transform_indices = @transform_27, window_bounds = array<i64: 1, 32>}, {pipeline_mode = #tpu.pipeline_mode<synchronous>, transform_indices = @transform_28, window_bounds = array<i64: 1, 32>}, {pipeline_mode = #tpu.pipeline_mode<synchronous>, transform_indices = @transform_29, window_bounds = array<i64: 1, 32>}, {pipeline_mode = #tpu.pipeline_mode<synchronous>, transform_indices = @transform_30, window_bounds = array<i64: 32, 64>}, {pipeline_mode = #tpu.pipeline_mode<synchronous>, transform_indices = @transform_31, window_bounds = array<i64: 1, 64>}, {pipeline_mode = #tpu.pipeline_mode<synchronous>, transform_indices = @transform_32, window_bounds = array<i64: 64, 32>}, {pipeline_mode = #tpu.pipeline_mode<synchronous>, transform_indices = @transform_33, window_bounds = array<i64: 1, 32>}, {pipeline_mode = #tpu.pipeline_mode<synchronous>, transform_indices = @transform_34, window_bounds = array<i64: 1, 32>}, {pipeline_mode = #tpu.pipeline_mode<synchronous>, transform_indices = @transform_35, window_bounds = array<i64: 1, 32>}, {pipeline_mode = #tpu.pipeline_mode<synchronous>, transform_indices = @transform_36, window_bounds = array<i64: 32, 128>}, {pipeline_mode = #tpu.pipeline_mode<synchronous>, transform_indices = @transform_37, window_bounds = array<i64: 1, 128>}, {pipeline_mode = #tpu.pipeline_mode<synchronous>, transform_indices = @transform_38, window_bounds = array<i64: 16, 128>}]} {
    %c0 = arith.constant 0 : index
    %c0_0 = arith.constant 0 : index
    %0 = vector.load %arg1[%c0, %c0_0] : memref<16x32xf32, #tpu.memory_space<vmem>>, vector<16x32xf32>
    %c0_1 = arith.constant 0 : index
    %c0_2 = arith.constant 0 : index
    %1 = vector.load %arg2[%c0_1, %c0_2] : memref<16x16xf32, #tpu.memory_space<vmem>>, vector<16x16xf32>
    %2 = tpu.iota {dimensions = array<i32: 1>} : vector<1x32xi32>
    %c0_i32 = arith.constant 0 : i32
    %3 = vector.broadcast %c0_i32 : i32 to vector<1x32xi32>
    %4 = arith.cmpi sge, %2, %3 : vector<1x32xi32>
    %c8_i32 = arith.constant 8 : i32
    %5 = vector.broadcast %c8_i32 : i32 to vector<1x32xi32>
    %6 = arith.cmpi slt, %2, %5 : vector<1x32xi32>
    %7 = arith.andi %4, %6 : vector<1x32xi1>
    %8 = arith.extui %7 : vector<1x32xi1> to vector<1x32xi32>
    %9 = arith.sitofp %8 : vector<1x32xi32> to vector<1x32xf32>
    %c8_i32_3 = arith.constant 8 : i32
    %10 = vector.broadcast %c8_i32_3 : i32 to vector<1x32xi32>
    %11 = arith.cmpi sge, %2, %10 : vector<1x32xi32>
    %c16_i32 = arith.constant 16 : i32
    %12 = vector.broadcast %c16_i32 : i32 to vector<1x32xi32>
    %13 = arith.cmpi slt, %2, %12 : vector<1x32xi32>
    %14 = arith.andi %11, %13 : vector<1x32xi1>
    %15 = arith.extui %14 : vector<1x32xi1> to vector<1x32xi32>
    %16 = arith.sitofp %15 : vector<1x32xi32> to vector<1x32xf32>
    %c16_i32_4 = arith.constant 16 : i32
    %17 = vector.broadcast %c16_i32_4 : i32 to vector<1x32xi32>
    %18 = arith.cmpi sge, %2, %17 : vector<1x32xi32>
    %c24_i32 = arith.constant 24 : i32
    %19 = vector.broadcast %c24_i32 : i32 to vector<1x32xi32>
    %20 = arith.cmpi slt, %2, %19 : vector<1x32xi32>
    %21 = arith.andi %18, %20 : vector<1x32xi1>
    %22 = arith.extui %21 : vector<1x32xi1> to vector<1x32xi32>
    %23 = arith.sitofp %22 : vector<1x32xi32> to vector<1x32xf32>
    %c24_i32_5 = arith.constant 24 : i32
    %24 = vector.broadcast %c24_i32_5 : i32 to vector<1x32xi32>
    %25 = arith.cmpi sge, %2, %24 : vector<1x32xi32>
    %c32_i32 = arith.constant 32 : i32
    %26 = vector.broadcast %c32_i32 : i32 to vector<1x32xi32>
    %27 = arith.cmpi slt, %2, %26 : vector<1x32xi32>
    %28 = arith.andi %25, %27 : vector<1x32xi1>
    %29 = arith.extui %28 : vector<1x32xi1> to vector<1x32xi32>
    %30 = arith.sitofp %29 : vector<1x32xi32> to vector<1x32xf32>
    %c0_6 = arith.constant 0 : index
    %c0_7 = arith.constant 0 : index
    %31 = vector.load %arg3[%c0_6, %c0_7] : memref<1x32xf32, #tpu.memory_space<vmem>>, vector<1x32xf32>
    %c0_8 = arith.constant 0 : index
    %c0_9 = arith.constant 0 : index
    %32 = vector.load %arg4[%c0_8, %c0_9] : memref<1x32xf32, #tpu.memory_space<vmem>>, vector<1x32xf32>
    %c0_10 = arith.constant 0 : index
    %c0_11 = arith.constant 0 : index
    %33 = vector.load %arg5[%c0_10, %c0_11] : memref<32x32xf32, #tpu.memory_space<vmem>>, vector<32x32xf32>
    %c0_12 = arith.constant 0 : index
    %c0_13 = arith.constant 0 : index
    %34 = vector.load %arg6[%c0_12, %c0_13] : memref<1x32xf32, #tpu.memory_space<vmem>>, vector<1x32xf32>
    %c0_14 = arith.constant 0 : index
    %c0_15 = arith.constant 0 : index
    %35 = vector.load %arg7[%c0_14, %c0_15] : memref<32x32xf32, #tpu.memory_space<vmem>>, vector<32x32xf32>
    %c0_16 = arith.constant 0 : index
    %c0_17 = arith.constant 0 : index
    %36 = vector.load %arg8[%c0_16, %c0_17] : memref<1x32xf32, #tpu.memory_space<vmem>>, vector<1x32xf32>
    %c0_18 = arith.constant 0 : index
    %c0_19 = arith.constant 0 : index
    %37 = vector.load %arg9[%c0_18, %c0_19] : memref<32x32xf32, #tpu.memory_space<vmem>>, vector<32x32xf32>
    %c0_20 = arith.constant 0 : index
    %c0_21 = arith.constant 0 : index
    %38 = vector.load %arg10[%c0_20, %c0_21] : memref<1x32xf32, #tpu.memory_space<vmem>>, vector<1x32xf32>
    %c0_22 = arith.constant 0 : index
    %c0_23 = arith.constant 0 : index
    %39 = vector.load %arg11[%c0_22, %c0_23] : memref<32x32xf32, #tpu.memory_space<vmem>>, vector<32x32xf32>
    %c0_24 = arith.constant 0 : index
    %c0_25 = arith.constant 0 : index
    %40 = vector.load %arg12[%c0_24, %c0_25] : memref<1x32xf32, #tpu.memory_space<vmem>>, vector<1x32xf32>
    %c0_26 = arith.constant 0 : index
    %c0_27 = arith.constant 0 : index
    %41 = vector.load %arg13[%c0_26, %c0_27] : memref<1x32xf32, #tpu.memory_space<vmem>>, vector<1x32xf32>
    %c0_28 = arith.constant 0 : index
    %c0_29 = arith.constant 0 : index
    %42 = vector.load %arg14[%c0_28, %c0_29] : memref<1x32xf32, #tpu.memory_space<vmem>>, vector<1x32xf32>
    %c0_30 = arith.constant 0 : index
    %c0_31 = arith.constant 0 : index
    %43 = vector.load %arg15[%c0_30, %c0_31] : memref<32x64xf32, #tpu.memory_space<vmem>>, vector<32x64xf32>
    %c0_32 = arith.constant 0 : index
    %c0_33 = arith.constant 0 : index
    %44 = vector.load %arg16[%c0_32, %c0_33] : memref<1x64xf32, #tpu.memory_space<vmem>>, vector<1x64xf32>
    %c0_34 = arith.constant 0 : index
    %c0_35 = arith.constant 0 : index
    %45 = vector.load %arg17[%c0_34, %c0_35] : memref<64x32xf32, #tpu.memory_space<vmem>>, vector<64x32xf32>
    %c0_36 = arith.constant 0 : index
    %c0_37 = arith.constant 0 : index
    %46 = vector.load %arg18[%c0_36, %c0_37] : memref<1x32xf32, #tpu.memory_space<vmem>>, vector<1x32xf32>
    %cst = arith.constant dense<0.000000e+00> : vector<16xf32>
    %47 = vector.multi_reduction <add>, %0, %cst [1] : vector<16x32xf32> to vector<16xf32>
    %48 = vector.shape_cast %47 : vector<16xf32> to vector<16x1xf32>
    %cst_38 = arith.constant 3.200000e+01 : f32
    %49 = vector.broadcast %cst_38 : f32 to vector<16x1xf32>
    %50 = arith.divf %48, %49 : vector<16x1xf32>
    %51 = vector.broadcast %50 : vector<16x1xf32> to vector<16x32xf32>
    %52 = arith.subf %0, %51 : vector<16x32xf32>
    %53 = arith.mulf %52, %52 : vector<16x32xf32>
    %cst_39 = arith.constant dense<0.000000e+00> : vector<16xf32>
    %54 = vector.multi_reduction <add>, %53, %cst_39 [1] : vector<16x32xf32> to vector<16xf32>
    %55 = vector.shape_cast %54 : vector<16xf32> to vector<16x1xf32>
    %cst_40 = arith.constant 0.0322580636 : f32
    %56 = vector.broadcast %cst_40 : f32 to vector<16x1xf32>
    %57 = arith.mulf %55, %56 : vector<16x1xf32>
    %58 = math.sqrt %57 : vector<16x1xf32>
    %cst_41 = arith.constant 9.99999974E-6 : f32
    %59 = vector.broadcast %cst_41 : f32 to vector<16x1xf32>
    %60 = arith.addf %58, %59 : vector<16x1xf32>
    %61 = tpu.reciprocal %60 {approx = true} : vector<16x1xf32> -> vector<16x1xf32>
    %62 = vector.broadcast %61 : vector<16x1xf32> to vector<16x32xf32>
    %63 = arith.mulf %52, %62 : vector<16x32xf32>
    %64 = vector.broadcast %31 : vector<1x32xf32> to vector<16x32xf32>
    %65 = arith.mulf %64, %63 : vector<16x32xf32>
    %66 = vector.broadcast %32 : vector<1x32xf32> to vector<16x32xf32>
    %67 = arith.addf %65, %66 : vector<16x32xf32>
    %cst_42 = arith.constant dense<0.000000e+00> : vector<16x32xf32>
    %68 = tpu.matmul %67, %33, %cst_42 {dimension_numbers = #tpu.dot_dimension_numbers<[1], [0], [0], [1], [0, 0, 1, 1], [], []>} : vector<16x32xf32>, vector<32x32xf32>, vector<16x32xf32> -> vector<16x32xf32>
    %69 = vector.broadcast %34 : vector<1x32xf32> to vector<16x32xf32>
    %70 = arith.addf %68, %69 : vector<16x32xf32>
    %cst_43 = arith.constant dense<0.000000e+00> : vector<16x32xf32>
    %71 = tpu.matmul %67, %35, %cst_43 {dimension_numbers = #tpu.dot_dimension_numbers<[1], [0], [0], [1], [0, 0, 1, 1], [], []>} : vector<16x32xf32>, vector<32x32xf32>, vector<16x32xf32> -> vector<16x32xf32>
    %72 = vector.broadcast %36 : vector<1x32xf32> to vector<16x32xf32>
    %73 = arith.addf %71, %72 : vector<16x32xf32>
    %cst_44 = arith.constant dense<0.000000e+00> : vector<16x32xf32>
    %74 = tpu.matmul %67, %37, %cst_44 {dimension_numbers = #tpu.dot_dimension_numbers<[1], [0], [0], [1], [0, 0, 1, 1], [], []>} : vector<16x32xf32>, vector<32x32xf32>, vector<16x32xf32> -> vector<16x32xf32>
    %75 = vector.broadcast %38 : vector<1x32xf32> to vector<16x32xf32>
    %76 = arith.addf %74, %75 : vector<16x32xf32>
    %cst_45 = arith.constant 0.000000e+00 : f32
    %77 = vector.broadcast %cst_45 : f32 to vector<16x32xf32>
    %78 = vector.broadcast %9 : vector<1x32xf32> to vector<16x32xf32>
    %79 = arith.mulf %70, %78 : vector<16x32xf32>
    %cst_46 = arith.constant dense<0.000000e+00> : vector<16x16xf32>
    %80 = tpu.matmul %79, %73, %cst_46 {dimension_numbers = #tpu.dot_dimension_numbers<[1], [1], [0], [0], [0, 0, 1, 0], [], []>} : vector<16x32xf32>, vector<16x32xf32>, vector<16x16xf32> -> vector<16x16xf32>
    %cst_47 = arith.constant 0.353553385 : f32
    %81 = vector.broadcast %cst_47 : f32 to vector<16x16xf32>
    %82 = arith.mulf %80, %81 : vector<16x16xf32>
    %83 = arith.addf %82, %1 : vector<16x16xf32>
    %cst_48 = arith.constant dense<0xFF800000> : vector<16xf32>
    %84 = vector.multi_reduction <maximumf>, %83, %cst_48 [1] : vector<16x16xf32> to vector<16xf32>
    %85 = vector.shape_cast %84 : vector<16xf32> to vector<16x1xf32>
    %86 = vector.broadcast %85 : vector<16x1xf32> to vector<16x16xf32>
    %87 = arith.subf %83, %86 : vector<16x16xf32>
    %88 = math.exp %87 : vector<16x16xf32>
    %cst_49 = arith.constant dense<0.000000e+00> : vector<16xf32>
    %89 = vector.multi_reduction <add>, %88, %cst_49 [1] : vector<16x16xf32> to vector<16xf32>
    %90 = vector.shape_cast %89 : vector<16xf32> to vector<16x1xf32>
    %91 = tpu.reciprocal %90 {approx = true} : vector<16x1xf32> -> vector<16x1xf32>
    %92 = vector.broadcast %91 : vector<16x1xf32> to vector<16x16xf32>
    %93 = arith.mulf %88, %92 : vector<16x16xf32>
    %94 = vector.broadcast %9 : vector<1x32xf32> to vector<16x32xf32>
    %95 = arith.mulf %76, %94 : vector<16x32xf32>
    %cst_50 = arith.constant dense<0.000000e+00> : vector<16x32xf32>
    %96 = tpu.matmul %93, %95, %cst_50 {dimension_numbers = #tpu.dot_dimension_numbers<[1], [0], [0], [1], [0, 0, 1, 1], [], []>} : vector<16x16xf32>, vector<16x32xf32>, vector<16x32xf32> -> vector<16x32xf32>
    %97 = arith.addf %77, %96 : vector<16x32xf32>
    %98 = vector.broadcast %16 : vector<1x32xf32> to vector<16x32xf32>
    %99 = arith.mulf %70, %98 : vector<16x32xf32>
    %cst_51 = arith.constant dense<0.000000e+00> : vector<16x16xf32>
    %100 = tpu.matmul %99, %73, %cst_51 {dimension_numbers = #tpu.dot_dimension_numbers<[1], [1], [0], [0], [0, 0, 1, 0], [], []>} : vector<16x32xf32>, vector<16x32xf32>, vector<16x16xf32> -> vector<16x16xf32>
    %cst_52 = arith.constant 0.353553385 : f32
    %101 = vector.broadcast %cst_52 : f32 to vector<16x16xf32>
    %102 = arith.mulf %100, %101 : vector<16x16xf32>
    %103 = arith.addf %102, %1 : vector<16x16xf32>
    %cst_53 = arith.constant dense<0xFF800000> : vector<16xf32>
    %104 = vector.multi_reduction <maximumf>, %103, %cst_53 [1] : vector<16x16xf32> to vector<16xf32>
    %105 = vector.shape_cast %104 : vector<16xf32> to vector<16x1xf32>
    %106 = vector.broadcast %105 : vector<16x1xf32> to vector<16x16xf32>
    %107 = arith.subf %103, %106 : vector<16x16xf32>
    %108 = math.exp %107 : vector<16x16xf32>
    %cst_54 = arith.constant dense<0.000000e+00> : vector<16xf32>
    %109 = vector.multi_reduction <add>, %108, %cst_54 [1] : vector<16x16xf32> to vector<16xf32>
    %110 = vector.shape_cast %109 : vector<16xf32> to vector<16x1xf32>
    %111 = tpu.reciprocal %110 {approx = true} : vector<16x1xf32> -> vector<16x1xf32>
    %112 = vector.broadcast %111 : vector<16x1xf32> to vector<16x16xf32>
    %113 = arith.mulf %108, %112 : vector<16x16xf32>
    %114 = vector.broadcast %16 : vector<1x32xf32> to vector<16x32xf32>
    %115 = arith.mulf %76, %114 : vector<16x32xf32>
    %cst_55 = arith.constant dense<0.000000e+00> : vector<16x32xf32>
    %116 = tpu.matmul %113, %115, %cst_55 {dimension_numbers = #tpu.dot_dimension_numbers<[1], [0], [0], [1], [0, 0, 1, 1], [], []>} : vector<16x16xf32>, vector<16x32xf32>, vector<16x32xf32> -> vector<16x32xf32>
    %117 = arith.addf %97, %116 : vector<16x32xf32>
    %118 = vector.broadcast %23 : vector<1x32xf32> to vector<16x32xf32>
    %119 = arith.mulf %70, %118 : vector<16x32xf32>
    %cst_56 = arith.constant dense<0.000000e+00> : vector<16x16xf32>
    %120 = tpu.matmul %119, %73, %cst_56 {dimension_numbers = #tpu.dot_dimension_numbers<[1], [1], [0], [0], [0, 0, 1, 0], [], []>} : vector<16x32xf32>, vector<16x32xf32>, vector<16x16xf32> -> vector<16x16xf32>
    %cst_57 = arith.constant 0.353553385 : f32
    %121 = vector.broadcast %cst_57 : f32 to vector<16x16xf32>
    %122 = arith.mulf %120, %121 : vector<16x16xf32>
    %123 = arith.addf %122, %1 : vector<16x16xf32>
    %cst_58 = arith.constant dense<0xFF800000> : vector<16xf32>
    %124 = vector.multi_reduction <maximumf>, %123, %cst_58 [1] : vector<16x16xf32> to vector<16xf32>
    %125 = vector.shape_cast %124 : vector<16xf32> to vector<16x1xf32>
    %126 = vector.broadcast %125 : vector<16x1xf32> to vector<16x16xf32>
    %127 = arith.subf %123, %126 : vector<16x16xf32>
    %128 = math.exp %127 : vector<16x16xf32>
    %cst_59 = arith.constant dense<0.000000e+00> : vector<16xf32>
    %129 = vector.multi_reduction <add>, %128, %cst_59 [1] : vector<16x16xf32> to vector<16xf32>
    %130 = vector.shape_cast %129 : vector<16xf32> to vector<16x1xf32>
    %131 = tpu.reciprocal %130 {approx = true} : vector<16x1xf32> -> vector<16x1xf32>
    %132 = vector.broadcast %131 : vector<16x1xf32> to vector<16x16xf32>
    %133 = arith.mulf %128, %132 : vector<16x16xf32>
    %134 = vector.broadcast %23 : vector<1x32xf32> to vector<16x32xf32>
    %135 = arith.mulf %76, %134 : vector<16x32xf32>
    %cst_60 = arith.constant dense<0.000000e+00> : vector<16x32xf32>
    %136 = tpu.matmul %133, %135, %cst_60 {dimension_numbers = #tpu.dot_dimension_numbers<[1], [0], [0], [1], [0, 0, 1, 1], [], []>} : vector<16x16xf32>, vector<16x32xf32>, vector<16x32xf32> -> vector<16x32xf32>
    %137 = arith.addf %117, %136 : vector<16x32xf32>
    %138 = vector.broadcast %30 : vector<1x32xf32> to vector<16x32xf32>
    %139 = arith.mulf %70, %138 : vector<16x32xf32>
    %cst_61 = arith.constant dense<0.000000e+00> : vector<16x16xf32>
    %140 = tpu.matmul %139, %73, %cst_61 {dimension_numbers = #tpu.dot_dimension_numbers<[1], [1], [0], [0], [0, 0, 1, 0], [], []>} : vector<16x32xf32>, vector<16x32xf32>, vector<16x16xf32> -> vector<16x16xf32>
    %cst_62 = arith.constant 0.353553385 : f32
    %141 = vector.broadcast %cst_62 : f32 to vector<16x16xf32>
    %142 = arith.mulf %140, %141 : vector<16x16xf32>
    %143 = arith.addf %142, %1 : vector<16x16xf32>
    %cst_63 = arith.constant dense<0xFF800000> : vector<16xf32>
    %144 = vector.multi_reduction <maximumf>, %143, %cst_63 [1] : vector<16x16xf32> to vector<16xf32>
    %145 = vector.shape_cast %144 : vector<16xf32> to vector<16x1xf32>
    %146 = vector.broadcast %145 : vector<16x1xf32> to vector<16x16xf32>
    %147 = arith.subf %143, %146 : vector<16x16xf32>
    %148 = math.exp %147 : vector<16x16xf32>
    %cst_64 = arith.constant dense<0.000000e+00> : vector<16xf32>
    %149 = vector.multi_reduction <add>, %148, %cst_64 [1] : vector<16x16xf32> to vector<16xf32>
    %150 = vector.shape_cast %149 : vector<16xf32> to vector<16x1xf32>
    %151 = tpu.reciprocal %150 {approx = true} : vector<16x1xf32> -> vector<16x1xf32>
    %152 = vector.broadcast %151 : vector<16x1xf32> to vector<16x16xf32>
    %153 = arith.mulf %148, %152 : vector<16x16xf32>
    %154 = vector.broadcast %30 : vector<1x32xf32> to vector<16x32xf32>
    %155 = arith.mulf %76, %154 : vector<16x32xf32>
    %cst_65 = arith.constant dense<0.000000e+00> : vector<16x32xf32>
    %156 = tpu.matmul %153, %155, %cst_65 {dimension_numbers = #tpu.dot_dimension_numbers<[1], [0], [0], [1], [0, 0, 1, 1], [], []>} : vector<16x16xf32>, vector<16x32xf32>, vector<16x32xf32> -> vector<16x32xf32>
    %157 = arith.addf %137, %156 : vector<16x32xf32>
    %cst_66 = arith.constant dense<0.000000e+00> : vector<16x32xf32>
    %158 = tpu.matmul %157, %39, %cst_66 {dimension_numbers = #tpu.dot_dimension_numbers<[1], [0], [0], [1], [0, 0, 1, 1], [], []>} : vector<16x32xf32>, vector<32x32xf32>, vector<16x32xf32> -> vector<16x32xf32>
    %159 = arith.addf %0, %158 : vector<16x32xf32>
    %160 = vector.broadcast %40 : vector<1x32xf32> to vector<16x32xf32>
    %161 = arith.addf %159, %160 : vector<16x32xf32>
    %cst_67 = arith.constant dense<0.000000e+00> : vector<16xf32>
    %162 = vector.multi_reduction <add>, %161, %cst_67 [1] : vector<16x32xf32> to vector<16xf32>
    %163 = vector.shape_cast %162 : vector<16xf32> to vector<16x1xf32>
    %cst_68 = arith.constant 3.200000e+01 : f32
    %164 = vector.broadcast %cst_68 : f32 to vector<16x1xf32>
    %165 = arith.divf %163, %164 : vector<16x1xf32>
    %166 = vector.broadcast %165 : vector<16x1xf32> to vector<16x32xf32>
    %167 = arith.subf %161, %166 : vector<16x32xf32>
    %168 = arith.mulf %167, %167 : vector<16x32xf32>
    %cst_69 = arith.constant dense<0.000000e+00> : vector<16xf32>
    %169 = vector.multi_reduction <add>, %168, %cst_69 [1] : vector<16x32xf32> to vector<16xf32>
    %170 = vector.shape_cast %169 : vector<16xf32> to vector<16x1xf32>
    %cst_70 = arith.constant 0.0322580636 : f32
    %171 = vector.broadcast %cst_70 : f32 to vector<16x1xf32>
    %172 = arith.mulf %170, %171 : vector<16x1xf32>
    %173 = math.sqrt %172 : vector<16x1xf32>
    %cst_71 = arith.constant 9.99999974E-6 : f32
    %174 = vector.broadcast %cst_71 : f32 to vector<16x1xf32>
    %175 = arith.addf %173, %174 : vector<16x1xf32>
    %176 = tpu.reciprocal %175 {approx = true} : vector<16x1xf32> -> vector<16x1xf32>
    %177 = vector.broadcast %176 : vector<16x1xf32> to vector<16x32xf32>
    %178 = arith.mulf %167, %177 : vector<16x32xf32>
    %179 = vector.broadcast %41 : vector<1x32xf32> to vector<16x32xf32>
    %180 = arith.mulf %179, %178 : vector<16x32xf32>
    %181 = vector.broadcast %42 : vector<1x32xf32> to vector<16x32xf32>
    %182 = arith.addf %180, %181 : vector<16x32xf32>
    %cst_72 = arith.constant dense<0.000000e+00> : vector<16x64xf32>
    %183 = tpu.matmul %182, %43, %cst_72 {dimension_numbers = #tpu.dot_dimension_numbers<[1], [0], [0], [1], [0, 0, 1, 1], [], []>} : vector<16x32xf32>, vector<32x64xf32>, vector<16x64xf32> -> vector<16x64xf32>
    %184 = vector.broadcast %44 : vector<1x64xf32> to vector<16x64xf32>
    %185 = arith.addf %183, %184 : vector<16x64xf32>
    %186 = arith.negf %185 : vector<16x64xf32>
    %187 = math.exp %186 : vector<16x64xf32>
    %cst_73 = arith.constant 1.000000e+00 : f32
    %188 = vector.broadcast %cst_73 : f32 to vector<16x64xf32>
    %189 = arith.addf %188, %187 : vector<16x64xf32>
    %190 = arith.divf %188, %189 : vector<16x64xf32>
    %191 = arith.mulf %185, %190 : vector<16x64xf32>
    %cst_74 = arith.constant dense<0.000000e+00> : vector<16x32xf32>
    %192 = tpu.matmul %191, %45, %cst_74 {dimension_numbers = #tpu.dot_dimension_numbers<[1], [0], [0], [1], [0, 0, 1, 1], [], []>} : vector<16x64xf32>, vector<64x32xf32>, vector<16x32xf32> -> vector<16x32xf32>
    %193 = arith.addf %161, %192 : vector<16x32xf32>
    %194 = vector.broadcast %46 : vector<1x32xf32> to vector<16x32xf32>
    %195 = arith.addf %193, %194 : vector<16x32xf32>
    %c0_75 = arith.constant 0 : index
    %c0_76 = arith.constant 0 : index
    %196 = vector.load %arg19[%c0_75, %c0_76] : memref<1x32xf32, #tpu.memory_space<vmem>>, vector<1x32xf32>
    %c0_77 = arith.constant 0 : index
    %c0_78 = arith.constant 0 : index
    %197 = vector.load %arg20[%c0_77, %c0_78] : memref<1x32xf32, #tpu.memory_space<vmem>>, vector<1x32xf32>
    %c0_79 = arith.constant 0 : index
    %c0_80 = arith.constant 0 : index
    %198 = vector.load %arg21[%c0_79, %c0_80] : memref<32x32xf32, #tpu.memory_space<vmem>>, vector<32x32xf32>
    %c0_81 = arith.constant 0 : index
    %c0_82 = arith.constant 0 : index
    %199 = vector.load %arg22[%c0_81, %c0_82] : memref<1x32xf32, #tpu.memory_space<vmem>>, vector<1x32xf32>
    %c0_83 = arith.constant 0 : index
    %c0_84 = arith.constant 0 : index
    %200 = vector.load %arg23[%c0_83, %c0_84] : memref<32x32xf32, #tpu.memory_space<vmem>>, vector<32x32xf32>
    %c0_85 = arith.constant 0 : index
    %c0_86 = arith.constant 0 : index
    %201 = vector.load %arg24[%c0_85, %c0_86] : memref<1x32xf32, #tpu.memory_space<vmem>>, vector<1x32xf32>
    %c0_87 = arith.constant 0 : index
    %c0_88 = arith.constant 0 : index
    %202 = vector.load %arg25[%c0_87, %c0_88] : memref<32x32xf32, #tpu.memory_space<vmem>>, vector<32x32xf32>
    %c0_89 = arith.constant 0 : index
    %c0_90 = arith.constant 0 : index
    %203 = vector.load %arg26[%c0_89, %c0_90] : memref<1x32xf32, #tpu.memory_space<vmem>>, vector<1x32xf32>
    %c0_91 = arith.constant 0 : index
    %c0_92 = arith.constant 0 : index
    %204 = vector.load %arg27[%c0_91, %c0_92] : memref<32x32xf32, #tpu.memory_space<vmem>>, vector<32x32xf32>
    %c0_93 = arith.constant 0 : index
    %c0_94 = arith.constant 0 : index
    %205 = vector.load %arg28[%c0_93, %c0_94] : memref<1x32xf32, #tpu.memory_space<vmem>>, vector<1x32xf32>
    %c0_95 = arith.constant 0 : index
    %c0_96 = arith.constant 0 : index
    %206 = vector.load %arg29[%c0_95, %c0_96] : memref<1x32xf32, #tpu.memory_space<vmem>>, vector<1x32xf32>
    %c0_97 = arith.constant 0 : index
    %c0_98 = arith.constant 0 : index
    %207 = vector.load %arg30[%c0_97, %c0_98] : memref<1x32xf32, #tpu.memory_space<vmem>>, vector<1x32xf32>
    %c0_99 = arith.constant 0 : index
    %c0_100 = arith.constant 0 : index
    %208 = vector.load %arg31[%c0_99, %c0_100] : memref<32x64xf32, #tpu.memory_space<vmem>>, vector<32x64xf32>
    %c0_101 = arith.constant 0 : index
    %c0_102 = arith.constant 0 : index
    %209 = vector.load %arg32[%c0_101, %c0_102] : memref<1x64xf32, #tpu.memory_space<vmem>>, vector<1x64xf32>
    %c0_103 = arith.constant 0 : index
    %c0_104 = arith.constant 0 : index
    %210 = vector.load %arg33[%c0_103, %c0_104] : memref<64x32xf32, #tpu.memory_space<vmem>>, vector<64x32xf32>
    %c0_105 = arith.constant 0 : index
    %c0_106 = arith.constant 0 : index
    %211 = vector.load %arg34[%c0_105, %c0_106] : memref<1x32xf32, #tpu.memory_space<vmem>>, vector<1x32xf32>
    %cst_107 = arith.constant dense<0.000000e+00> : vector<16xf32>
    %212 = vector.multi_reduction <add>, %195, %cst_107 [1] : vector<16x32xf32> to vector<16xf32>
    %213 = vector.shape_cast %212 : vector<16xf32> to vector<16x1xf32>
    %cst_108 = arith.constant 3.200000e+01 : f32
    %214 = vector.broadcast %cst_108 : f32 to vector<16x1xf32>
    %215 = arith.divf %213, %214 : vector<16x1xf32>
    %216 = vector.broadcast %215 : vector<16x1xf32> to vector<16x32xf32>
    %217 = arith.subf %195, %216 : vector<16x32xf32>
    %218 = arith.mulf %217, %217 : vector<16x32xf32>
    %cst_109 = arith.constant dense<0.000000e+00> : vector<16xf32>
    %219 = vector.multi_reduction <add>, %218, %cst_109 [1] : vector<16x32xf32> to vector<16xf32>
    %220 = vector.shape_cast %219 : vector<16xf32> to vector<16x1xf32>
    %cst_110 = arith.constant 0.0322580636 : f32
    %221 = vector.broadcast %cst_110 : f32 to vector<16x1xf32>
    %222 = arith.mulf %220, %221 : vector<16x1xf32>
    %223 = math.sqrt %222 : vector<16x1xf32>
    %cst_111 = arith.constant 9.99999974E-6 : f32
    %224 = vector.broadcast %cst_111 : f32 to vector<16x1xf32>
    %225 = arith.addf %223, %224 : vector<16x1xf32>
    %226 = tpu.reciprocal %225 {approx = true} : vector<16x1xf32> -> vector<16x1xf32>
    %227 = vector.broadcast %226 : vector<16x1xf32> to vector<16x32xf32>
    %228 = arith.mulf %217, %227 : vector<16x32xf32>
    %229 = vector.broadcast %196 : vector<1x32xf32> to vector<16x32xf32>
    %230 = arith.mulf %229, %228 : vector<16x32xf32>
    %231 = vector.broadcast %197 : vector<1x32xf32> to vector<16x32xf32>
    %232 = arith.addf %230, %231 : vector<16x32xf32>
    %cst_112 = arith.constant dense<0.000000e+00> : vector<16x32xf32>
    %233 = tpu.matmul %232, %198, %cst_112 {dimension_numbers = #tpu.dot_dimension_numbers<[1], [0], [0], [1], [0, 0, 1, 1], [], []>} : vector<16x32xf32>, vector<32x32xf32>, vector<16x32xf32> -> vector<16x32xf32>
    %234 = vector.broadcast %199 : vector<1x32xf32> to vector<16x32xf32>
    %235 = arith.addf %233, %234 : vector<16x32xf32>
    %cst_113 = arith.constant dense<0.000000e+00> : vector<16x32xf32>
    %236 = tpu.matmul %232, %200, %cst_113 {dimension_numbers = #tpu.dot_dimension_numbers<[1], [0], [0], [1], [0, 0, 1, 1], [], []>} : vector<16x32xf32>, vector<32x32xf32>, vector<16x32xf32> -> vector<16x32xf32>
    %237 = vector.broadcast %201 : vector<1x32xf32> to vector<16x32xf32>
    %238 = arith.addf %236, %237 : vector<16x32xf32>
    %cst_114 = arith.constant dense<0.000000e+00> : vector<16x32xf32>
    %239 = tpu.matmul %232, %202, %cst_114 {dimension_numbers = #tpu.dot_dimension_numbers<[1], [0], [0], [1], [0, 0, 1, 1], [], []>} : vector<16x32xf32>, vector<32x32xf32>, vector<16x32xf32> -> vector<16x32xf32>
    %240 = vector.broadcast %203 : vector<1x32xf32> to vector<16x32xf32>
    %241 = arith.addf %239, %240 : vector<16x32xf32>
    %cst_115 = arith.constant 0.000000e+00 : f32
    %242 = vector.broadcast %cst_115 : f32 to vector<16x32xf32>
    %243 = vector.broadcast %9 : vector<1x32xf32> to vector<16x32xf32>
    %244 = arith.mulf %235, %243 : vector<16x32xf32>
    %cst_116 = arith.constant dense<0.000000e+00> : vector<16x16xf32>
    %245 = tpu.matmul %244, %238, %cst_116 {dimension_numbers = #tpu.dot_dimension_numbers<[1], [1], [0], [0], [0, 0, 1, 0], [], []>} : vector<16x32xf32>, vector<16x32xf32>, vector<16x16xf32> -> vector<16x16xf32>
    %cst_117 = arith.constant 0.353553385 : f32
    %246 = vector.broadcast %cst_117 : f32 to vector<16x16xf32>
    %247 = arith.mulf %245, %246 : vector<16x16xf32>
    %248 = arith.addf %247, %1 : vector<16x16xf32>
    %cst_118 = arith.constant dense<0xFF800000> : vector<16xf32>
    %249 = vector.multi_reduction <maximumf>, %248, %cst_118 [1] : vector<16x16xf32> to vector<16xf32>
    %250 = vector.shape_cast %249 : vector<16xf32> to vector<16x1xf32>
    %251 = vector.broadcast %250 : vector<16x1xf32> to vector<16x16xf32>
    %252 = arith.subf %248, %251 : vector<16x16xf32>
    %253 = math.exp %252 : vector<16x16xf32>
    %cst_119 = arith.constant dense<0.000000e+00> : vector<16xf32>
    %254 = vector.multi_reduction <add>, %253, %cst_119 [1] : vector<16x16xf32> to vector<16xf32>
    %255 = vector.shape_cast %254 : vector<16xf32> to vector<16x1xf32>
    %256 = tpu.reciprocal %255 {approx = true} : vector<16x1xf32> -> vector<16x1xf32>
    %257 = vector.broadcast %256 : vector<16x1xf32> to vector<16x16xf32>
    %258 = arith.mulf %253, %257 : vector<16x16xf32>
    %259 = vector.broadcast %9 : vector<1x32xf32> to vector<16x32xf32>
    %260 = arith.mulf %241, %259 : vector<16x32xf32>
    %cst_120 = arith.constant dense<0.000000e+00> : vector<16x32xf32>
    %261 = tpu.matmul %258, %260, %cst_120 {dimension_numbers = #tpu.dot_dimension_numbers<[1], [0], [0], [1], [0, 0, 1, 1], [], []>} : vector<16x16xf32>, vector<16x32xf32>, vector<16x32xf32> -> vector<16x32xf32>
    %262 = arith.addf %242, %261 : vector<16x32xf32>
    %263 = vector.broadcast %16 : vector<1x32xf32> to vector<16x32xf32>
    %264 = arith.mulf %235, %263 : vector<16x32xf32>
    %cst_121 = arith.constant dense<0.000000e+00> : vector<16x16xf32>
    %265 = tpu.matmul %264, %238, %cst_121 {dimension_numbers = #tpu.dot_dimension_numbers<[1], [1], [0], [0], [0, 0, 1, 0], [], []>} : vector<16x32xf32>, vector<16x32xf32>, vector<16x16xf32> -> vector<16x16xf32>
    %cst_122 = arith.constant 0.353553385 : f32
    %266 = vector.broadcast %cst_122 : f32 to vector<16x16xf32>
    %267 = arith.mulf %265, %266 : vector<16x16xf32>
    %268 = arith.addf %267, %1 : vector<16x16xf32>
    %cst_123 = arith.constant dense<0xFF800000> : vector<16xf32>
    %269 = vector.multi_reduction <maximumf>, %268, %cst_123 [1] : vector<16x16xf32> to vector<16xf32>
    %270 = vector.shape_cast %269 : vector<16xf32> to vector<16x1xf32>
    %271 = vector.broadcast %270 : vector<16x1xf32> to vector<16x16xf32>
    %272 = arith.subf %268, %271 : vector<16x16xf32>
    %273 = math.exp %272 : vector<16x16xf32>
    %cst_124 = arith.constant dense<0.000000e+00> : vector<16xf32>
    %274 = vector.multi_reduction <add>, %273, %cst_124 [1] : vector<16x16xf32> to vector<16xf32>
    %275 = vector.shape_cast %274 : vector<16xf32> to vector<16x1xf32>
    %276 = tpu.reciprocal %275 {approx = true} : vector<16x1xf32> -> vector<16x1xf32>
    %277 = vector.broadcast %276 : vector<16x1xf32> to vector<16x16xf32>
    %278 = arith.mulf %273, %277 : vector<16x16xf32>
    %279 = vector.broadcast %16 : vector<1x32xf32> to vector<16x32xf32>
    %280 = arith.mulf %241, %279 : vector<16x32xf32>
    %cst_125 = arith.constant dense<0.000000e+00> : vector<16x32xf32>
    %281 = tpu.matmul %278, %280, %cst_125 {dimension_numbers = #tpu.dot_dimension_numbers<[1], [0], [0], [1], [0, 0, 1, 1], [], []>} : vector<16x16xf32>, vector<16x32xf32>, vector<16x32xf32> -> vector<16x32xf32>
    %282 = arith.addf %262, %281 : vector<16x32xf32>
    %283 = vector.broadcast %23 : vector<1x32xf32> to vector<16x32xf32>
    %284 = arith.mulf %235, %283 : vector<16x32xf32>
    %cst_126 = arith.constant dense<0.000000e+00> : vector<16x16xf32>
    %285 = tpu.matmul %284, %238, %cst_126 {dimension_numbers = #tpu.dot_dimension_numbers<[1], [1], [0], [0], [0, 0, 1, 0], [], []>} : vector<16x32xf32>, vector<16x32xf32>, vector<16x16xf32> -> vector<16x16xf32>
    %cst_127 = arith.constant 0.353553385 : f32
    %286 = vector.broadcast %cst_127 : f32 to vector<16x16xf32>
    %287 = arith.mulf %285, %286 : vector<16x16xf32>
    %288 = arith.addf %287, %1 : vector<16x16xf32>
    %cst_128 = arith.constant dense<0xFF800000> : vector<16xf32>
    %289 = vector.multi_reduction <maximumf>, %288, %cst_128 [1] : vector<16x16xf32> to vector<16xf32>
    %290 = vector.shape_cast %289 : vector<16xf32> to vector<16x1xf32>
    %291 = vector.broadcast %290 : vector<16x1xf32> to vector<16x16xf32>
    %292 = arith.subf %288, %291 : vector<16x16xf32>
    %293 = math.exp %292 : vector<16x16xf32>
    %cst_129 = arith.constant dense<0.000000e+00> : vector<16xf32>
    %294 = vector.multi_reduction <add>, %293, %cst_129 [1] : vector<16x16xf32> to vector<16xf32>
    %295 = vector.shape_cast %294 : vector<16xf32> to vector<16x1xf32>
    %296 = tpu.reciprocal %295 {approx = true} : vector<16x1xf32> -> vector<16x1xf32>
    %297 = vector.broadcast %296 : vector<16x1xf32> to vector<16x16xf32>
    %298 = arith.mulf %293, %297 : vector<16x16xf32>
    %299 = vector.broadcast %23 : vector<1x32xf32> to vector<16x32xf32>
    %300 = arith.mulf %241, %299 : vector<16x32xf32>
    %cst_130 = arith.constant dense<0.000000e+00> : vector<16x32xf32>
    %301 = tpu.matmul %298, %300, %cst_130 {dimension_numbers = #tpu.dot_dimension_numbers<[1], [0], [0], [1], [0, 0, 1, 1], [], []>} : vector<16x16xf32>, vector<16x32xf32>, vector<16x32xf32> -> vector<16x32xf32>
    %302 = arith.addf %282, %301 : vector<16x32xf32>
    %303 = vector.broadcast %30 : vector<1x32xf32> to vector<16x32xf32>
    %304 = arith.mulf %235, %303 : vector<16x32xf32>
    %cst_131 = arith.constant dense<0.000000e+00> : vector<16x16xf32>
    %305 = tpu.matmul %304, %238, %cst_131 {dimension_numbers = #tpu.dot_dimension_numbers<[1], [1], [0], [0], [0, 0, 1, 0], [], []>} : vector<16x32xf32>, vector<16x32xf32>, vector<16x16xf32> -> vector<16x16xf32>
    %cst_132 = arith.constant 0.353553385 : f32
    %306 = vector.broadcast %cst_132 : f32 to vector<16x16xf32>
    %307 = arith.mulf %305, %306 : vector<16x16xf32>
    %308 = arith.addf %307, %1 : vector<16x16xf32>
    %cst_133 = arith.constant dense<0xFF800000> : vector<16xf32>
    %309 = vector.multi_reduction <maximumf>, %308, %cst_133 [1] : vector<16x16xf32> to vector<16xf32>
    %310 = vector.shape_cast %309 : vector<16xf32> to vector<16x1xf32>
    %311 = vector.broadcast %310 : vector<16x1xf32> to vector<16x16xf32>
    %312 = arith.subf %308, %311 : vector<16x16xf32>
    %313 = math.exp %312 : vector<16x16xf32>
    %cst_134 = arith.constant dense<0.000000e+00> : vector<16xf32>
    %314 = vector.multi_reduction <add>, %313, %cst_134 [1] : vector<16x16xf32> to vector<16xf32>
    %315 = vector.shape_cast %314 : vector<16xf32> to vector<16x1xf32>
    %316 = tpu.reciprocal %315 {approx = true} : vector<16x1xf32> -> vector<16x1xf32>
    %317 = vector.broadcast %316 : vector<16x1xf32> to vector<16x16xf32>
    %318 = arith.mulf %313, %317 : vector<16x16xf32>
    %319 = vector.broadcast %30 : vector<1x32xf32> to vector<16x32xf32>
    %320 = arith.mulf %241, %319 : vector<16x32xf32>
    %cst_135 = arith.constant dense<0.000000e+00> : vector<16x32xf32>
    %321 = tpu.matmul %318, %320, %cst_135 {dimension_numbers = #tpu.dot_dimension_numbers<[1], [0], [0], [1], [0, 0, 1, 1], [], []>} : vector<16x16xf32>, vector<16x32xf32>, vector<16x32xf32> -> vector<16x32xf32>
    %322 = arith.addf %302, %321 : vector<16x32xf32>
    %cst_136 = arith.constant dense<0.000000e+00> : vector<16x32xf32>
    %323 = tpu.matmul %322, %204, %cst_136 {dimension_numbers = #tpu.dot_dimension_numbers<[1], [0], [0], [1], [0, 0, 1, 1], [], []>} : vector<16x32xf32>, vector<32x32xf32>, vector<16x32xf32> -> vector<16x32xf32>
    %324 = arith.addf %195, %323 : vector<16x32xf32>
    %325 = vector.broadcast %205 : vector<1x32xf32> to vector<16x32xf32>
    %326 = arith.addf %324, %325 : vector<16x32xf32>
    %cst_137 = arith.constant dense<0.000000e+00> : vector<16xf32>
    %327 = vector.multi_reduction <add>, %326, %cst_137 [1] : vector<16x32xf32> to vector<16xf32>
    %328 = vector.shape_cast %327 : vector<16xf32> to vector<16x1xf32>
    %cst_138 = arith.constant 3.200000e+01 : f32
    %329 = vector.broadcast %cst_138 : f32 to vector<16x1xf32>
    %330 = arith.divf %328, %329 : vector<16x1xf32>
    %331 = vector.broadcast %330 : vector<16x1xf32> to vector<16x32xf32>
    %332 = arith.subf %326, %331 : vector<16x32xf32>
    %333 = arith.mulf %332, %332 : vector<16x32xf32>
    %cst_139 = arith.constant dense<0.000000e+00> : vector<16xf32>
    %334 = vector.multi_reduction <add>, %333, %cst_139 [1] : vector<16x32xf32> to vector<16xf32>
    %335 = vector.shape_cast %334 : vector<16xf32> to vector<16x1xf32>
    %cst_140 = arith.constant 0.0322580636 : f32
    %336 = vector.broadcast %cst_140 : f32 to vector<16x1xf32>
    %337 = arith.mulf %335, %336 : vector<16x1xf32>
    %338 = math.sqrt %337 : vector<16x1xf32>
    %cst_141 = arith.constant 9.99999974E-6 : f32
    %339 = vector.broadcast %cst_141 : f32 to vector<16x1xf32>
    %340 = arith.addf %338, %339 : vector<16x1xf32>
    %341 = tpu.reciprocal %340 {approx = true} : vector<16x1xf32> -> vector<16x1xf32>
    %342 = vector.broadcast %341 : vector<16x1xf32> to vector<16x32xf32>
    %343 = arith.mulf %332, %342 : vector<16x32xf32>
    %344 = vector.broadcast %206 : vector<1x32xf32> to vector<16x32xf32>
    %345 = arith.mulf %344, %343 : vector<16x32xf32>
    %346 = vector.broadcast %207 : vector<1x32xf32> to vector<16x32xf32>
    %347 = arith.addf %345, %346 : vector<16x32xf32>
    %cst_142 = arith.constant dense<0.000000e+00> : vector<16x64xf32>
    %348 = tpu.matmul %347, %208, %cst_142 {dimension_numbers = #tpu.dot_dimension_numbers<[1], [0], [0], [1], [0, 0, 1, 1], [], []>} : vector<16x32xf32>, vector<32x64xf32>, vector<16x64xf32> -> vector<16x64xf32>
    %349 = vector.broadcast %209 : vector<1x64xf32> to vector<16x64xf32>
    %350 = arith.addf %348, %349 : vector<16x64xf32>
    %351 = arith.negf %350 : vector<16x64xf32>
    %352 = math.exp %351 : vector<16x64xf32>
    %cst_143 = arith.constant 1.000000e+00 : f32
    %353 = vector.broadcast %cst_143 : f32 to vector<16x64xf32>
    %354 = arith.addf %353, %352 : vector<16x64xf32>
    %355 = arith.divf %353, %354 : vector<16x64xf32>
    %356 = arith.mulf %350, %355 : vector<16x64xf32>
    %cst_144 = arith.constant dense<0.000000e+00> : vector<16x32xf32>
    %357 = tpu.matmul %356, %210, %cst_144 {dimension_numbers = #tpu.dot_dimension_numbers<[1], [0], [0], [1], [0, 0, 1, 1], [], []>} : vector<16x64xf32>, vector<64x32xf32>, vector<16x32xf32> -> vector<16x32xf32>
    %358 = arith.addf %326, %357 : vector<16x32xf32>
    %359 = vector.broadcast %211 : vector<1x32xf32> to vector<16x32xf32>
    %360 = arith.addf %358, %359 : vector<16x32xf32>
    %c0_145 = arith.constant 0 : index
    %c0_146 = arith.constant 0 : index
    %361 = vector.load %arg35[%c0_145, %c0_146] : memref<1x32xf32, #tpu.memory_space<vmem>>, vector<1x32xf32>
    %c0_147 = arith.constant 0 : index
    %c0_148 = arith.constant 0 : index
    %362 = vector.load %arg36[%c0_147, %c0_148] : memref<1x32xf32, #tpu.memory_space<vmem>>, vector<1x32xf32>
    %c0_149 = arith.constant 0 : index
    %c0_150 = arith.constant 0 : index
    %363 = vector.load %arg37[%c0_149, %c0_150] : memref<32x128xf32, #tpu.memory_space<vmem>>, vector<32x128xf32>
    %c0_151 = arith.constant 0 : index
    %c0_152 = arith.constant 0 : index
    %364 = vector.load %arg38[%c0_151, %c0_152] : memref<1x128xf32, #tpu.memory_space<vmem>>, vector<1x128xf32>
    %cst_153 = arith.constant dense<0.000000e+00> : vector<16xf32>
    %365 = vector.multi_reduction <add>, %360, %cst_153 [1] : vector<16x32xf32> to vector<16xf32>
    %366 = vector.shape_cast %365 : vector<16xf32> to vector<16x1xf32>
    %cst_154 = arith.constant 3.200000e+01 : f32
    %367 = vector.broadcast %cst_154 : f32 to vector<16x1xf32>
    %368 = arith.divf %366, %367 : vector<16x1xf32>
    %369 = vector.broadcast %368 : vector<16x1xf32> to vector<16x32xf32>
    %370 = arith.subf %360, %369 : vector<16x32xf32>
    %371 = arith.mulf %370, %370 : vector<16x32xf32>
    %cst_155 = arith.constant dense<0.000000e+00> : vector<16xf32>
    %372 = vector.multi_reduction <add>, %371, %cst_155 [1] : vector<16x32xf32> to vector<16xf32>
    %373 = vector.shape_cast %372 : vector<16xf32> to vector<16x1xf32>
    %cst_156 = arith.constant 0.0322580636 : f32
    %374 = vector.broadcast %cst_156 : f32 to vector<16x1xf32>
    %375 = arith.mulf %373, %374 : vector<16x1xf32>
    %376 = math.sqrt %375 : vector<16x1xf32>
    %cst_157 = arith.constant 9.99999974E-6 : f32
    %377 = vector.broadcast %cst_157 : f32 to vector<16x1xf32>
    %378 = arith.addf %376, %377 : vector<16x1xf32>
    %379 = tpu.reciprocal %378 {approx = true} : vector<16x1xf32> -> vector<16x1xf32>
    %380 = vector.broadcast %379 : vector<16x1xf32> to vector<16x32xf32>
    %381 = arith.mulf %370, %380 : vector<16x32xf32>
    %382 = vector.broadcast %361 : vector<1x32xf32> to vector<16x32xf32>
    %383 = arith.mulf %382, %381 : vector<16x32xf32>
    %384 = vector.broadcast %362 : vector<1x32xf32> to vector<16x32xf32>
    %385 = arith.addf %383, %384 : vector<16x32xf32>
    %cst_158 = arith.constant dense<0.000000e+00> : vector<16x128xf32>
    %386 = tpu.matmul %385, %363, %cst_158 {dimension_numbers = #tpu.dot_dimension_numbers<[1], [0], [0], [1], [0, 0, 1, 1], [], []>} : vector<16x32xf32>, vector<32x128xf32>, vector<16x128xf32> -> vector<16x128xf32>
    %387 = vector.broadcast %364 : vector<1x128xf32> to vector<16x128xf32>
    %388 = arith.addf %386, %387 : vector<16x128xf32>
    %c0_159 = arith.constant 0 : index
    %c0_160 = arith.constant 0 : index
    %389 = vector.load %arg39[%c0_159, %c0_160] : memref<16x128xf32, #tpu.memory_space<vmem>>, vector<16x128xf32>
    tpu.vector_store %arg39[%c0_159, %c0_160], %388 {strides = array<i32>} : memref<16x128xf32, #tpu.memory_space<vmem>>, vector<16x128xf32>,
    return
  }
  func.func @transform_0(%arg0: i32) -> (i32, i32) {
    %c0_i32 = arith.constant 0 : i32
    %c0_i32_0 = arith.constant 0 : i32
    %c0_i32_1 = arith.constant 0 : i32
    return %c0_i32, %c0_i32_0 : i32, i32
  }
  func.func @transform_1(%arg0: i32) -> (i32, i32) {
    %c0_i32 = arith.constant 0 : i32
    %c0_i32_0 = arith.constant 0 : i32
    %c0_i32_1 = arith.constant 0 : i32
    return %c0_i32, %c0_i32_0 : i32, i32
  }
  func.func @transform_2(%arg0: i32) -> (i32, i32) {
    %c0_i32 = arith.constant 0 : i32
    %c0_i32_0 = arith.constant 0 : i32
    %c0_i32_1 = arith.constant 0 : i32
    return %c0_i32, %c0_i32_0 : i32, i32
  }
  func.func @transform_3(%arg0: i32) -> (i32, i32) {
    %c0_i32 = arith.constant 0 : i32
    %c0_i32_0 = arith.constant 0 : i32
    %c0_i32_1 = arith.constant 0 : i32
    return %c0_i32, %c0_i32_0 : i32, i32
  }
  func.func @transform_4(%arg0: i32) -> (i32, i32) {
    %c0_i32 = arith.constant 0 : i32
    %c0_i32_0 = arith.constant 0 : i32
    %c0_i32_1 = arith.constant 0 : i32
    return %c0_i32, %c0_i32_0 : i32, i32
  }
  func.func @transform_5(%arg0: i32) -> (i32, i32) {
    %c0_i32 = arith.constant 0 : i32
    %c0_i32_0 = arith.constant 0 : i32
    %c0_i32_1 = arith.constant 0 : i32
    return %c0_i32, %c0_i32_0 : i32, i32
  }
  func.func @transform_6(%arg0: i32) -> (i32, i32) {
    %c0_i32 = arith.constant 0 : i32
    %c0_i32_0 = arith.constant 0 : i32
    %c0_i32_1 = arith.constant 0 : i32
    return %c0_i32, %c0_i32_0 : i32, i32
  }
  func.func @transform_7(%arg0: i32) -> (i32, i32) {
    %c0_i32 = arith.constant 0 : i32
    %c0_i32_0 = arith.constant 0 : i32
    %c0_i32_1 = arith.constant 0 : i32
    return %c0_i32, %c0_i32_0 : i32, i32
  }
  func.func @transform_8(%arg0: i32) -> (i32, i32) {
    %c0_i32 = arith.constant 0 : i32
    %c0_i32_0 = arith.constant 0 : i32
    %c0_i32_1 = arith.constant 0 : i32
    return %c0_i32, %c0_i32_0 : i32, i32
  }
  func.func @transform_9(%arg0: i32) -> (i32, i32) {
    %c0_i32 = arith.constant 0 : i32
    %c0_i32_0 = arith.constant 0 : i32
    %c0_i32_1 = arith.constant 0 : i32
    return %c0_i32, %c0_i32_0 : i32, i32
  }
  func.func @transform_10(%arg0: i32) -> (i32, i32) {
    %c0_i32 = arith.constant 0 : i32
    %c0_i32_0 = arith.constant 0 : i32
    %c0_i32_1 = arith.constant 0 : i32
    return %c0_i32, %c0_i32_0 : i32, i32
  }
  func.func @transform_11(%arg0: i32) -> (i32, i32) {
    %c0_i32 = arith.constant 0 : i32
    %c0_i32_0 = arith.constant 0 : i32
    %c0_i32_1 = arith.constant 0 : i32
    return %c0_i32, %c0_i32_0 : i32, i32
  }
  func.func @transform_12(%arg0: i32) -> (i32, i32) {
    %c0_i32 = arith.constant 0 : i32
    %c0_i32_0 = arith.constant 0 : i32
    %c0_i32_1 = arith.constant 0 : i32
    return %c0_i32, %c0_i32_0 : i32, i32
  }
  func.func @transform_13(%arg0: i32) -> (i32, i32) {
    %c0_i32 = arith.constant 0 : i32
    %c0_i32_0 = arith.constant 0 : i32
    %c0_i32_1 = arith.constant 0 : i32
    return %c0_i32, %c0_i32_0 : i32, i32
  }
  func.func @transform_14(%arg0: i32) -> (i32, i32) {
    %c0_i32 = arith.constant 0 : i32
    %c0_i32_0 = arith.constant 0 : i32
    %c0_i32_1 = arith.constant 0 : i32
    return %c0_i32, %c0_i32_0 : i32, i32
  }
  func.func @transform_15(%arg0: i32) -> (i32, i32) {
    %c0_i32 = arith.constant 0 : i32
    %c0_i32_0 = arith.constant 0 : i32
    %c0_i32_1 = arith.constant 0 : i32
    return %c0_i32, %c0_i32_0 : i32, i32
  }
  func.func @transform_16(%arg0: i32) -> (i32, i32) {
    %c0_i32 = arith.constant 0 : i32
    %c0_i32_0 = arith.constant 0 : i32
    %c0_i32_1 = arith.constant 0 : i32
    return %c0_i32, %c0_i32_0 : i32, i32
  }
  func.func @transform_17(%arg0: i32) -> (i32, i32) {
    %c0_i32 = arith.constant 0 : i32
    %c0_i32_0 = arith.constant 0 : i32
    %c0_i32_1 = arith.constant 0 : i32
    return %c0_i32, %c0_i32_0 : i32, i32
  }
  func.func @transform_18(%arg0: i32) -> (i32, i32) {
    %c0_i32 = arith.constant 0 : i32
    %c0_i32_0 = arith.constant 0 : i32
    %c0_i32_1 = arith.constant 0 : i32
    return %c0_i32, %c0_i32_0 : i32, i32
  }
  func.func @transform_19(%arg0: i32) -> (i32, i32) {
    %c0_i32 = arith.constant 0 : i32
    %c0_i32_0 = arith.constant 0 : i32
    %c0_i32_1 = arith.constant 0 : i32
    return %c0_i32, %c0_i32_0 : i32, i32
  }
  func.func @transform_20(%arg0: i32) -> (i32, i32) {
    %c0_i32 = arith.constant 0 : i32
    %c0_i32_0 = arith.constant 0 : i32
    %c0_i32_1 = arith.constant 0 : i32
    return %c0_i32, %c0_i32_0 : i32, i32
  }
  func.func @transform_21(%arg0: i32) -> (i32, i32) {
    %c0_i32 = arith.constant 0 : i32
    %c0_i32_0 = arith.constant 0 : i32
    %c0_i32_1 = arith.constant 0 : i32
    return %c0_i32, %c0_i32_0 : i32, i32
  }
  func.func @transform_22(%arg0: i32) -> (i32, i32) {
    %c0_i32 = arith.constant 0 : i32
    %c0_i32_0 = arith.constant 0 : i32
    %c0_i32_1 = arith.constant 0 : i32
    return %c0_i32, %c0_i32_0 : i32, i32
  }
  func.func @transform_23(%arg0: i32) -> (i32, i32) {
    %c0_i32 = arith.constant 0 : i32
    %c0_i32_0 = arith.constant 0 : i32
    %c0_i32_1 = arith.constant 0 : i32
    return %c0_i32, %c0_i32_0 : i32, i32
  }
  func.func @transform_24(%arg0: i32) -> (i32, i32) {
    %c0_i32 = arith.constant 0 : i32
    %c0_i32_0 = arith.constant 0 : i32
    %c0_i32_1 = arith.constant 0 : i32
    return %c0_i32, %c0_i32_0 : i32, i32
  }
  func.func @transform_25(%arg0: i32) -> (i32, i32) {
    %c0_i32 = arith.constant 0 : i32
    %c0_i32_0 = arith.constant 0 : i32
    %c0_i32_1 = arith.constant 0 : i32
    return %c0_i32, %c0_i32_0 : i32, i32
  }
  func.func @transform_26(%arg0: i32) -> (i32, i32) {
    %c0_i32 = arith.constant 0 : i32
    %c0_i32_0 = arith.constant 0 : i32
    %c0_i32_1 = arith.constant 0 : i32
    return %c0_i32, %c0_i32_0 : i32, i32
  }
  func.func @transform_27(%arg0: i32) -> (i32, i32) {
    %c0_i32 = arith.constant 0 : i32
    %c0_i32_0 = arith.constant 0 : i32
    %c0_i32_1 = arith.constant 0 : i32
    return %c0_i32, %c0_i32_0 : i32, i32
  }
  func.func @transform_28(%arg0: i32) -> (i32, i32) {
    %c0_i32 = arith.constant 0 : i32
    %c0_i32_0 = arith.constant 0 : i32
    %c0_i32_1 = arith.constant 0 : i32
    return %c0_i32, %c0_i32_0 : i32, i32
  }
  func.func @transform_29(%arg0: i32) -> (i32, i32) {
    %c0_i32 = arith.constant 0 : i32
    %c0_i32_0 = arith.constant 0 : i32
    %c0_i32_1 = arith.constant 0 : i32
    return %c0_i32, %c0_i32_0 : i32, i32
  }
  func.func @transform_30(%arg0: i32) -> (i32, i32) {
    %c0_i32 = arith.constant 0 : i32
    %c0_i32_0 = arith.constant 0 : i32
    %c0_i32_1 = arith.constant 0 : i32
    return %c0_i32, %c0_i32_0 : i32, i32
  }
  func.func @transform_31(%arg0: i32) -> (i32, i32) {
    %c0_i32 = arith.constant 0 : i32
    %c0_i32_0 = arith.constant 0 : i32
    %c0_i32_1 = arith.constant 0 : i32
    return %c0_i32, %c0_i32_0 : i32, i32
  }
  func.func @transform_32(%arg0: i32) -> (i32, i32) {
    %c0_i32 = arith.constant 0 : i32
    %c0_i32_0 = arith.constant 0 : i32
    %c0_i32_1 = arith.constant 0 : i32
    return %c0_i32, %c0_i32_0 : i32, i32
  }
  func.func @transform_33(%arg0: i32) -> (i32, i32) {
    %c0_i32 = arith.constant 0 : i32
    %c0_i32_0 = arith.constant 0 : i32
    %c0_i32_1 = arith.constant 0 : i32
    return %c0_i32, %c0_i32_0 : i32, i32
  }
  func.func @transform_34(%arg0: i32) -> (i32, i32) {
    %c0_i32 = arith.constant 0 : i32
    %c0_i32_0 = arith.constant 0 : i32
    %c0_i32_1 = arith.constant 0 : i32
    return %c0_i32, %c0_i32_0 : i32, i32
  }
  func.func @transform_35(%arg0: i32) -> (i32, i32) {
    %c0_i32 = arith.constant 0 : i32
    %c0_i32_0 = arith.constant 0 : i32
    %c0_i32_1 = arith.constant 0 : i32
    return %c0_i32, %c0_i32_0 : i32, i32
  }
  func.func @transform_36(%arg0: i32) -> (i32, i32) {
    %c0_i32 = arith.constant 0 : i32
    %c0_i32_0 = arith.constant 0 : i32
    %c0_i32_1 = arith.constant 0 : i32
    return %c0_i32, %c0_i32_0 : i32, i32
  }
  func.func @transform_37(%arg0: i32) -> (i32, i32) {
    %c0_i32 = arith.constant 0 : i32
    %c0_i32_0 = arith.constant 0 : i32
    %c0_i32_1 = arith.constant 0 : i32
    return %c0_i32, %c0_i32_0 : i32, i32
  }
  func.func @transform_38(%arg0: i32) -> (i32, i32) {
    %c0_i32 = arith.constant 0 : i32
    %c0_i32_0 = arith.constant 0 : i32
    %c0_i32_1 = arith.constant 0 : i32
    return %c0_i32, %c0_i32_0 : i32, i32
  }
}

</mosaic_0001>

<bundles_post_ra>
// kernel: tpu_custom_call.1
= control target key start
LH: loop header
LB: loop body
LE: loop exit
PB: predicated region body
PF: predicated region fallthrough
CT: control target
= control target key end

     0   :  { %s5189_s6 = smov 1   ;;  %s5190_s10 = smov 2   ;;  %s5996_s0 = inlined_call_operand.smem [shape: u32[39], index: -1, kind: input, shape index: {}] }
   0x1   :  { %s5265_s5 = sld [smem:[%s5996_s0]]   ;;  %s5191_s14 = smov 3  }
   0x2   :  { %s5270_s9 = sld [smem:[%s5996_s0 + %s5189_s6]]   ;;  %s5192_s18 = smov 4  }
   0x3   :  { %s5275_s13 = sld [smem:[%s5996_s0 + %s5190_s10]]   ;;  %s5193_s22 = smov 5  }
   0x4   :  { %s5280_s17 = sld [smem:[%s5996_s0 + %s5191_s14]]   ;;  %s5194_s26 = smov 6  }
   0x5   :  { %s5285_s21 = sld [smem:[%s5996_s0 + %s5192_s18]]   ;;  %s5195_s30 = smov 7  }
   0x6   :  { %s5290_s25 = sld [smem:[%s5996_s0 + %s5193_s22]]   ;;  %s5196_s4 = smov 8  }
   0x7   :  { %s5295_s29 = sld [smem:[%s5996_s0 + %s5194_s26]]   ;;  %s5197_s10 = smov 9  }
   0x8   :  { %s5300_s3 = sld [smem:[%s5996_s0 + %s5195_s30]]   ;;  %s5198_s15 = smov 10  }
   0x9   :  { %s5305_s8 = sld [smem:[%s5996_s0 + %s5196_s4]]   ;;  %s5199_s20 = smov 11  }
   0xa   :  { %s5310_s14 = sld [smem:[%s5996_s0 + %s5197_s10]]   ;;  %s5200_s26 = smov 12  }
   0xb   :  { %6018 = sst [smem:[#allocation59_spill]] %s5285_s21  ;;  %s5201_s1 = smov 13  }
   0xc   :  { %6019 = sst [smem:[#allocation60_spill]] %s5290_s25  ;;  %s5202_s7 = smov 14  }
   0xd   :  { %6020 = sst [smem:[#allocation61_spill]] %s5295_s29  ;;  %s5204_s22 = smov 16  }
   0xe   :  { %s5315_s19 = sld [smem:[%s5996_s0 + %s5198_s15]]   ;;  %s5203_s15 = smov 15  }
   0xf   :  { %6021 = sst [smem:[#allocation62_spill]] %s5305_s8  ;;  %s5205_s28 = smov 17  }
  0x10   :  { %6022 = sst [smem:[#allocation63_spill]] %s5310_s14 }
  0x11   :  { %s5320_s24 = sld [smem:[%s5996_s0 + %s5199_s20]]  }
  0x12   :  { %s5325_s30 = sld [smem:[%s5996_s0 + %s5200_s26]]  }
  0x13   :  { %s5330_s6 = sld [smem:[%s5996_s0 + %s5201_s1]]  }
  0x14   :  { %6023 = sst [smem:[#allocation64_spill]] %s5315_s19 }
  0x15   :  { %s5335_s12 = sld [smem:[%s5996_s0 + %s5202_s7]]   ;;  %s5206_s7 = smov 18  }
  0x16   :  { %s5340_s20 = sld [smem:[%s5996_s0 + %s5203_s15]]   ;;  %s5207_s15 = smov 19  }
  0x17   :  { %s5345_s27 = sld [smem:[%s5996_s0 + %s5204_s22]]   ;;  %s5208_s22 = smov 20  }
  0x18   :  { %6024 = sst [smem:[#allocation65_spill]] %s5325_s30 }
  0x19   :  { %s5350_s4 = sld [smem:[%s5996_s0 + %s5205_s28]]   ;;  %s5209_s28 = smov 21  }
  0x1a   :  { %s5360_s19 = sld [smem:[%s5996_s0 + %s5207_s15]]   ;;  %s5211_s15 = smov 23  }
  0x1b   :  { %6025 = sst [smem:[#allocation66_spill]] %s5335_s12 }
  0x1c   :  { %6026 = sst [smem:[#allocation67_spill]] %s5340_s20 }
  0x1d   :  { %6027 = sst [smem:[#allocation68_spill]] %s5345_s27 }
  0x1e   :  { %s5355_s12 = sld [smem:[%s5996_s0 + %s5206_s7]]   ;;  %s5210_s7 = smov 22  }
  0x1f   :  { %s5365_s27 = sld [smem:[%s5996_s0 + %s5208_s22]]   ;;  %s5212_s22 = smov 24  }
  0x20   :  { %s5370_s8 = sld [smem:[%s5996_s0 + %s5209_s28]]   ;;  %s5213_s28 = smov 25  }
  0x21   :  { %s5375_s29 = sld [smem:[%s5996_s0 + %s5210_s7]]   ;;  %s5214_s7 = smov 26  }
  0x22   :  { %s5380_s21 = sld [smem:[%s5996_s0 + %s5211_s15]]   ;;  %s5215_s15 = smov 27  }
  0x24   :  { %6028 = sst [smem:[#allocation69_spill]] %s5355_s12 }
  0x25   :  { %6029 = sst [smem:[#allocation70_spill]] %s5365_s27 }
  0x26   :  { %6030 = sst [smem:[#allocation71_spill]] %s5370_s8 }
  0x27   :  { %s5385_s27 = sld [smem:[%s5996_s0 + %s5212_s22]]   ;;  %s5216_s22 = smov 28  }
  0x28   :  { %6031 = sst [smem:[#allocation72_spill]] %s5380_s21 }
  0x29   :  { %s5390_s8 = sld [smem:[%s5996_s0 + %s5213_s28]]   ;;  %s5217_s28 = smov 29  }
  0x2a   :  { %s5395_s12 = sld [smem:[%s5996_s0 + %s5214_s7]]   ;;  %s5218_s7 = smov 30  }
  0x2b   :  { %s5400_s21 = sld [smem:[%s5996_s0 + %s5215_s15]]   ;;  %s5219_s15 = smov 31  }
  0x2c   :  { %s5405_s20 = sld [smem:[%s5996_s0 + %s5216_s22]]   ;;  %s5220_s22 = smov 32  }
  0x2d   :  { %s5420_s30 = sld [smem:[%s5996_s0 + %s5219_s15]]   ;;  %s5223_s15 = smov 35  }
  0x2e   :  { %s5440_s25 = sld [smem:[%s5996_s0 + %s5223_s15]]  }
  0x2f   :  { %6032 = sst [smem:[#allocation73_spill]] %s5390_s8 }
  0x30   :  { %6033 = sst [smem:[#allocation74_spill]] %s5395_s12 }
  0x31   :  { %s5410_s8 = sld [smem:[%s5996_s0 + %s5217_s28]]   ;;  %s5221_s28 = smov 33  }
  0x32   :  { %6034 = sst [smem:[#allocation75_spill]] %s5405_s20 }
  0x33   :  { %s5415_s12 = sld [smem:[%s5996_s0 + %s5218_s7]]   ;;  %s5222_s7 = smov 34  }
  0x34   :  { %s5425_s20 = sld [smem:[%s5996_s0 + %s5220_s22]]   ;;  %s5224_s22 = smov 36  }
  0x35   :  { %s5430_s14 = sld [smem:[%s5996_s0 + %s5221_s28]]   ;;  %s5225_s28 = smov 37  }
  0x39   :  { %6035 = sst [smem:[#allocation76_spill]] %s5415_s12 }
  0x3a   :  { %6036 = sst [smem:[#allocation77_spill]] %s5425_s20 }
  0x3b   :  { %6037 = sst [smem:[#allocation78_spill]] %s5430_s14 }
  0x3c   :  { %s5435_s12 = sld [smem:[%s5996_s0 + %s5222_s7]]   ;;  %s5226_s7 = smov 38  }
  0x3d   :  { %s5445_s20 = sld [smem:[%s5996_s0 + %s5224_s22]]  }
  0x3e   :  { %s5450_s14 = sld [smem:[%s5996_s0 + %s5225_s28]]  }
  0x42   :  { %6038 = sst [smem:[#allocation79_spill]] %s5435_s12 }
  0x43   :  { %s5455_s12 = sld [smem:[%s5996_s0 + %s5226_s7]]  }
  0x44   :  { %82 = vsyncpa [#allocation3], 0 }
  0x45   :  { %83 = vsyncpa [#allocation6], 0 }
  0x46   :  { %84 = vsyncpa [#allocation9], 0 }
  0x47   :  { %85 = vsyncpa [#allocation12], 0 }
  0x48   :  { %86 = vsyncpa [#allocation15], 0 }
  0x49   :  { %87 = vsyncpa [#allocation18], 0 }
  0x4a   :  { %88 = vsyncpa [#allocation21], 0 }
  0x4b   :  { %89 = vsyncpa [#allocation24], 0 }
  0x4c   :  { %90 = vsyncpa [#allocation27], 0 }
  0x4d   :  { %91 = vsyncpa [#allocation30], 0 }
  0x4e   :  { %92 = vsyncpa [#allocation33], 0 }
  0x4f   :  { %93 = vsyncpa [#allocation36], 0 }
  0x50   :  { %94 = vsyncpa [#allocation39], 0 }
  0x51   :  { %95 = vsyncpa [#allocation42], 0 }
  0x52   :  { %96 = vsyncpa [#allocation4], 0  ;;  %s5227_s0 = smov [#allocation5]   ;;  %s5228_s16 = smov [#allocation8]  }
  0x53   :  { %s114_s15 = sshll.u32 %s5227_s0, 4  ;;  %s137_s18 = sshll.u32 %s5228_s16, 4  ;;  %s115_s15 = int_to_ptr.vmem [resolvable:$true] %s114_s15  ;;  %s5457_s18 = int_to_ptr.vmem [resolvable:$true] %s137_s18 }
  0x54   :  { %s4565_s22 = scalar_lea.hbm %s5270_s9, 256 }
  0x55   :  { %p4566_p0 = scmp.ne.s32.totalorder %s5270_s9, %s4565_s22  ;;  %p4569_p1 = scmp.lt.u32.totalorder %s4565_s22, %s5270_s9 }
  0x57   :  { %p4571_p2 = pnand %p4569_p1, %p4566_p0 }
  0x59   :  { %4574 = shalt.err (!%p4571_p2)
}
  0x5a   :  { %s4575_s23 = scalar_lea.vmem %s115_s15, 256  ;;  %p4580_p4 = scmp.lt.s32.totalorder %s115_s15, %s115_s15 }
  0x5b   :  { %p4576_p3 = scmp.ne.s32.totalorder %s115_s15, %s4575_s23  ;;  %p4581_p5 = scmp.lt.s32.totalorder %s4575_s23, %s4575_s23 }
  0x5d   :  { %p4582_p6 = por %p4581_p5, %p4580_p4 }
  0x5f   :  { %p4583_p7 = pnand %p4582_p6, %p4576_p3 }
  0x61   :  { %4586 = shalt.err (!%p4583_p7)
}
  0x62   :  { %s5229_s26 = smov 128   ;;  %s5230_s28 = smov 8  }
  0x63   :  { %120 = dma.hbm_to_vmem [thread:$0]  %s5270_s9, 256, %s115_s15, [#allocation6], %s5229_s26, %s5229_s26, %s5230_s28  }
  0x64   :  { %s4587_s1 = scalar_lea.hbm %s5280_s17, 16 }
  0x65   :  { %p4588_p8 = scmp.ne.s32.totalorder %s5280_s17, %s4587_s1  ;;  %p4591_p9 = scmp.lt.u32.totalorder %s4587_s1, %s5280_s17 }
  0x67   :  { %p4593_p10 = pnand %p4591_p9, %p4588_p8 }
  0x69   :  { %4596 = shalt.err (!%p4593_p10)
}
  0x6a   :  { %s4597_s2 = scalar_lea.vmem %s5457_s18, 16  ;;  %s4601_s7 = scalar_lea.vmem %s5457_s18, 32 }
  0x6b   :  { %p4598_p11 = scmp.ne.s32.totalorder %s5457_s18, %s4597_s2  ;;  %p4602_p12 = scmp.lt.s32.totalorder %s5457_s18, %s5457_s18 }
  0x6c   :  { %p4603_p13 = scmp.lt.s32.totalorder %s4601_s7, %s4597_s2 }
  0x6e   :  { %p4604_p0 = por %p4603_p13, %p4602_p12 }
  0x70   :  { %p4605_p1 = pnand %p4604_p0, %p4598_p11 }
  0x72   :  { %4608 = shalt.err (!%p4605_p1)
}
  0x73   :  { %140 = dma.hbm_to_vmem [thread:$0]  %s5280_s17, 16, %s5457_s18, [#allocation9]  }
  0x74   :  { %s5231_s9 = smov [#allocation11]   ;;  %s5232_s11 = smov [#allocation14]  }
  0x75   :  { %s161_s10 = sshll.u32 %s5231_s9, 4  ;;  %s185_s0 = sshll.u32 %s5232_s11, 4  ;;  %s162_s10 = int_to_ptr.vmem [resolvable:$true] %s161_s10  ;;  %s186_s0 = int_to_ptr.vmem [resolvable:$true] %s185_s0 }
  0x76   :  { %s4609_s15 = scalar_lea.hbm %s5300_s3, 16 }
  0x77   :  { %p4610_p2 = scmp.ne.s32.totalorder %s5300_s3, %s4609_s15  ;;  %p4613_p3 = scmp.lt.u32.totalorder %s4609_s15, %s5300_s3 }
  0x79   :  { %p4615_p4 = pnand %p4613_p3, %p4610_p2 }
  0x7b   :  { %4618 = shalt.err (!%p4615_p4)
}
  0x7c   :  { %s4619_s16 = scalar_lea.vmem %s162_s10, 16  ;;  %s4623_s22 = scalar_lea.vmem %s162_s10, 32 }
  0x7d   :  { %p4620_p5 = scmp.ne.s32.totalorder %s162_s10, %s4619_s16  ;;  %p4624_p6 = scmp.lt.s32.totalorder %s162_s10, %s162_s10 }
  0x7e   :  { %p4625_p7 = scmp.lt.s32.totalorder %s4623_s22, %s4619_s16 }
  0x80   :  { %p4626_p8 = por %p4625_p7, %p4624_p6 }
  0x82   :  { %p4627_p9 = pnand %p4626_p8, %p4620_p5 }
  0x84   :  { %4630 = shalt.err (!%p4627_p9)
}
  0x85   :  { %164 = dma.hbm_to_vmem [thread:$0]  %s5300_s3, 16, %s162_s10, [#allocation12]  }
  0x86   :  { %s4631_s17 = scalar_lea.hbm %s5320_s24, 16 }
  0x87   :  { %p4632_p10 = scmp.ne.s32.totalorder %s5320_s24, %s4631_s17  ;;  %p4635_p11 = scmp.lt.u32.totalorder %s4631_s17, %s5320_s24 }
  0x89   :  { %p4637_p12 = pnand %p4635_p11, %p4632_p10 }
  0x8b   :  { %4640 = shalt.err (!%p4637_p12)
}
  0x8c   :  { %s4641_s18 = scalar_lea.vmem %s186_s0, 16  ;;  %s4645_s23 = scalar_lea.vmem %s186_s0, 32 }
  0x8d   :  { %p4642_p13 = scmp.ne.s32.totalorder %s186_s0, %s4641_s18  ;;  %p4646_p0 = scmp.lt.s32.totalorder %s186_s0, %s186_s0 }
  0x8e   :  { %p4647_p1 = scmp.lt.s32.totalorder %s4645_s23, %s4641_s18 }
  0x90   :  { %p4648_p2 = por %p4647_p1, %p4646_p0 }
  0x92   :  { %p4649_p3 = pnand %p4648_p2, %p4642_p13 }
  0x94   :  { %4652 = shalt.err (!%p4649_p3)
}
  0x95   :  { %188 = dma.hbm_to_vmem [thread:$0]  %s5320_s24, 16, %s186_s0, [#allocation15]  }
  0x96   :  { %s5233_s1 = smov [#allocation17]   ;;  %s5234_s2 = smov [#allocation20]  }
  0x97   :  { %s205_s3 = sshll.u32 %s5233_s1, 4  ;;  %s229_s7 = sshll.u32 %s5234_s2, 4  ;;  %s206_s3 = int_to_ptr.vmem [resolvable:$true] %s205_s3  ;;  %s230_s7 = int_to_ptr.vmem [resolvable:$true] %s229_s7 }
  0x98   :  { %s4653_s9 = scalar_lea.hbm %s5330_s6, 16 }
  0x99   :  { %p4654_p4 = scmp.ne.s32.totalorder %s5330_s6, %s4653_s9  ;;  %p4657_p5 = scmp.lt.u32.totalorder %s4653_s9, %s5330_s6 }
  0x9b   :  { %p4659_p6 = pnand %p4657_p5, %p4654_p4 }
  0x9d   :  { %4662 = shalt.err (!%p4659_p6)
}
  0x9e   :  { %s4663_s10 = scalar_lea.vmem %s206_s3, 16  ;;  %s4667_s11 = scalar_lea.vmem %s206_s3, 32 }
  0x9f   :  { %p4664_p7 = scmp.ne.s32.totalorder %s206_s3, %s4663_s10  ;;  %p4668_p8 = scmp.lt.s32.totalorder %s206_s3, %s206_s3 }
  0xa0   :  { %p4669_p9 = scmp.lt.s32.totalorder %s4667_s11, %s4663_s10 }
  0xa2   :  { %p4670_p10 = por %p4669_p9, %p4668_p8 }
  0xa4   :  { %p4671_p11 = pnand %p4670_p10, %p4664_p7 }
  0xa6   :  { %4674 = shalt.err (!%p4671_p11)
}
  0xa7   :  { %208 = dma.hbm_to_vmem [thread:$0]  %s5330_s6, 16, %s206_s3, [#allocation18]  }
  0xa8   :  { %s4675_s24 = scalar_lea.hbm %s5350_s4, 16 }
  0xa9   :  { %p4676_p12 = scmp.ne.s32.totalorder %s5350_s4, %s4675_s24  ;;  %p4679_p13 = scmp.lt.u32.totalorder %s4675_s24, %s5350_s4 }
  0xab   :  { %p4681_p0 = pnand %p4679_p13, %p4676_p12 }
  0xad   :  { %4684 = shalt.err (!%p4681_p0)
}
  0xae   :  { %s4685_s0 = scalar_lea.vmem %s230_s7, 16  ;;  %s4689_s15 = scalar_lea.vmem %s230_s7, 32 }
  0xaf   :  { %p4686_p1 = scmp.ne.s32.totalorder %s230_s7, %s4685_s0  ;;  %p4690_p2 = scmp.lt.s32.totalorder %s230_s7, %s230_s7 }
  0xb0   :  { %p4691_p3 = scmp.lt.s32.totalorder %s4689_s15, %s4685_s0 }
  0xb2   :  { %p4692_p4 = por %p4691_p3, %p4690_p2 }
  0xb4   :  { %p4693_p5 = pnand %p4692_p4, %p4686_p1 }
  0xb6   :  { %4696 = shalt.err (!%p4693_p5)
}
  0xb7   :  { %232 = dma.hbm_to_vmem [thread:$0]  %s5350_s4, 16, %s230_s7, [#allocation21]  }
  0xb8   :  { %s5235_s16 = smov [#allocation23]   ;;  %s5236_s22 = smov [#allocation26]  }
  0xb9   :  { %s249_s6 = sshll.u32 %s5235_s16, 4  ;;  %s270_s17 = sshll.u32 %s5236_s22, 4  ;;  %s250_s6 = int_to_ptr.vmem [resolvable:$true] %s249_s6  ;;  %s5492_s17 = int_to_ptr.vmem [resolvable:$true] %s270_s17 }
  0xba   :  { %s4697_s18 = scalar_lea.hbm %s5360_s19, 16 }
  0xbb   :  { %p4698_p6 = scmp.ne.s32.totalorder %s5360_s19, %s4697_s18  ;;  %p4701_p7 = scmp.lt.u32.totalorder %s4697_s18, %s5360_s19 }
  0xbd   :  { %p4703_p8 = pnand %p4701_p7, %p4698_p6 }
  0xbf   :  { %4706 = shalt.err (!%p4703_p8)
}
  0xc0   :  { %s4707_s23 = scalar_lea.vmem %s250_s6, 16  ;;  %s4711_s1 = scalar_lea.vmem %s250_s6, 32 }
  0xc1   :  { %p4708_p9 = scmp.ne.s32.totalorder %s250_s6, %s4707_s23  ;;  %p4712_p10 = scmp.lt.s32.totalorder %s250_s6, %s250_s6 }
  0xc2   :  { %p4713_p11 = scmp.lt.s32.totalorder %s4711_s1, %s4707_s23 }
  0xc4   :  { %p4714_p12 = por %p4713_p11, %p4712_p10 }
  0xc6   :  { %p4715_p13 = pnand %p4714_p12, %p4708_p9 }
  0xc8   :  { %4718 = shalt.err (!%p4715_p13)
}
  0xc9   :  { %252 = dma.hbm_to_vmem [thread:$0]  %s5360_s19, 16, %s250_s6, [#allocation24]  }
  0xca   :  { %s4719_s4 = scalar_lea.hbm %s5375_s29, 512 }
  0xcb   :  { %p4720_p0 = scmp.ne.s32.totalorder %s5375_s29, %s4719_s4  ;;  %p4723_p1 = scmp.lt.u32.totalorder %s4719_s4, %s5375_s29 }
  0xcd   :  { %p4725_p2 = pnand %p4723_p1, %p4720_p0 }
  0xcf   :  { %4728 = shalt.err (!%p4725_p2)
}
  0xd0   :  { %s4729_s3 = scalar_lea.vmem %s5492_s17, 512  ;;  %p4734_p4 = scmp.lt.s32.totalorder %s5492_s17, %s5492_s17 }
  0xd1   :  { %p4730_p3 = scmp.ne.s32.totalorder %s5492_s17, %s4729_s3  ;;  %p4735_p5 = scmp.lt.s32.totalorder %s4729_s3, %s4729_s3 }
  0xd3   :  { %p4736_p6 = por %p4735_p5, %p4734_p4 }
  0xd5   :  { %p4737_p7 = pnand %p4736_p6, %p4730_p3 }
  0xd7   :  { %4740 = shalt.err (!%p4737_p7)
}
  0xd8   :  { %276 = dma.hbm_to_vmem [thread:$0]  %s5375_s29, 512, %s5492_s17, [#allocation27], %s5229_s26, %s5229_s26, %s5230_s28  }
  0xd9   :  { %s5237_s19 = smov [#allocation29]   ;;  %s5238_s7 = smov [#allocation32]  }
  0xda   :  { %s292_s2 = sshll.u32 %s5237_s19, 4  ;;  %s317_s9 = sshll.u32 %s5238_s7, 4  ;;  %s293_s2 = int_to_ptr.vmem [resolvable:$true] %s292_s2  ;;  %s318_s9 = int_to_ptr.vmem [resolvable:$true] %s317_s9 }
  0xdb   :  { %s4741_s10 = scalar_lea.hbm %s5385_s27, 512 }
  0xdc   :  { %p4742_p8 = scmp.ne.s32.totalorder %s5385_s27, %s4741_s10  ;;  %p4745_p9 = scmp.lt.u32.totalorder %s4741_s10, %s5385_s27 }
  0xde   :  { %p4747_p10 = pnand %p4745_p9, %p4742_p8 }
  0xe0   :  { %4750 = shalt.err (!%p4747_p10)
}
  0xe1   :  { %s4751_s11 = scalar_lea.vmem %s293_s2, 512  ;;  %p4756_p12 = scmp.lt.s32.totalorder %s293_s2, %s293_s2 }
  0xe2   :  { %p4752_p11 = scmp.ne.s32.totalorder %s293_s2, %s4751_s11  ;;  %p4757_p13 = scmp.lt.s32.totalorder %s4751_s11, %s4751_s11 }
  0xe4   :  { %p4758_p0 = por %p4757_p13, %p4756_p12 }
  0xe6   :  { %p4759_p1 = pnand %p4758_p0, %p4752_p11 }
  0xe8   :  { %4762 = shalt.err (!%p4759_p1)
}
  0xe9   :  { %298 = dma.hbm_to_vmem [thread:$0]  %s5385_s27, 512, %s293_s2, [#allocation30], %s5229_s26, %s5229_s26, %s5230_s28  }
  0xea   :  { %s4763_s29 = scalar_lea.hbm %s5400_s21, 16 }
  0xeb   :  { %p4764_p2 = scmp.ne.s32.totalorder %s5400_s21, %s4763_s29  ;;  %p4767_p3 = scmp.lt.u32.totalorder %s4763_s29, %s5400_s21 }
  0xed   :  { %p4769_p4 = pnand %p4767_p3, %p4764_p2 }
  0xef   :  { %4772 = shalt.err (!%p4769_p4)
}
  0xf0   :  { %s4773_s24 = scalar_lea.vmem %s318_s9, 16  ;;  %s4777_s0 = scalar_lea.vmem %s318_s9, 32 }
  0xf1   :  { %p4774_p5 = scmp.ne.s32.totalorder %s318_s9, %s4773_s24  ;;  %p4778_p6 = scmp.lt.s32.totalorder %s318_s9, %s318_s9 }
  0xf2   :  { %p4779_p7 = scmp.lt.s32.totalorder %s4777_s0, %s4773_s24 }
  0xf4   :  { %p4780_p8 = por %p4779_p7, %p4778_p6 }
  0xf6   :  { %p4781_p9 = pnand %p4780_p8, %p4774_p5 }
  0xf8   :  { %4784 = shalt.err (!%p4781_p9)
}
  0xf9   :  { %320 = dma.hbm_to_vmem [thread:$0]  %s5400_s21, 16, %s318_s9, [#allocation33]  }
  0xfa   :  { %s5239_s15 = smov [#allocation35]   ;;  %s5240_s16 = smov [#allocation38]  }
  0xfb   :  { %s337_s27 = sshll.u32 %s5239_s15, 4  ;;  %s359_s6 = sshll.u32 %s5240_s16, 4  ;;  %s338_s27 = int_to_ptr.vmem [resolvable:$true] %s337_s27  ;;  %s360_s6 = int_to_ptr.vmem [resolvable:$true] %s359_s6 }
  0xfc   :  { %s4785_s22 = scalar_lea.hbm %s5410_s8, 16 }
  0xfd   :  { %p4786_p10 = scmp.ne.s32.totalorder %s5410_s8, %s4785_s22  ;;  %p4789_p11 = scmp.lt.u32.totalorder %s4785_s22, %s5410_s8 }
  0xff   :  { %p4791_p12 = pnand %p4789_p11, %p4786_p10 }
 0x101   :  { %4794 = shalt.err (!%p4791_p12)
}
 0x102   :  { %s4795_s17 = scalar_lea.vmem %s338_s27, 16  ;;  %s4799_s18 = scalar_lea.vmem %s338_s27, 32 }
 0x103   :  { %p4796_p13 = scmp.ne.s32.totalorder %s338_s27, %s4795_s17  ;;  %p4800_p0 = scmp.lt.s32.totalorder %s338_s27, %s338_s27 }
 0x104   :  { %p4801_p1 = scmp.lt.s32.totalorder %s4799_s18, %s4795_s17 }
 0x106   :  { %p4802_p2 = por %p4801_p1, %p4800_p0 }
 0x108   :  { %p4803_p3 = pnand %p4802_p2, %p4796_p13 }
 0x10a   :  { %4806 = shalt.err (!%p4803_p3)
}
 0x10b   :  { %340 = dma.hbm_to_vmem [thread:$0]  %s5410_s8, 16, %s338_s27, [#allocation36]  }
 0x10c   :  { %s4807_s21 = scalar_lea.hbm %s5420_s30, 16 }
 0x10d   :  { %p4808_p4 = scmp.ne.s32.totalorder %s5420_s30, %s4807_s21  ;;  %p4811_p5 = scmp.lt.u32.totalorder %s4807_s21, %s5420_s30 }
 0x10f   :  { %p4813_p6 = pnand %p4811_p5, %p4808_p4 }
 0x111   :  { %4816 = shalt.err (!%p4813_p6)
}
 0x112   :  { %s4817_s23 = scalar_lea.vmem %s360_s6, 16  ;;  %s4821_s1 = scalar_lea.vmem %s360_s6, 32 }
 0x113   :  { %p4818_p7 = scmp.ne.s32.totalorder %s360_s6, %s4817_s23  ;;  %p4822_p8 = scmp.lt.s32.totalorder %s360_s6, %s360_s6 }
 0x114   :  { %p4823_p9 = scmp.lt.s32.totalorder %s4821_s1, %s4817_s23 }
 0x116   :  { %p4824_p10 = por %p4823_p9, %p4822_p8 }
 0x118   :  { %p4825_p11 = pnand %p4824_p10, %p4818_p7 }
 0x11a   :  { %4828 = shalt.err (!%p4825_p11)
}
 0x11b   :  { %362 = dma.hbm_to_vmem [thread:$0]  %s5420_s30, 16, %s360_s6, [#allocation39]  }
 0x11c   :  { %s5241_s4 = smov [#allocation2]   ;;  %s5242_s3 = smov [#allocation7]  }
 0x11d   :  { %s102_s8 = sshll.u32 %s5241_s4, 4  ;;  %s127_s19 = sshll.u32 %s5242_s3, 4  ;;  %s103_s8 = int_to_ptr.vmem [resolvable:$true] %s102_s8  ;;  %s128_s19 = int_to_ptr.vmem [resolvable:$true] %s127_s19 }
 0x11e   :  { %s4829_s2 = scalar_lea.hbm %s5265_s5, 256 }
 0x11f   :  { %p4830_p12 = scmp.ne.s32.totalorder %s5265_s5, %s4829_s2  ;;  %p4833_p13 = scmp.lt.u32.totalorder %s4829_s2, %s5265_s5 }
 0x121   :  { %p4835_p0 = pnand %p4833_p13, %p4830_p12 }
 0x123   :  { %4838 = shalt.err (!%p4835_p0)
}
 0x124   :  { %s4839_s7 = scalar_lea.vmem %s103_s8, 256  ;;  %p4844_p2 = scmp.lt.s32.totalorder %s103_s8, %s103_s8 }
 0x125   :  { %p4840_p1 = scmp.ne.s32.totalorder %s103_s8, %s4839_s7  ;;  %p4845_p3 = scmp.lt.s32.totalorder %s4839_s7, %s4839_s7 }
 0x127   :  { %p4846_p4 = por %p4845_p3, %p4844_p2 }
 0x129   :  { %p4847_p5 = pnand %p4846_p4, %p4840_p1 }
 0x12b   :  { %4850 = shalt.err (!%p4847_p5)
}
 0x12c   :  { %108 = dma.hbm_to_vmem [thread:$0]  %s5265_s5, 256, %s103_s8, [#allocation3], %s5229_s26, %s5229_s26, %s5230_s28  }
 0x12d   :  { %s4851_s30 = scalar_lea.hbm %s5275_s13, 16 }
 0x12e   :  { %p4852_p6 = scmp.ne.s32.totalorder %s5275_s13, %s4851_s30  ;;  %p4855_p7 = scmp.lt.u32.totalorder %s4851_s30, %s5275_s13 }
 0x130   :  { %p4857_p8 = pnand %p4855_p7, %p4852_p6 }
 0x132   :  { %4860 = shalt.err (!%p4857_p8)
}
 0x133   :  { %s4861_s9 = scalar_lea.vmem %s128_s19, 16  ;;  %s4865_s10 = scalar_lea.vmem %s128_s19, 32 }
 0x134   :  { %p4862_p9 = scmp.ne.s32.totalorder %s128_s19, %s4861_s9  ;;  %p4866_p10 = scmp.lt.s32.totalorder %s128_s19, %s128_s19 }
 0x135   :  { %p4867_p11 = scmp.lt.s32.totalorder %s4865_s10, %s4861_s9 }
 0x137   :  { %p4868_p12 = por %p4867_p11, %p4866_p10 }
 0x139   :  { %p4869_p13 = pnand %p4868_p12, %p4862_p9 }
 0x13b   :  { %4872 = shalt.err (!%p4869_p13)
}
 0x13c   :  { %s6039_s11 = sld [smem:[#allocation60_spill]]  ;;  %s5243_s29 = smov [#allocation10]  }
 0x13d   :  { %130 = dma.hbm_to_vmem [thread:$0]  %s5275_s13, 16, %s128_s19, [#allocation6]  }
 0x13e   :  { %s149_s5 = sshll.u32 %s5243_s29, 4  ;;  %s5244_s24 = smov [#allocation13]   ;;  %s150_s5 = int_to_ptr.vmem [resolvable:$true] %s149_s5 }
 0x13f   :  { %s173_s0 = sshll.u32 %s5244_s24, 4  ;;  %s174_s0 = int_to_ptr.vmem [resolvable:$true] %s173_s0 }
 0x142   :  { %s4873_s15 = scalar_lea.hbm %s6039_s11, 16 }
 0x143   :  { %p4874_p0 = scmp.ne.s32.totalorder %s6039_s11, %s4873_s15  ;;  %p4877_p1 = scmp.lt.u32.totalorder %s4873_s15, %s6039_s11 }
 0x145   :  { %p4879_p2 = pnand %p4877_p1, %p4874_p0 }
 0x147   :  { %4882 = shalt.err (!%p4879_p2)
}
 0x148   :  { %s4883_s27 = scalar_lea.vmem %s150_s5, 16  ;;  %s4887_s16 = scalar_lea.vmem %s150_s5, 32 }
 0x149   :  { %p4884_p3 = scmp.ne.s32.totalorder %s150_s5, %s4883_s27  ;;  %p4888_p4 = scmp.lt.s32.totalorder %s150_s5, %s150_s5 }
 0x14a   :  { %p4889_p5 = scmp.lt.s32.totalorder %s4887_s16, %s4883_s27 }
 0x14c   :  { %p4890_p6 = por %p4889_p5, %p4888_p4 }
 0x14e   :  { %p4891_p7 = pnand %p4890_p6, %p4884_p3 }
 0x150   :  { %4894 = shalt.err (!%p4891_p7)
}
 0x151   :  { %s6040_s13 = sld [smem:[#allocation63_spill]] }
 0x152   :  { %152 = dma.hbm_to_vmem [thread:$0]  %s6039_s11, 16, %s150_s5, [#allocation9]  }
 0x157   :  { %s4895_s6 = scalar_lea.hbm %s6040_s13, 16 }
 0x158   :  { %p4896_p8 = scmp.ne.s32.totalorder %s6040_s13, %s4895_s6  ;;  %p4899_p9 = scmp.lt.u32.totalorder %s4895_s6, %s6040_s13 }
 0x15a   :  { %p4901_p10 = pnand %p4899_p9, %p4896_p8 }
 0x15c   :  { %4904 = shalt.err (!%p4901_p10)
}
 0x15d   :  { %s4905_s22 = scalar_lea.vmem %s174_s0, 16  ;;  %s4909_s17 = scalar_lea.vmem %s174_s0, 32 }
 0x15e   :  { %p4906_p11 = scmp.ne.s32.totalorder %s174_s0, %s4905_s22  ;;  %p4910_p12 = scmp.lt.s32.totalorder %s174_s0, %s174_s0 }
 0x15f   :  { %p4911_p13 = scmp.lt.s32.totalorder %s4909_s17, %s4905_s22 }
 0x161   :  { %p4912_p0 = por %p4911_p13, %p4910_p12 }
 0x163   :  { %p4913_p1 = pnand %p4912_p0, %p4906_p11 }
 0x165   :  { %4916 = shalt.err (!%p4913_p1)
}
 0x166   :  { %s6041_s18 = sld [smem:[#allocation65_spill]]  ;;  %s5245_s21 = smov [#allocation16]  }
 0x167   :  { %176 = dma.hbm_to_vmem [thread:$0]  %s6040_s13, 16, %s174_s0, [#allocation12]  }
 0x168   :  { %s195_s23 = sshll.u32 %s5245_s21, 4  ;;  %s5246_s1 = smov [#allocation19]   ;;  %s196_s23 = int_to_ptr.vmem [resolvable:$true] %s195_s23 }
 0x169   :  { %s217_s4 = sshll.u32 %s5246_s1, 4  ;;  %s218_s4 = int_to_ptr.vmem [resolvable:$true] %s217_s4 }
 0x16c   :  { %s4917_s8 = scalar_lea.hbm %s6041_s18, 16 }
 0x16d   :  { %p4918_p2 = scmp.ne.s32.totalorder %s6041_s18, %s4917_s8  ;;  %p4921_p3 = scmp.lt.u32.totalorder %s4917_s8, %s6041_s18 }
 0x16f   :  { %p4923_p4 = pnand %p4921_p3, %p4918_p2 }
 0x171   :  { %4926 = shalt.err (!%p4923_p4)
}
 0x172   :  { %s4927_s3 = scalar_lea.vmem %s196_s23, 16  ;;  %s4931_s19 = scalar_lea.vmem %s196_s23, 32 }
 0x173   :  { %p4928_p5 = scmp.ne.s32.totalorder %s196_s23, %s4927_s3  ;;  %p4932_p6 = scmp.lt.s32.totalorder %s196_s23, %s196_s23 }
 0x174   :  { %p4933_p7 = scmp.lt.s32.totalorder %s4931_s19, %s4927_s3 }
 0x176   :  { %p4934_p8 = por %p4933_p7, %p4932_p6 }
 0x178   :  { %p4935_p9 = pnand %p4934_p8, %p4928_p5 }
 0x17a   :  { %4938 = shalt.err (!%p4935_p9)
}
 0x17b   :  { %s6042_s2 = sld [smem:[#allocation67_spill]] }
 0x17c   :  { %198 = dma.hbm_to_vmem [thread:$0]  %s6041_s18, 16, %s196_s23, [#allocation15]  }
 0x181   :  { %s4939_s7 = scalar_lea.hbm %s6042_s2, 16 }
 0x182   :  { %p4940_p10 = scmp.ne.s32.totalorder %s6042_s2, %s4939_s7  ;;  %p4943_p11 = scmp.lt.u32.totalorder %s4939_s7, %s6042_s2 }
 0x184   :  { %p4945_p12 = pnand %p4943_p11, %p4940_p10 }
 0x186   :  { %4948 = shalt.err (!%p4945_p12)
}
 0x187   :  { %s4949_s30 = scalar_lea.vmem %s218_s4, 16  ;;  %s4953_s9 = scalar_lea.vmem %s218_s4, 32 }
 0x188   :  { %p4950_p13 = scmp.ne.s32.totalorder %s218_s4, %s4949_s30  ;;  %p4954_p0 = scmp.lt.s32.totalorder %s218_s4, %s218_s4 }
 0x189   :  { %p4955_p1 = scmp.lt.s32.totalorder %s4953_s9, %s4949_s30 }
 0x18b   :  { %p4956_p2 = por %p4955_p1, %p4954_p0 }
 0x18d   :  { %p4957_p3 = pnand %p4956_p2, %p4950_p13 }
 0x18f   :  { %4960 = shalt.err (!%p4957_p3)
}
 0x190   :  { %s6043_s10 = sld [smem:[#allocation69_spill]]  ;;  %s5247_s11 = smov [#allocation22]  }
 0x191   :  { %220 = dma.hbm_to_vmem [thread:$0]  %s6042_s2, 16, %s218_s4, [#allocation18]  }
 0x192   :  { %s239_s29 = sshll.u32 %s5247_s11, 4  ;;  %s5248_s5 = smov [#allocation25]   ;;  %s240_s29 = int_to_ptr.vmem [resolvable:$true] %s239_s29 }
 0x193   :  { %s261_s24 = sshll.u32 %s5248_s5, 4  ;;  %s262_s24 = int_to_ptr.vmem [resolvable:$true] %s261_s24 }
 0x196   :  { %s4961_s0 = scalar_lea.hbm %s6043_s10, 16 }
 0x197   :  { %p4962_p4 = scmp.ne.s32.totalorder %s6043_s10, %s4961_s0  ;;  %p4965_p5 = scmp.lt.u32.totalorder %s4961_s0, %s6043_s10 }
 0x199   :  { %p4967_p6 = pnand %p4965_p5, %p4962_p4 }
 0x19b   :  { %4970 = shalt.err (!%p4967_p6)
}
 0x19c   :  { %s4971_s15 = scalar_lea.vmem %s240_s29, 16  ;;  %s4975_s27 = scalar_lea.vmem %s240_s29, 32 }
 0x19d   :  { %p4972_p7 = scmp.ne.s32.totalorder %s240_s29, %s4971_s15  ;;  %p4976_p8 = scmp.lt.s32.totalorder %s240_s29, %s240_s29 }
 0x19e   :  { %p4977_p9 = scmp.lt.s32.totalorder %s4975_s27, %s4971_s15 }
 0x1a0   :  { %p4978_p10 = por %p4977_p9, %p4976_p8 }
 0x1a2   :  { %p4979_p11 = pnand %p4978_p10, %p4972_p7 }
 0x1a4   :  { %4982 = shalt.err (!%p4979_p11)
}
 0x1a5   :  { %s6044_s16 = sld [smem:[#allocation71_spill]] }
 0x1a6   :  { %242 = dma.hbm_to_vmem [thread:$0]  %s6043_s10, 16, %s240_s29, [#allocation21]  }
 0x1ab   :  { %s4983_s13 = scalar_lea.hbm %s6044_s16, 16 }
 0x1ac   :  { %p4984_p12 = scmp.ne.s32.totalorder %s6044_s16, %s4983_s13  ;;  %p4987_p13 = scmp.lt.u32.totalorder %s4983_s13, %s6044_s16 }
 0x1ae   :  { %p4989_p0 = pnand %p4987_p13, %p4984_p12 }
 0x1b0   :  { %4992 = shalt.err (!%p4989_p0)
}
 0x1b1   :  { %s4993_s6 = scalar_lea.vmem %s262_s24, 16  ;;  %s4997_s22 = scalar_lea.vmem %s262_s24, 32 }
 0x1b2   :  { %p4994_p1 = scmp.ne.s32.totalorder %s262_s24, %s4993_s6  ;;  %p4998_p2 = scmp.lt.s32.totalorder %s262_s24, %s262_s24 }
 0x1b3   :  { %p4999_p3 = scmp.lt.s32.totalorder %s4997_s22, %s4993_s6 }
 0x1b5   :  { %p5000_p4 = por %p4999_p3, %p4998_p2 }
 0x1b7   :  { %p5001_p5 = pnand %p5000_p4, %p4994_p1 }
 0x1b9   :  { %5004 = shalt.err (!%p5001_p5)
}
 0x1ba   :  { %s6045_s17 = sld [smem:[#allocation72_spill]]  ;;  %s5249_s18 = smov [#allocation28]  }
 0x1bb   :  { %264 = dma.hbm_to_vmem [thread:$0]  %s6044_s16, 16, %s262_s24, [#allocation24]  }
 0x1bc   :  { %s283_s21 = sshll.u32 %s5249_s18, 4  ;;  %s5250_s23 = smov [#allocation31]   ;;  %s284_s21 = int_to_ptr.vmem [resolvable:$true] %s283_s21 }
 0x1bd   :  { %s305_s1 = sshll.u32 %s5250_s23, 4  ;;  %s306_s1 = int_to_ptr.vmem [resolvable:$true] %s305_s1 }
 0x1c0   :  { %s5005_s4 = scalar_lea.hbm %s6045_s17, 16 }
 0x1c1   :  { %p5006_p6 = scmp.ne.s32.totalorder %s6045_s17, %s5005_s4  ;;  %p5009_p7 = scmp.lt.u32.totalorder %s5005_s4, %s6045_s17 }
 0x1c3   :  { %p5011_p8 = pnand %p5009_p7, %p5006_p6 }
 0x1c5   :  { %5014 = shalt.err (!%p5011_p8)
}
 0x1c6   :  { %s5015_s8 = scalar_lea.vmem %s284_s21, 16  ;;  %s5019_s3 = scalar_lea.vmem %s284_s21, 32 }
 0x1c7   :  { %p5016_p9 = scmp.ne.s32.totalorder %s284_s21, %s5015_s8  ;;  %p5020_p10 = scmp.lt.s32.totalorder %s284_s21, %s284_s21 }
 0x1c8   :  { %p5021_p11 = scmp.lt.s32.totalorder %s5019_s3, %s5015_s8 }
 0x1ca   :  { %p5022_p12 = por %p5021_p11, %p5020_p10 }
 0x1cc   :  { %p5023_p13 = pnand %p5022_p12, %p5016_p9 }
 0x1ce   :  { %5026 = shalt.err (!%p5023_p13)
}
 0x1cf   :  { %s6046_s19 = sld [smem:[#allocation73_spill]] }
 0x1d0   :  { %286 = dma.hbm_to_vmem [thread:$0]  %s6045_s17, 16, %s284_s21, [#allocation27]  }
 0x1d5   :  { %s5027_s2 = scalar_lea.hbm %s6046_s19, 16 }
 0x1d6   :  { %p5028_p0 = scmp.ne.s32.totalorder %s6046_s19, %s5027_s2  ;;  %p5031_p1 = scmp.lt.u32.totalorder %s5027_s2, %s6046_s19 }
 0x1d8   :  { %p5033_p2 = pnand %p5031_p1, %p5028_p0 }
 0x1da   :  { %5036 = shalt.err (!%p5033_p2)
}
 0x1db   :  { %s5037_s7 = scalar_lea.vmem %s306_s1, 16  ;;  %s5041_s30 = scalar_lea.vmem %s306_s1, 32 }
 0x1dc   :  { %p5038_p3 = scmp.ne.s32.totalorder %s306_s1, %s5037_s7  ;;  %p5042_p4 = scmp.lt.s32.totalorder %s306_s1, %s306_s1 }
 0x1dd   :  { %p5043_p5 = scmp.lt.s32.totalorder %s5041_s30, %s5037_s7 }
 0x1df   :  { %p5044_p6 = por %p5043_p5, %p5042_p4 }
 0x1e1   :  { %p5045_p7 = pnand %p5044_p6, %p5038_p3 }
 0x1e3   :  { %5048 = shalt.err (!%p5045_p7)
}
 0x1e4   :  { %s6047_s9 = sld [smem:[#allocation75_spill]]  ;;  %s5251_s10 = smov [#allocation34]  }
 0x1e5   :  { %308 = dma.hbm_to_vmem [thread:$0]  %s6046_s19, 16, %s306_s1, [#allocation30]  }
 0x1e6   :  { %s327_s11 = sshll.u32 %s5251_s10, 4  ;;  %s5252_s29 = smov [#allocation37]   ;;  %s328_s11 = int_to_ptr.vmem [resolvable:$true] %s327_s11 }
 0x1e7   :  { %s346_s5 = sshll.u32 %s5252_s29, 4  ;;  %s5572_s5 = int_to_ptr.vmem [resolvable:$true] %s346_s5 }
 0x1ea   :  { %s5049_s24 = scalar_lea.hbm %s6047_s9, 16 }
 0x1eb   :  { %p5050_p8 = scmp.ne.s32.totalorder %s6047_s9, %s5049_s24  ;;  %p5053_p9 = scmp.lt.u32.totalorder %s5049_s24, %s6047_s9 }
 0x1ed   :  { %p5055_p10 = pnand %p5053_p9, %p5050_p8 }
 0x1ef   :  { %5058 = shalt.err (!%p5055_p10)
}
 0x1f0   :  { %s5059_s0 = scalar_lea.vmem %s328_s11, 16  ;;  %s5063_s15 = scalar_lea.vmem %s328_s11, 32 }
 0x1f1   :  { %p5060_p11 = scmp.ne.s32.totalorder %s328_s11, %s5059_s0  ;;  %p5064_p12 = scmp.lt.s32.totalorder %s328_s11, %s328_s11 }
 0x1f2   :  { %p5065_p13 = scmp.lt.s32.totalorder %s5063_s15, %s5059_s0 }
 0x1f4   :  { %p5066_p0 = por %p5065_p13, %p5064_p12 }
 0x1f6   :  { %p5067_p1 = pnand %p5066_p0, %p5060_p11 }
 0x1f8   :  { %5070 = shalt.err (!%p5067_p1)
}
 0x1f9   :  { %s6048_s27 = sld [smem:[#allocation76_spill]] }
 0x1fa   :  { %330 = dma.hbm_to_vmem [thread:$0]  %s6047_s9, 16, %s328_s11, [#allocation33]  }
 0x1ff   :  { %s5071_s16 = scalar_lea.hbm %s6048_s27, 512 }
 0x200   :  { %p5072_p2 = scmp.ne.s32.totalorder %s6048_s27, %s5071_s16  ;;  %p5075_p3 = scmp.lt.u32.totalorder %s5071_s16, %s6048_s27 }
 0x202   :  { %p5077_p4 = pnand %p5075_p3, %p5072_p2 }
 0x204   :  { %5080 = shalt.err (!%p5077_p4)
}
 0x205   :  { %s5081_s13 = scalar_lea.vmem %s5572_s5, 512  ;;  %p5086_p6 = scmp.lt.s32.totalorder %s5572_s5, %s5572_s5 }
 0x206   :  { %p5082_p5 = scmp.ne.s32.totalorder %s5572_s5, %s5081_s13  ;;  %p5087_p7 = scmp.lt.s32.totalorder %s5081_s13, %s5081_s13 }
 0x208   :  { %p5088_p8 = por %p5087_p7, %p5086_p6 }
 0x20a   :  { %p5089_p9 = pnand %p5088_p8, %p5082_p5 }
 0x20c   :  { %5092 = shalt.err (!%p5089_p9)
}
 0x20d   :  { %s6049_s6 = sld [smem:[#allocation78_spill]]  ;;  %s5253_s22 = smov [#allocation40]  }
 0x20e   :  { %352 = dma.hbm_to_vmem [thread:$0]  %s6048_s27, 512, %s5572_s5, [#allocation36], %s5229_s26, %s5229_s26, %s5230_s28  }
 0x20f   :  { %s371_s17 = sshll.u32 %s5253_s22, 4  ;;  %s5254_s18 = smov [#allocation41]   ;;  %s372_s17 = int_to_ptr.vmem [resolvable:$true] %s371_s17 }
 0x210   :  { %s381_s21 = sshll.u32 %s5254_s18, 4  ;;  %s382_s21 = int_to_ptr.vmem [resolvable:$true] %s381_s21 }
 0x213   :  { %s5093_s23 = scalar_lea.hbm %s6049_s6, 16 }
 0x214   :  { %p5094_p10 = scmp.ne.s32.totalorder %s6049_s6, %s5093_s23  ;;  %p5097_p11 = scmp.lt.u32.totalorder %s5093_s23, %s6049_s6 }
 0x216   :  { %p5099_p12 = pnand %p5097_p11, %p5094_p10 }
 0x218   :  { %5102 = shalt.err (!%p5099_p12)
}
 0x219   :  { %s5103_s1 = scalar_lea.vmem %s372_s17, 16  ;;  %s5107_s4 = scalar_lea.vmem %s372_s17, 32 }
 0x21a   :  { %p5104_p13 = scmp.ne.s32.totalorder %s372_s17, %s5103_s1  ;;  %p5108_p0 = scmp.lt.s32.totalorder %s372_s17, %s372_s17 }
 0x21b   :  { %p5109_p1 = scmp.lt.s32.totalorder %s5107_s4, %s5103_s1 }
 0x21d   :  { %p5110_p2 = por %p5109_p1, %p5108_p0 }
 0x21f   :  { %p5111_p3 = pnand %p5110_p2, %p5104_p13 }
 0x221   :  { %5114 = shalt.err (!%p5111_p3)
}
 0x222   :  { %s6050_s8 = sld [smem:[#allocation79_spill]] }
 0x223   :  { %374 = dma.hbm_to_vmem [thread:$0]  %s6049_s6, 16, %s372_s17, [#allocation39]  }
 0x228   :  { %s5115_s3 = scalar_lea.hbm %s6050_s8, 16 }
 0x229   :  { %p5116_p4 = scmp.ne.s32.totalorder %s6050_s8, %s5115_s3  ;;  %p5119_p5 = scmp.lt.u32.totalorder %s5115_s3, %s6050_s8 }
 0x22b   :  { %p5121_p6 = pnand %p5119_p5, %p5116_p4 }
 0x22d   :  { %5124 = shalt.err (!%p5121_p6)
}
 0x22e   :  { %s5125_s19 = scalar_lea.vmem %s382_s21, 16  ;;  %s5129_s2 = scalar_lea.vmem %s382_s21, 32 }
 0x22f   :  { %p5126_p7 = scmp.ne.s32.totalorder %s382_s21, %s5125_s19  ;;  %p5130_p8 = scmp.lt.s32.totalorder %s382_s21, %s382_s21 }
 0x230   :  { %p5131_p9 = scmp.lt.s32.totalorder %s5129_s2, %s5125_s19 }
 0x232   :  { %p5132_p10 = por %p5131_p9, %p5130_p8 }
 0x234   :  { %p5133_p11 = pnand %p5132_p10, %p5126_p7 }
 0x236   :  { %5136 = shalt.err (!%p5133_p11)
}
 0x237   :  { %384 = dma.hbm_to_vmem [thread:$0]  %s6050_s8, 16, %s382_s21, [#allocation42]  }
 0x238   :  { %5159 = dma.done.wait [#allocation3], 256  }
 0x239   :  { %5160 = vsyncadd [#allocation3], 4294967040 }
 0x23a   :  { %5161 = dma.done.wait [#allocation6], 272  }
 0x23b   :  { %5162 = vsyncadd [#allocation6], 4294967024 }
 0x23c   :  { %5163 = dma.done.wait [#allocation9], 32  }
 0x23d   :  { %5164 = vsyncadd [#allocation9], 4294967264 }
 0x23e   :  { %5165 = dma.done.wait [#allocation12], 32  }
 0x23f   :  { %5166 = vsyncadd [#allocation12], 4294967264 }
 0x240   :  { %5167 = dma.done.wait [#allocation15], 32  }
 0x241   :  { %5168 = vsyncadd [#allocation15], 4294967264 }
 0x242   :  { %5169 = dma.done.wait [#allocation18], 32  }
 0x243   :  { %5170 = vsyncadd [#allocation18], 4294967264 }
 0x244   :  { %5171 = dma.done.wait [#allocation21], 32  }
 0x245   :  { %5172 = vsyncadd [#allocation21], 4294967264 }
 0x246   :  { %5173 = dma.done.wait [#allocation24], 32  }
 0x247   :  { %5174 = vsyncadd [#allocation24], 4294967264 }
 0x248   :  { %5175 = dma.done.wait [#allocation27], 528  }
 0x249   :  { %5176 = vsyncadd [#allocation27], 4294966768 }
 0x24a   :  { %5177 = dma.done.wait [#allocation30], 528  }
 0x24b   :  { %5178 = vsyncadd [#allocation30], 4294966768 }
 0x24c   :  { %5179 = dma.done.wait [#allocation33], 32  }
 0x24d   :  { %5180 = vsyncadd [#allocation33], 4294967264 }
 0x24e   :  { %5181 = dma.done.wait [#allocation36], 528  }
 0x24f   :  { %5182 = vsyncadd [#allocation36], 4294966768 }
 0x250   :  { %5183 = dma.done.wait [#allocation39], 32  }
 0x251   :  { %5184 = vsyncadd [#allocation39], 4294967264 }
 0x252   :  { %5185 = dma.done.wait [#allocation42], 16  }
 0x253   :  { %5186 = vsyncadd [#allocation42], 4294967280  ;;  %vm533_vm0 = vcmask 261120   ;;  %v5598_v0 = vld [vmem:[#allocation2] sm:$0xff]  ;;  %v5600_v1 = vld [vmem:[#allocation2 + $0x8] sm:$0xff]  ;;  %s6051_s7 = sld [smem:[#allocation59_spill]]  ;;  %v473_v29 = vlaneseq }
 0x254   :  { %v534_v2 = vsel %vm533_vm0, %v5598_v0, 0.0  ;;  %v537_v3 = vsel %vm533_vm0, %v5600_v1, 0.0  ;;  %s6052_s30 = sld [smem:[#allocation61_spill]]  ;;  %s6053_s9 = sld [smem:[#allocation62_spill]]  ;;  %v5255_v31 = vmov 0.0   ;;  %vm5659_vm13 = vmpackc.low %vm533_vm0, %vm533_vm0 }
 0x255   :  { %535 = vadd.xlane.f32.xlu0 %v534_v2  ;;  %v5628_v30 = vand.u32 127, %v473_v29  ;;  %v3643_v50 = vld [vmem:[#allocation7] ss:$0 sm:$0xff]  ;;  %v3644_v52 = vld [vmem:[#allocation8] ss:$0 sm:$0xff]  ;;  %s6056_s10 = sld [smem:[#allocation64_spill]] }
 0x256   :  { %v3648_v62 = vld [vmem:[#allocation11] ss:$0 sm:$0xff]  ;;  %v3645_v63 = vld [vmem:[#allocation10] ss:$0 sm:$0xff]  ;;  %s6057_s11 = sld [smem:[#allocation66_spill]]  ;;  %s6058_s29 = sld [smem:[#allocation68_spill]] }
 0x257   :  { %vm490_vm1 = vcmp.ge.s32.totalorder %v5628_v30, 24  ;;  %vm491_vm2 = vcmp.lt.s32.totalorder %v5628_v30, 32  ;;  %vm480_vm8 = vcmp.ge.s32.totalorder %v5628_v30, 8  ;;  %vm481_vm9 = vcmp.lt.s32.totalorder %v5628_v30, 16  ;;  %s6059_s5 = sld [smem:[#allocation70_spill]]  ;;  %s6060_s24 = sld [smem:[#allocation74_spill]] }
 0x258   :  { %vm492_vm3 = vmand %vm490_vm1, %vm491_vm2  ;;  %vm476_vm10 = vcmp.lt.s32.totalorder %v5628_v30, 8  ;;  %vm485_vm12 = vcmp.ge.s32.totalorder %v5628_v30, 16  ;;  %vm486_vm14 = vcmp.lt.s32.totalorder %v5628_v30, 24  ;;  %vm933_vm1 = vcmask 130048   ;;  %s6061_s0 = sld [smem:[#allocation77_spill]] }
 0x259   :  { %538 = vadd.xlane.f32.xlu0 %v537_v3  ;;  %v497_v14 = vld [vmem:[%s6051_s7] sm:$0xff]  ;;  %v498_v15 = vld [vmem:[%s6051_s7 + $0x8] sm:$0xff]  ;;  %v499_v19 = vld [vmem:[%s6051_s7 + $0x10] sm:$0xff]  ;;  %v5633_v32 = vsel %vm492_vm3, 1.0, %v5255_v31 }
 0x25a   :  { %v502_v16 = vld [vmem:[%s6052_s30] sm:$0xff]  ;;  %v4165_v17 = vpack.c.bf16 %v498_v15, %v497_v14  ;;  %v503_v18 = vld [vmem:[%s6052_s30 + $0x8] sm:$0xff]  ;;  %v500_v20 = vld [vmem:[%s6051_s7 + $0x18] sm:$0xff] }
 0x25b   :  { %v4173_v21 = vpack.c.bf16 %v503_v18, %v502_v16  ;;  %v4169_v22 = vpack.c.bf16 %v500_v20, %v499_v19  ;;  %v504_v23 = vld [vmem:[%s6052_s30 + $0x10] sm:$0xff]  ;;  %v505_v24 = vld [vmem:[%s6052_s30 + $0x18] sm:$0xff]  ;;  %v507_v26 = vld [vmem:[%s6053_s9] sm:$0xff] }
 0x25c   :  { %4166 = vmatprep.subr.bf16.mxu0 %v4165_v17  ;;  %v4177_v25 = vpack.c.bf16 %v505_v24, %v504_v23  ;;  %v508_v27 = vld [vmem:[%s6053_s9 + $0x8] sm:$0xff]  ;;  %v509_v57 = vld [vmem:[%s6053_s9 + $0x10] sm:$0xff]  ;;  %v510_v58 = vld [vmem:[%s6053_s9 + $0x18] sm:$0xff] }
 0x25d   :  { %4168 = vmatpush3.bf16.msra.mxu0 %v4165_v17  ;;  %4174 = vmatprep.subr.bf16.mxu1 %v4173_v21  ;;  %v4181_v28 = vpack.c.bf16 %v508_v27, %v507_v26  ;;  %v4185_v61 = vpack.c.bf16 %v510_v58, %v509_v57  ;;  %vm482_vm11 = vmand %vm480_vm8, %vm481_vm9  ;;  %v3651_v15 = vld [vmem:[#allocation13] ss:$0 sm:$0xff] }
 0x25e   :  { %4176 = vmatpush3.bf16.msra.mxu1 %v4173_v21  ;;  %4170 = vmatprep.subr.bf16.mxu0 %v4169_v22  ;;  %vm487_vm15 = vmand %vm485_vm12, %vm486_vm14 }
 0x25f   :  { %4178 = vmatprep.subr.bf16.mxu1 %v4177_v25  ;;  %v5690_v20 = vsel %vm487_vm15, 1.0, %v5255_v31 }
 0x261   :  { %4172 = vmatpush3.bf16.msra.mxu0 %v4169_v22 }
 0x262   :  { %4180 = vmatpush3.bf16.msra.mxu1 %v4177_v25  ;;  %4182 = vmatprep.subr.bf16.mxu0 %v4181_v28 }
 0x2e2   :  { %v536_v4 = vpop.xlane.xlu0 %535 }
 0x2e3   :  { %v541_v5 = vmul.f32 0.03125, %v536_v4  ;;  %v5649_v4 = vsel %vm476_vm10, 1.0, %v5255_v31 }
 0x2e5   :  { %v5607_v6 = vsub.f32 %v5598_v0, %v541_v5  ;;  %v5652_v5 = vsel %vm482_vm11, 1.0, %v5255_v31 }
 0x2e6   :  { %v539_v7 = vpop.xlane.xlu0 %538 }
 0x2e7   :  { %v542_v8 = vmul.f32 0.03125, %v539_v7  ;;  %v545_v9 = vmul.f32 %v5607_v6, %v5607_v6 }
 0x2e9   :  { %v5612_v10 = vsub.f32 %v5600_v1, %v542_v8  ;;  %v547_v11 = vsel %vm533_vm0, %v545_v9, 0.0 }
 0x2ea   :  { %548 = vadd.xlane.f32.xlu1 %v547_v11 }
 0x2eb   :  { %v546_v12 = vmul.f32 %v5612_v10, %v5612_v10 }
 0x2ed   :  { %v550_v13 = vsel %vm533_vm0, %v546_v12, 0.0 }
 0x2ee   :  { %551 = vadd.xlane.f32.xlu1 %v550_v13 }
 0x377   :  { %v549_v33 = vpop.xlane.xlu1 %548 }
 0x378   :  { %v553_v34 = vmul.f32 0.032258064, %v549_v33 }
 0x37a   :  { %4445 = vrsqrt.f32 %v553_v34  ;;  %vm557_vm4 = vcmp.eq.f32.partialorder %v553_v34, inf  ;;  %v560_v39 = vand.u32 2147483648, %v553_v34  ;;  %vm559_vm5 = vcmp.eq.f32.partialorder %v553_v34, 0.0 }
 0x37b   :  { %v552_v35 = vpop.xlane.xlu1 %551 }
 0x37c   :  { %v554_v36 = vmul.f32 0.032258064, %v552_v35 }
 0x37e   :  { %4447 = vrsqrt.f32 %v554_v36  ;;  %vm564_vm6 = vcmp.eq.f32.partialorder %v554_v36, inf  ;;  %v567_v45 = vand.u32 2147483648, %v554_v36  ;;  %vm566_vm7 = vcmp.eq.f32.partialorder %v554_v36, 0.0 }
 0x384   :  { %v4446_v37 = vpop.eup %4445 }
 0x385   :  { %v556_v38 = vmul.f32 %v4446_v37, %v553_v34 }
 0x387   :  { %v558_v40 = vsel %vm557_vm4, %v553_v34, %v556_v38 }
 0x388   :  { %v4448_v41 = vpop.eup %4447  ;;  %v561_v42 = vsel %vm559_vm5, %v560_v39, %v558_v40 }
 0x389   :  { %v563_v43 = vmul.f32 %v4448_v41, %v554_v36  ;;  %v569_v44 = vadd.f32 1e-05, %v561_v42  ;;  %v5722_v41 = vld [vmem:[#allocation5 + $0x8] sm:$0xff]  ;;  %v5724_v42 = vld [vmem:[#allocation5] sm:$0xff] }
 0x38b   :  { %v565_v46 = vsel %vm564_vm6, %v554_v36, %v563_v43  ;;  %4449 = vrcp.f32 %v569_v44  ;;  %vm1867_vm6 = vcmask 523264  }
 0x38c   :  { %v568_v47 = vsel %vm566_vm7, %v567_v45, %v565_v46 }
 0x38d   :  { %v570_v48 = vadd.f32 1e-05, %v568_v47 }
 0x38f   :  { %4451 = vrcp.f32 %v570_v48 }
 0x395   :  { %v4450_v49 = vpop.eup %4449 }
 0x396   :  { %v573_v51 = vmul.f32 %v4450_v49, %v5607_v6 }
 0x398   :  { %v581_v53 = vmul.f32 %v3643_v50, %v573_v51 }
 0x399   :  { %v4452_v54 = vpop.eup %4451 }
 0x39a   :  { %v574_v55 = vmul.f32 %v4452_v54, %v5612_v10  ;;  %v589_v56 = vadd.f32 %v3644_v52, %v581_v53 }
 0x39c   :  { %v582_v59 = vmul.f32 %v3643_v50, %v574_v55  ;;  %3902 = vmatprep.mubr.msk.f32.mxu0 %vm533_vm0, %v589_v56  ;;  %3913 = vmatprep.mubr.msk.f32.mxu1 %vm533_vm0, %v589_v56 }
 0x39e   :  { %v590_v60 = vadd.f32 %v3644_v52, %v582_v59 }
 0x3a0   :  { %3903 = vmatmul.mubr.msk.f32.vlgmr.msra.gmra.mrb[0].mxu0 %vm533_vm0, %v590_v60  ;;  %3914 = vmatmul.mubr.msk.f32.vlgmr.msra.gmra.mrb[0].mxu1 %vm533_vm0, %v590_v60 }
 0x3a1   :  { %4184 = vmatpush3.bf16.msra.mxu0 %v4181_v28  ;;  %3924 = vmatprep.mubr.msk.f32.mxu0 %vm533_vm0, %v589_v56 }
 0x3a2   :  { %4186 = vmatprep.subr.bf16.mxu0 %v4185_v61 }
 0x3a5   :  { %4188 = vmatpush3.bf16.msra.mxu0 %v4185_v61 }
 0x3a8   :  { %3925 = vmatmul.mubr.msk.f32.vlgmr.msra.gmra.mrb[2].mxu0 %vm533_vm0, %v590_v60 }
 0x473   :  { %v3904_v2 = vpop.f32.mrb[0].mxu0  ;;  %v3915_v3 = vpop.f32.mrb[0].mxu1 }
 0x474   :  { %v756_v6 = vadd.f32 %v3915_v3, %v3648_v62  ;;  %v669_v7 = vpop.f32.mrb[1].mxu0  ;;  %v750_v8 = vpop.f32.mrb[1].mxu1  ;;  %v5684_v17 = vadd.f32 %v3904_v2, %v3645_v63 }
 0x475   :  { %v5654_v9 = vadd.f32 %v3645_v63, %v669_v7  ;;  %v751_v10 = vadd.f32 %v3648_v62, %v750_v8 }
 0x476   :  { %v841_v30 = vmul.f32 %v5649_v4, %v5684_v17  ;;  %v959_v31 = vmul.f32 %v5652_v5, %v5684_v17  ;;  %v1232_v38 = vmul.f32 %v5690_v20, %v5684_v17 }
 0x477   :  { %v5664_v12 = vpack.c.bf16 %v756_v6, %v751_v10  ;;  %v840_v13 = vmul.f32 %v5649_v4, %v5654_v9  ;;  %v958_v14 = vmul.f32 %v5652_v5, %v5654_v9  ;;  %v1231_v37 = vmul.f32 %v5690_v20, %v5654_v9 }
 0x479   :  { %4191 = vmatprep.subr.msk.bf16.mxu1 %vm5659_vm13, %v5664_v12  ;;  %3931 = vmatprep.mubr.msk.f32.mxu1 %vm533_vm0, %v840_v13 }
 0x47a   :  { %4197 = vmatprep.subr.msk.bf16.mxu0 %vm5659_vm13, %v5664_v12  ;;  %3938 = vmatprep.mubr.msk.f32.mxu0 %vm533_vm0, %v958_v14 }
 0x47b   :  { %v3926_v16 = vpop.f32.mrb[2].mxu0  ;;  %4194 = vmatpush3.bf16.xpose.msk.msra.mxu1 %vm5659_vm13, %v5664_v12  ;;  %4200 = vmatpush3.bf16.xpose.msk.msra.mxu0 %vm5659_vm13, %v5664_v12 }
 0x47c   :  { %v837_v18 = vadd.f32 %v3926_v16, %v3651_v15  ;;  %v831_v19 = vpop.f32.mrb[3].mxu0  ;;  %4211 = vmatprep.subr.msk.bf16.mxu0 %vm5659_vm13, %v5664_v12 }
 0x47d   :  { %v832_v21 = vadd.f32 %v3651_v15, %v831_v19 }
 0x47e   :  { %v1068_v22 = vmul.f32 %v5652_v5, %v837_v18  ;;  %v957_v23 = vmul.f32 %v5649_v4, %v837_v18  ;;  %v1341_v24 = vmul.f32 %v5690_v20, %v837_v18  ;;  %v1535_v25 = vmul.f32 %v5633_v32, %v837_v18 }
 0x47f   :  { %v1067_v26 = vmul.f32 %v5652_v5, %v832_v21  ;;  %v956_v27 = vmul.f32 %v5649_v4, %v832_v21  ;;  %v1340_v28 = vmul.f32 %v5690_v20, %v832_v21  ;;  %v1534_v29 = vmul.f32 %v5633_v32, %v832_v21 }
 0x481   :  { %v4201_v33 = vpack.c.bf16 %v1068_v22, %v1067_v26  ;;  %v5704_v34 = vpack.c.bf16 %v957_v23, %v956_v27  ;;  %v5706_v35 = vpack.c.bf16 %v1341_v24, %v1340_v28  ;;  %v5708_v36 = vpack.c.bf16 %v1535_v25, %v1534_v29 }
 0x482   :  { %3932 = vmatmul.mubr.msk.f32.vlgmr.msra.gmra.mrb[2].mxu1 %vm533_vm0, %v841_v30  ;;  %3939 = vmatmul.mubr.msk.f32.vlgmr.msra.gmra.mrb[4].mxu0 %vm533_vm0, %v959_v31 }
 0x483   :  { %4202 = vmatprep.subr.bf16.mxu1 %v4201_v33  ;;  %4214 = vmatpush3.bf16.xpose.msk.msra.mxu0 %vm5659_vm13, %v5664_v12 }
 0x484   :  { %3959 = vmatprep.mubr.msk.f32.mxu0 %vm533_vm0, %v1231_v37  ;;  %4204 = vmatpush3.bf16.msra.mxu1 %v4201_v33 }
 0x485   :  { %4206 = vmatprep.subr.bf16.mxu1 %v5704_v34 }
 0x48a   :  { %3960 = vmatmul.mubr.msk.f32.vlgmr.msra.gmra.mrb[6].mxu0 %vm533_vm0, %v1232_v38 }
 0x555   :  { %v3933_v39 = vpop.f32.mrb[2].mxu1  ;;  %v3940_v40 = vpop.f32.mrb[4].mxu0 }
 0x556   :  { %v930_v43 = vmul.f32 0.35355338, %v3933_v39  ;;  %v1042_v44 = vmul.f32 0.35355338, %v3940_v40  ;;  %v920_v45 = vpop.f32.mrb[3].mxu1  ;;  %v1032_v46 = vpop.f32.mrb[5].mxu0 }
 0x557   :  { %v929_v47 = vmul.f32 0.35355338, %v920_v45  ;;  %v1041_v48 = vmul.f32 0.35355338, %v1032_v46 }
 0x558   :  { %v1044_v49 = vadd.f32 %v1042_v44, %v5722_v41  ;;  %v932_v52 = vadd.f32 %v930_v43, %v5722_v41 }
 0x559   :  { %v1043_v50 = vadd.f32 %v1041_v48, %v5724_v42  ;;  %v931_v54 = vadd.f32 %v929_v47, %v5724_v42 }
 0x55a   :  { %v1048_v51 = vsel %vm933_vm1, %v1044_v49, -inf  ;;  %v937_v58 = vsel %vm933_vm1, %v932_v52, -inf }
 0x55b   :  { %1049 = vmax.xlane.f32.xlu1 %v1048_v51  ;;  %v1045_v53 = vsel %vm933_vm1, %v1043_v50, -inf  ;;  %v934_v60 = vsel %vm933_vm1, %v931_v54, -inf }
 0x55c   :  { %1046 = vmax.xlane.f32.xlu0 %v1045_v53 }
 0x55d   :  { %v3961_v55 = vpop.f32.mrb[6].mxu0 }
 0x55e   :  { %v1315_v56 = vmul.f32 0.35355338, %v3961_v55  ;;  %v1305_v57 = vpop.f32.mrb[7].mxu0 }
 0x55f   :  { %v1314_v59 = vmul.f32 0.35355338, %v1305_v57  ;;  %938 = vmax.xlane.f32.xlu1 %v937_v58 }
 0x560   :  { %935 = vmax.xlane.f32.xlu0 %v934_v60  ;;  %v1317_v61 = vadd.f32 %v1315_v56, %v5722_v41 }
 0x561   :  { %v1316_v62 = vadd.f32 %v1314_v59, %v5724_v42 }
 0x562   :  { %v1321_v63 = vsel %vm933_vm1, %v1317_v61, -inf }
 0x563   :  { %1322 = vmax.xlane.f32.xlu1 %v1321_v63  ;;  %v1318_v2 = vsel %vm933_vm1, %v1316_v62, -inf  ;;  %v1425_v63 = vmul.f32 %v5633_v32, %v5654_v9 }
 0x564   :  { %1319 = vmax.xlane.f32.xlu0 %v1318_v2 }
 0x5e8   :  { %v1050_v3 = vpop.xlane.xlu1 %1049 }
 0x5e9   :  { %v1052_v6 = vsub.f32 %v1044_v49, %v1050_v3  ;;  %v1047_v7 = vpop.xlane.xlu0 %1046 }
 0x5ea   :  { %v1051_v8 = vsub.f32 %v1043_v50, %v1047_v7 }
 0x5eb   :  { %v1055_v10 = vmul.f32 1.442695, %v1052_v6 }
 0x5ec   :  { %v1053_v13 = vmul.f32 1.442695, %v1051_v8  ;;  %v939_v14 = vpop.xlane.xlu1 %938 }
 0x5ed   :  { %4453 = vpow2.f32 %v1055_v10  ;;  %v941_v15 = vsub.f32 %v932_v52, %v939_v14  ;;  %v936_v16 = vpop.xlane.xlu0 %935 }
 0x5ee   :  { %4455 = vpow2.f32 %v1053_v13  ;;  %v940_v18 = vsub.f32 %v931_v54, %v936_v16 }
 0x5ef   :  { %v944_v19 = vmul.f32 1.442695, %v941_v15 }
 0x5f0   :  { %v942_v21 = vmul.f32 1.442695, %v940_v18  ;;  %v1323_v22 = vpop.xlane.xlu1 %1322 }
 0x5f1   :  { %4457 = vpow2.f32 %v944_v19  ;;  %v1325_v23 = vsub.f32 %v1317_v61, %v1323_v22  ;;  %v1320_v24 = vpop.xlane.xlu0 %1319 }
 0x5f2   :  { %4459 = vpow2.f32 %v942_v21  ;;  %v1324_v25 = vsub.f32 %v1316_v62, %v1320_v24  ;;  %v513_v24 = vld [vmem:[%s6056_s10 + $0x8] sm:$0xff] }
 0x5f3   :  { %v1328_v26 = vmul.f32 1.442695, %v1325_v23  ;;  %v512_v23 = vld [vmem:[%s6056_s10] sm:$0xff] }
 0x5f4   :  { %v1326_v27 = vmul.f32 1.442695, %v1324_v25  ;;  %v514_v25 = vld [vmem:[%s6056_s10 + $0x10] sm:$0xff] }
 0x5f5   :  { %4461 = vpow2.f32 %v1328_v26  ;;  %v4229_v26 = vpack.c.bf16 %v513_v24, %v512_v23 }
 0x5f6   :  { %4463 = vpow2.f32 %v1326_v27  ;;  %v515_v27 = vld [vmem:[%s6056_s10 + $0x18] sm:$0xff] }
 0x5f7   :  { %v4454_v28 = vpop.eup %4453  ;;  %4230 = vmatprep.subr.bf16.mxu0 %v4229_v26 }
 0x5f8   :  { %v4456_v29 = vpop.eup %4455  ;;  %v1060_v30 = vsel %vm933_vm1, %v4454_v28, 0.0  ;;  %4232 = vmatpush3.bf16.msra.mxu0 %v4229_v26  ;;  %v3682_v26 = vld [vmem:[#allocation17] ss:$0 sm:$0xff] }
 0x5f9   :  { %1061 = vadd.xlane.f32.xlu1 %v1060_v30  ;;  %v1057_v31 = vsel %vm933_vm1, %v4456_v29, 0.0 }
 0x5fa   :  { %1058 = vadd.xlane.f32.xlu0 %v1057_v31 }
 0x5fb   :  { %v4458_v33 = vpop.eup %4457 }
 0x5fc   :  { %v4460_v37 = vpop.eup %4459  ;;  %v949_v38 = vsel %vm933_vm1, %v4458_v33, 0.0 }
 0x5fd   :  { %950 = vadd.xlane.f32.xlu1 %v949_v38  ;;  %v946_v39 = vsel %vm933_vm1, %v4460_v37, 0.0 }
 0x5fe   :  { %947 = vadd.xlane.f32.xlu0 %v946_v39 }
 0x5ff   :  { %v4462_v40 = vpop.eup %4461 }
 0x600   :  { %v4464_v43 = vpop.eup %4463  ;;  %v1333_v44 = vsel %vm933_vm1, %v4462_v40, 0.0 }
 0x601   :  { %1334 = vadd.xlane.f32.xlu1 %v1333_v44  ;;  %v1330_v45 = vsel %vm933_vm1, %v4464_v43, 0.0 }
 0x602   :  { %1331 = vadd.xlane.f32.xlu0 %v1330_v45 }
 0x686   :  { %v1062_v46 = vpop.xlane.xlu1 %1061 }
 0x687   :  { %4465 = vrcp.f32 %v1062_v46  ;;  %v1059_v47 = vpop.xlane.xlu0 %1058 }
 0x688   :  { %4467 = vrcp.f32 %v1059_v47 }
 0x68a   :  { %v951_v49 = vpop.xlane.xlu1 %950 }
 0x68b   :  { %v948_v48 = vpop.xlane.xlu0 %947 }
 0x68c   :  { %4469 = vrcp.f32 %v948_v48 }
 0x68d   :  { %4471 = vrcp.f32 %v951_v49 }
 0x68e   :  { %v1335_v55 = vpop.xlane.xlu1 %1334 }
 0x68f   :  { %v1332_v50 = vpop.xlane.xlu0 %1331 }
 0x690   :  { %4473 = vrcp.f32 %v1332_v50 }
 0x691   :  { %v4466_v51 = vpop.eup %4465  ;;  %4475 = vrcp.f32 %v1335_v55 }
 0x692   :  { %v4468_v52 = vpop.eup %4467  ;;  %v1066_v54 = vmul.f32 %v4466_v51, %v4454_v28  ;;  %v4233_v28 = vpack.c.bf16 %v515_v27, %v514_v25 }
 0x693   :  { %v1065_v53 = vmul.f32 %v4468_v52, %v4456_v29 }
 0x694   :  { %4234 = vmatprep.subr.bf16.mxu0 %v4233_v28 }
 0x695   :  { %3945 = vmatprep.mubr.msk.f32.mxu1 %vm933_vm1, %v1065_v53  ;;  %4236 = vmatpush3.bf16.msra.mxu0 %v4233_v28 }
 0x696   :  { %v4470_v56 = vpop.eup %4469  ;;  %3946 = vmatmul.mubr.msk.f32.vlgmr.msra.gmra.mrb[4].mxu1 %vm933_vm1, %v1066_v54 }
 0x697   :  { %4208 = vmatpush3.bf16.msra.mxu1 %v5704_v34  ;;  %v954_v57 = vmul.f32 %v4470_v56, %v4460_v37  ;;  %v4472_v58 = vpop.eup %4471 }
 0x698   :  { %4216 = vmatprep.subr.bf16.mxu1 %v5706_v35  ;;  %v955_v60 = vmul.f32 %v4472_v58, %v4458_v33 }
 0x699   :  { %3952 = vmatprep.mubr.msk.f32.mxu1 %vm933_vm1, %v954_v57 }
 0x69a   :  { %v4474_v59 = vpop.eup %4473 }
 0x69b   :  { %v1338_v61 = vmul.f32 %v4474_v59, %v4464_v43  ;;  %v4476_v34 = vpop.eup %4475  ;;  %v3680_v43 = vld [vmem:[#allocation14] ss:$0 sm:$0xff] }
 0x69c   :  { %v1339_v62 = vmul.f32 %v4476_v34, %v4462_v40  ;;  %v521_v34 = vld [vmem:[%s6057_s11 + $0x10] sm:$0xff] }
 0x69e   :  { %3953 = vmatmul.mubr.msk.f32.vlgmr.msra.gmra.mrb[4].mxu1 %vm933_vm1, %v955_v60  ;;  %v519_v60 = vld [vmem:[%s6057_s11] sm:$0xff] }
 0x69f   :  { %4218 = vmatpush3.bf16.msra.mxu1 %v5706_v35  ;;  %3966 = vmatprep.mubr.msk.f32.mxu1 %vm933_vm1, %v1338_v61  ;;  %v1426_v35 = vmul.f32 %v5633_v32, %v5684_v17  ;;  %v520_v61 = vld [vmem:[%s6057_s11 + $0x8] sm:$0xff] }
 0x6a0   :  { %4221 = vmatprep.subr.msk.bf16.mxu1 %vm5659_vm13, %v5664_v12 }
 0x6a6   :  { %3967 = vmatmul.mubr.msk.f32.vlgmr.msra.gmra.mrb[4].mxu1 %vm933_vm1, %v1339_v62  ;;  %v4237_v62 = vpack.c.bf16 %v520_v61, %v519_v60 }
 0x6a7   :  { %3973 = vmatprep.mubr.msk.f32.mxu1 %vm533_vm0, %v1425_v63  ;;  %v522_v63 = vld [vmem:[%s6057_s11 + $0x18] sm:$0xff] }
 0x6a8   :  { %4224 = vmatpush3.bf16.xpose.msk.msra.mxu1 %vm5659_vm13, %v5664_v12  ;;  %4238 = vmatprep.subr.bf16.mxu0 %v4237_v62 }
 0x6a9   :  { %4226 = vmatprep.subr.bf16.mxu1 %v5708_v36 }
 0x6af   :  { %3974 = vmatmul.mubr.msk.f32.vlgmr.msra.gmra.mrb[6].mxu1 %vm533_vm0, %v1426_v35  ;;  %v4241_v35 = vpack.c.bf16 %v522_v63, %v521_v34  ;;  %v3690_v63 = vld [vmem:[#allocation20] ss:$0 sm:$0xff] }
 0x6b0   :  { %4228 = vmatpush3.bf16.msra.mxu1 %v5708_v36 }
 0x782   :  { %v3975_v2 = vpop.f32.mrb[6].mxu1 }
 0x783   :  { %v1509_v3 = vmul.f32 0.35355338, %v3975_v2  ;;  %v1499_v9 = vpop.f32.mrb[7].mxu1 }
 0x784   :  { %v1508_v6 = vmul.f32 0.35355338, %v1499_v9 }
 0x785   :  { %v1511_v7 = vadd.f32 %v1509_v3, %v5722_v41 }
 0x786   :  { %v1510_v8 = vadd.f32 %v1508_v6, %v5724_v42 }
 0x787   :  { %v1515_v10 = vsel %vm933_vm1, %v1511_v7, -inf }
 0x788   :  { %1516 = vmax.xlane.f32.xlu1 %v1515_v10  ;;  %v1512_v12 = vsel %vm933_vm1, %v1510_v8, -inf }
 0x789   :  { %1513 = vmax.xlane.f32.xlu0 %v1512_v12 }
 0x815   :  { %v1517_v17 = vpop.xlane.xlu1 %1516 }
 0x816   :  { %v1519_v13 = vsub.f32 %v1511_v7, %v1517_v17  ;;  %v1514_v36 = vpop.xlane.xlu0 %1513 }
 0x817   :  { %v1518_v14 = vsub.f32 %v1510_v8, %v1514_v36 }
 0x818   :  { %v1522_v15 = vmul.f32 1.442695, %v1519_v13 }
 0x819   :  { %v1520_v16 = vmul.f32 1.442695, %v1518_v14 }
 0x81a   :  { %4477 = vpow2.f32 %v1522_v15 }
 0x81b   :  { %4479 = vpow2.f32 %v1520_v16 }
 0x824   :  { %v4478_v18 = vpop.eup %4477 }
 0x825   :  { %v4480_v19 = vpop.eup %4479  ;;  %v1527_v21 = vsel %vm933_vm1, %v4478_v18, 0.0 }
 0x826   :  { %1528 = vadd.xlane.f32.xlu1 %v1527_v21  ;;  %v1524_v22 = vsel %vm933_vm1, %v4480_v19, 0.0 }
 0x827   :  { %1525 = vadd.xlane.f32.xlu0 %v1524_v22  ;;  %v3681_v22 = vld [vmem:[#allocation16] ss:$0 sm:$0xff] }
 0x8b3   :  { %v1529_v29 = vpop.xlane.xlu1 %1528 }
 0x8b4   :  { %4481 = vrcp.f32 %v1529_v29  ;;  %v1526_v30 = vpop.xlane.xlu0 %1525 }
 0x8b5   :  { %4483 = vrcp.f32 %v1526_v30 }
 0x8be   :  { %v4482_v31 = vpop.eup %4481 }
 0x8bf   :  { %v4484_v33 = vpop.eup %4483  ;;  %v1533_v38 = vmul.f32 %v4482_v31, %v4478_v18  ;;  %v524_v31 = vld [vmem:[%s6058_s29] sm:$0xff] }
 0x8c0   :  { %v1532_v37 = vmul.f32 %v4484_v33, %v4480_v19  ;;  %v525_v33 = vld [vmem:[%s6058_s29 + $0x8] sm:$0xff] }
 0x8c2   :  { %3980 = vmatprep.mubr.msk.f32.mxu1 %vm933_vm1, %v1532_v37  ;;  %v4245_v37 = vpack.c.bf16 %v525_v33, %v524_v31  ;;  %v1966_v33 = vld [vmem:[#allocation26] sm:$0xff] }
 0x8c3   :  { %3981 = vmatmul.mubr.msk.f32.vlgmr.msra.gmra.mrb[4].mxu1 %vm933_vm1, %v1533_v38  ;;  %v526_v38 = vld [vmem:[%s6058_s29 + $0x10] sm:$0xff] }
 0x8c4   :  { %4246 = vmatprep.subr.bf16.mxu1 %v4245_v37 }
 0x8c5   :  { %4248 = vmatpush3.bf16.msra.mxu1 %v4245_v37  ;;  %v1967_v37 = vld [vmem:[#allocation26 + $0x8] sm:$0xff] }
 0x996   :  { %v3982_v39 = vpop.f32.mrb[4].mxu1 }
 0x997   :  { %v1608_v40 = vpop.f32.mrb[5].mxu1 }
 0x998   :  { %3991 = vmatprep.mubr.msk.f32.mxu0 %vm533_vm0, %v1608_v40 }
 0x999   :  { %3992 = vmatmul.mubr.msk.f32.vlgmr.msra.gmra.mrb[8].mxu0 %vm533_vm0, %v3982_v39  ;;  %v527_v39 = vld [vmem:[%s6058_s29 + $0x18] sm:$0xff] }
 0x99a   :  { %4240 = vmatpush3.bf16.msra.mxu0 %v4237_v62  ;;  %v4249_v40 = vpack.c.bf16 %v527_v39, %v526_v38  ;;  %v4269_v38 = vpack.c.bf16 %v1967_v37, %v1966_v33 }
 0x99b   :  { %4242 = vmatprep.subr.bf16.mxu0 %v4241_v35 }
 0x99c   :  { %4250 = vmatprep.subr.bf16.mxu1 %v4249_v40 }
 0x99d   :  { %4252 = vmatpush3.bf16.msra.mxu1 %v4249_v40 }
 0x99e   :  { %4244 = vmatpush3.bf16.msra.mxu0 %v4241_v35 }
 0xa6c   :  { %v3993_v44 = vpop.f32.mrb[8].mxu0 }
 0xa6d   :  { %v1701_v45 = vadd.f32 %v3993_v44, %v5600_v1  ;;  %v1691_v46 = vpop.f32.mrb[9].mxu0  ;;  %v529_v44 = vld [vmem:[%s6058_s29 + $0x28] sm:$0xff] }
 0xa6e   :  { %v1700_v47 = vadd.f32 %v1691_v46, %v5598_v0  ;;  %v530_v46 = vld [vmem:[%s6058_s29 + $0x30] sm:$0xff] }
 0xa6f   :  { %v5783_v48 = vadd.f32 %v3680_v43, %v1701_v45 }
 0xa70   :  { %v5785_v49 = vadd.f32 %v3680_v43, %v1700_v47  ;;  %v528_v43 = vld [vmem:[%s6058_s29 + $0x20] sm:$0xff]  ;;  %v531_v47 = vld [vmem:[%s6058_s29 + $0x38] sm:$0xff] }
 0xa71   :  { %v1713_v50 = vsel %vm533_vm0, %v5783_v48, 0.0  ;;  %v4253_v45 = vpack.c.bf16 %v529_v44, %v528_v43 }
 0xa72   :  { %1714 = vadd.xlane.f32.xlu1 %v1713_v50  ;;  %v1710_v51 = vsel %vm533_vm0, %v5785_v49, 0.0  ;;  %v4257_v50 = vpack.c.bf16 %v531_v47, %v530_v46 }
 0xa73   :  { %1711 = vadd.xlane.f32.xlu0 %v1710_v51  ;;  %4254 = vmatprep.subr.bf16.mxu1 %v4253_v45  ;;  %v3683_v51 = vld [vmem:[#allocation19] ss:$0 sm:$0xff] }
 0xa74   :  { %4256 = vmatpush3.bf16.msra.mxu1 %v4253_v45 }
 0xa75   :  { %4258 = vmatprep.subr.bf16.mxu1 %v4257_v50 }
 0xa78   :  { %4260 = vmatpush3.bf16.msra.mxu1 %v4257_v50 }
 0xaff   :  { %v1715_v52 = vpop.xlane.xlu1 %1714 }
 0xb00   :  { %v1717_v1 = vmul.f32 0.03125, %v1715_v52  ;;  %v1712_v53 = vpop.xlane.xlu0 %1711 }
 0xb01   :  { %v1716_v0 = vmul.f32 0.03125, %v1712_v53 }
 0xb02   :  { %v1719_v54 = vsub.f32 %v5783_v48, %v1717_v1 }
 0xb03   :  { %v1718_v55 = vsub.f32 %v5785_v49, %v1716_v0 }
 0xb04   :  { %v1721_v56 = vmul.f32 %v1719_v54, %v1719_v54 }
 0xb05   :  { %v1720_v57 = vmul.f32 %v1718_v55, %v1718_v55 }
 0xb06   :  { %v1725_v58 = vsel %vm533_vm0, %v1721_v56, 0.0 }
 0xb07   :  { %1726 = vadd.xlane.f32.xlu1 %v1725_v58  ;;  %v1722_v59 = vsel %vm533_vm0, %v1720_v57, 0.0 }
 0xb08   :  { %1723 = vadd.xlane.f32.xlu0 %v1722_v59 }
 0xb94   :  { %v1727_v2 = vpop.xlane.xlu1 %1726 }
 0xb95   :  { %v1729_v3 = vmul.f32 0.032258064, %v1727_v2  ;;  %v1724_v9 = vpop.xlane.xlu0 %1723 }
 0xb96   :  { %v1728_v6 = vmul.f32 0.032258064, %v1724_v9 }
 0xb97   :  { %4485 = vrsqrt.f32 %v1729_v3  ;;  %vm1739_vm2 = vcmp.eq.f32.partialorder %v1729_v3, inf  ;;  %v1742_v12 = vand.u32 2147483648, %v1729_v3  ;;  %vm1741_vm3 = vcmp.eq.f32.partialorder %v1729_v3, 0.0 }
 0xb98   :  { %4487 = vrsqrt.f32 %v1728_v6  ;;  %vm1732_vm4 = vcmp.eq.f32.partialorder %v1728_v6, inf  ;;  %v1735_v36 = vand.u32 2147483648, %v1728_v6  ;;  %vm1734_vm5 = vcmp.eq.f32.partialorder %v1728_v6, 0.0 }
 0xba1   :  { %v4486_v7 = vpop.eup %4485 }
 0xba2   :  { %v4488_v8 = vpop.eup %4487  ;;  %v1738_v10 = vmul.f32 %v4486_v7, %v1729_v3 }
 0xba3   :  { %v1731_v17 = vmul.f32 %v4488_v8, %v1728_v6 }
 0xba4   :  { %v1740_v13 = vsel %vm1739_vm2, %v1729_v3, %v1738_v10 }
 0xba5   :  { %v1743_v14 = vsel %vm1741_vm3, %v1742_v12, %v1740_v13  ;;  %v1733_v15 = vsel %vm1732_vm4, %v1728_v6, %v1731_v17 }
 0xba6   :  { %v1745_v16 = vadd.f32 1e-05, %v1743_v14  ;;  %v1736_v18 = vsel %vm1734_vm5, %v1735_v36, %v1733_v15 }
 0xba7   :  { %v1744_v19 = vadd.f32 1e-05, %v1736_v18 }
 0xba8   :  { %4489 = vrcp.f32 %v1745_v16 }
 0xba9   :  { %4491 = vrcp.f32 %v1744_v19  ;;  %v1961_v19 = vld [vmem:[%s6059_s5] sm:$0xff] }
 0xbb2   :  { %v4490_v21 = vpop.eup %4489 }
 0xbb3   :  { %v4492_v23 = vpop.eup %4491  ;;  %v1749_v24 = vmul.f32 %v4490_v21, %v1719_v54  ;;  %v1962_v21 = vld [vmem:[%s6059_s5 + $0x8] sm:$0xff] }
 0xbb4   :  { %v1748_v25 = vmul.f32 %v4492_v23, %v1718_v55  ;;  %v4261_v23 = vpack.c.bf16 %v1962_v21, %v1961_v19 }
 0xbb5   :  { %v1757_v27 = vmul.f32 %v3681_v22, %v1749_v24  ;;  %v1972_v24 = vld [vmem:[#allocation29 + $0x8] sm:$0xff] }
 0xbb6   :  { %v1756_v28 = vmul.f32 %v3681_v22, %v1748_v25  ;;  %v1971_v22 = vld [vmem:[#allocation29] sm:$0xff]  ;;  %v1963_v25 = vld [vmem:[%s6059_s5 + $0x10] sm:$0xff]  ;;  %4262 = vmatprep.subr.bf16.mxu0 %v4261_v23 }
 0xbb7   :  { %v1765_v30 = vadd.f32 %v3682_v26, %v1757_v27  ;;  %v4277_v27 = vpack.c.bf16 %v1972_v24, %v1971_v22 }
 0xbb8   :  { %v1764_v29 = vadd.f32 %v3682_v26, %v1756_v28  ;;  %v1964_v26 = vld [vmem:[%s6059_s5 + $0x18] sm:$0xff] }
 0xbb9   :  { %v4265_v28 = vpack.c.bf16 %v1964_v26, %v1963_v25  ;;  %4278 = vmatprep.subr.bf16.mxu1 %v4277_v27  ;;  %v3696_v26 = vld [vmem:[#allocation28] ss:$0 sm:$0xff] }
 0xbba   :  { %4002 = vmatprep.mubr.msk.f32.mxu0 %vm533_vm0, %v1764_v29  ;;  %v1973_v29 = vld [vmem:[#allocation29 + $0x10] sm:$0xff] }
 0xbbb   :  { %4003 = vmatmul.mubr.msk.f32.vlgmr.msra.gmra.mrb[10].mxu0 %vm533_vm0, %v1765_v30  ;;  %v1974_v30 = vld [vmem:[#allocation29 + $0x18] sm:$0xff] }
 0xbbc   :  { %v4281_v31 = vpack.c.bf16 %v1974_v30, %v1973_v29  ;;  %4264 = vmatpush3.bf16.msra.mxu0 %v4261_v23 }
 0xbbd   :  { %4266 = vmatprep.subr.bf16.mxu0 %v4265_v28 }
 0xbc0   :  { %4268 = vmatpush3.bf16.msra.mxu0 %v4265_v28 }
 0xbc1   :  { %4270 = vmatprep.subr.bf16.mxu0 %v4269_v38 }
 0xc8e   :  { %v4004_v52 = vpop.f32.mrb[10].mxu0 }
 0xc8f   :  { %v1850_v1 = vadd.f32 %v4004_v52, %v3683_v51  ;;  %v1844_v53 = vpop.f32.mrb[11].mxu0 }
 0xc90   :  { %v1845_v0 = vadd.f32 %v3683_v51, %v1844_v53 }
 0xc91   :  { %v3687_v54 = vmul.f32 -1.442695, %v1850_v1 }
 0xc92   :  { %v3686_v55 = vmul.f32 -1.442695, %v1845_v0 }
 0xc93   :  { %4493 = vpow2.f32 %v3687_v54 }
 0xc94   :  { %4495 = vpow2.f32 %v3686_v55 }
 0xc9d   :  { %v4494_v56 = vpop.eup %4493 }
 0xc9e   :  { %v4496_v57 = vpop.eup %4495  ;;  %v1860_v58 = vadd.f32 1.0, %v4494_v56 }
 0xc9f   :  { %v1859_v59 = vadd.f32 1.0, %v4496_v57 }
 0xca0   :  { %4497 = vrcp.f32 %v1860_v58  ;;  %v3691_v58 = vld [vmem:[#allocation22] ss:$0 sm:$0xff] }
 0xca1   :  { %4499 = vrcp.f32 %v1859_v59 }
 0xcaa   :  { %v4498_v60 = vpop.eup %4497 }
 0xcab   :  { %v4500_v61 = vpop.eup %4499  ;;  %v1866_v62 = vmul.f32 %v4498_v60, %v1850_v1 }
 0xcac   :  { %v1865_v34 = vmul.f32 %v4500_v61, %v1845_v0 }
 0xcae   :  { %4021 = vmatprep.mubr.msk.f32.mxu1 %vm1867_vm6, %v1865_v34  ;;  %v3692_v34 = vld [vmem:[#allocation23] ss:$0 sm:$0xff] }
 0xcaf   :  { %4022 = vmatmul.mubr.msk.f32.vlgmr.msra.gmra.mrb[8].mxu1 %vm1867_vm6, %v1866_v62 }
 0xcb0   :  { %4280 = vmatpush3.bf16.msra.mxu1 %v4277_v27 }
 0xcb1   :  { %4282 = vmatprep.subr.bf16.mxu1 %v4281_v31 }
 0xcb4   :  { %4284 = vmatpush3.bf16.msra.mxu1 %v4281_v31 }
 0xd82   :  { %v4023_v35 = vpop.f32.mrb[8].mxu1 }
 0xd83   :  { %v1950_v2 = vadd.f32 %v4023_v35, %v5783_v48  ;;  %v1940_v3 = vpop.f32.mrb[9].mxu1  ;;  %v1968_v35 = vld [vmem:[#allocation26 + $0x10] sm:$0xff] }
 0xd84   :  { %v1949_v9 = vadd.f32 %v1940_v3, %v5785_v49 }
 0xd85   :  { %v5813_v6 = vadd.f32 %v3690_v63, %v1950_v2  ;;  %v1969_v2 = vld [vmem:[#allocation26 + $0x18] sm:$0xff] }
 0xd86   :  { %v5815_v7 = vadd.f32 %v3690_v63, %v1949_v9 }
 0xd87   :  { %v2000_v8 = vsel %vm533_vm0, %v5813_v6, 0.0 }
 0xd88   :  { %2001 = vadd.xlane.f32.xlu1 %v2000_v8  ;;  %v1997_v10 = vsel %vm533_vm0, %v5815_v7, 0.0  ;;  %v4273_v8 = vpack.c.bf16 %v1969_v2, %v1968_v35 }
 0xd89   :  { %1998 = vadd.xlane.f32.xlu0 %v1997_v10  ;;  %v3699_v10 = vld [vmem:[#allocation31] ss:$0 sm:$0xff] }
 0xe15   :  { %v2002_v12 = vpop.xlane.xlu1 %2001 }
 0xe16   :  { %v2004_v17 = vmul.f32 0.03125, %v2002_v12  ;;  %v1999_v48 = vpop.xlane.xlu0 %1998  ;;  %v3693_v12 = vld [vmem:[#allocation25] ss:$0 sm:$0xff] }
 0xe17   :  { %v2003_v49 = vmul.f32 0.03125, %v1999_v48 }
 0xe18   :  { %v2006_v13 = vsub.f32 %v5813_v6, %v2004_v17 }
 0xe19   :  { %v2005_v36 = vsub.f32 %v5815_v7, %v2003_v49 }
 0xe1a   :  { %v2008_v14 = vmul.f32 %v2006_v13, %v2006_v13 }
 0xe1b   :  { %v2007_v15 = vmul.f32 %v2005_v36, %v2005_v36 }
 0xe1c   :  { %v2012_v16 = vsel %vm533_vm0, %v2008_v14, 0.0 }
 0xe1d   :  { %2013 = vadd.xlane.f32.xlu1 %v2012_v16  ;;  %v2009_v18 = vsel %vm533_vm0, %v2007_v15, 0.0 }
 0xe1e   :  { %2010 = vadd.xlane.f32.xlu0 %v2009_v18 }
 0xeaa   :  { %v2014_v39 = vpop.xlane.xlu1 %2013 }
 0xeab   :  { %v2016_v40 = vmul.f32 0.032258064, %v2014_v39  ;;  %v2011_v43 = vpop.xlane.xlu0 %2010 }
 0xeac   :  { %v2015_v44 = vmul.f32 0.032258064, %v2011_v43 }
 0xead   :  { %4501 = vrsqrt.f32 %v2016_v40  ;;  %vm2026_vm7 = vcmp.eq.f32.partialorder %v2016_v40, inf  ;;  %v2029_v50 = vand.u32 2147483648, %v2016_v40  ;;  %vm2028_vm8 = vcmp.eq.f32.partialorder %v2016_v40, 0.0 }
 0xeae   :  { %4503 = vrsqrt.f32 %v2015_v44  ;;  %vm2019_vm9 = vcmp.eq.f32.partialorder %v2015_v44, inf  ;;  %v2022_v1 = vand.u32 2147483648, %v2015_v44  ;;  %vm2021_vm10 = vcmp.eq.f32.partialorder %v2015_v44, 0.0 }
 0xeb7   :  { %v4502_v45 = vpop.eup %4501 }
 0xeb8   :  { %v4504_v46 = vpop.eup %4503  ;;  %v2025_v47 = vmul.f32 %v4502_v45, %v2016_v40 }
 0xeb9   :  { %v2018_v51 = vmul.f32 %v4504_v46, %v2015_v44 }
 0xeba   :  { %v2027_v52 = vsel %vm2026_vm7, %v2016_v40, %v2025_v47 }
 0xebb   :  { %v2030_v53 = vsel %vm2028_vm8, %v2029_v50, %v2027_v52  ;;  %v2020_v0 = vsel %vm2019_vm9, %v2015_v44, %v2018_v51 }
 0xebc   :  { %v2032_v54 = vadd.f32 1e-05, %v2030_v53  ;;  %v2023_v55 = vsel %vm2021_vm10, %v2022_v1, %v2020_v0 }
 0xebd   :  { %v2031_v56 = vadd.f32 1e-05, %v2023_v55 }
 0xebe   :  { %4505 = vrcp.f32 %v2032_v54 }
 0xebf   :  { %4507 = vrcp.f32 %v2031_v56 }
 0xec8   :  { %v4506_v57 = vpop.eup %4505 }
 0xec9   :  { %v4508_v59 = vpop.eup %4507  ;;  %v2036_v60 = vmul.f32 %v4506_v57, %v2006_v13 }
 0xeca   :  { %v2035_v61 = vmul.f32 %v4508_v59, %v2005_v36 }
 0xecb   :  { %v2044_v62 = vmul.f32 %v3691_v58, %v2036_v60 }
 0xecc   :  { %v2043_v63 = vmul.f32 %v3691_v58, %v2035_v61 }
 0xecd   :  { %v2052_v9 = vadd.f32 %v3692_v34, %v2044_v62 }
 0xece   :  { %v2051_v3 = vadd.f32 %v3692_v34, %v2043_v63 }
 0xed0   :  { %4032 = vmatprep.mubr.msk.f32.mxu0 %vm533_vm0, %v2051_v3  ;;  %4054 = vmatprep.mubr.msk.f32.mxu1 %vm533_vm0, %v2051_v3 }
 0xed1   :  { %4033 = vmatmul.mubr.msk.f32.vlgmr.msra.gmra.mrb[12].mxu0 %vm533_vm0, %v2052_v9  ;;  %4055 = vmatmul.mubr.msk.f32.vlgmr.msra.gmra.mrb[10].mxu1 %vm533_vm0, %v2052_v9 }
 0xed2   :  { %4272 = vmatpush3.bf16.msra.mxu0 %v4269_v38  ;;  %4043 = vmatprep.mubr.msk.f32.mxu0 %vm533_vm0, %v2051_v3 }
 0xed3   :  { %4274 = vmatprep.subr.bf16.mxu0 %v4273_v8 }
 0xed6   :  { %4276 = vmatpush3.bf16.msra.mxu0 %v4273_v8 }
 0xed9   :  { %4044 = vmatmul.mubr.msk.f32.vlgmr.msra.gmra.mrb[14].mxu0 %vm533_vm0, %v2052_v9 }
 0xfa4   :  { %v4034_v17 = vpop.f32.mrb[12].mxu0  ;;  %v4056_v48 = vpop.f32.mrb[10].mxu1 }
 0xfa5   :  { %v2299_v49 = vadd.f32 %v4056_v48, %v3699_v10  ;;  %v2131_v13 = vpop.f32.mrb[13].mxu0  ;;  %v2293_v36 = vpop.f32.mrb[11].mxu1  ;;  %v5869_v44 = vadd.f32 %v4034_v17, %v3693_v12 }
 0xfa6   :  { %v5835_v14 = vadd.f32 %v3693_v12, %v2131_v13  ;;  %v2294_v15 = vadd.f32 %v3699_v10, %v2293_v36 }
 0xfa7   :  { %v2529_v21 = vmul.f32 %v5652_v5, %v2299_v49  ;;  %v2418_v23 = vmul.f32 %v5649_v4, %v2299_v49  ;;  %v2802_v25 = vmul.f32 %v5690_v20, %v2299_v49  ;;  %v2996_v31 = vmul.f32 %v5633_v32, %v2299_v49 }
 0xfa8   :  { %v2302_v16 = vmul.f32 %v5649_v4, %v5835_v14  ;;  %v2419_v18 = vmul.f32 %v5652_v5, %v5835_v14  ;;  %v2528_v19 = vmul.f32 %v5652_v5, %v2294_v15  ;;  %v2417_v22 = vmul.f32 %v5649_v4, %v2294_v15 }
 0xfa9   :  { %v2801_v24 = vmul.f32 %v5690_v20, %v2294_v15  ;;  %v2995_v30 = vmul.f32 %v5633_v32, %v2294_v15  ;;  %v2303_v45 = vmul.f32 %v5649_v4, %v5869_v44  ;;  %v2420_v46 = vmul.f32 %v5652_v5, %v5869_v44 }
 0xfaa   :  { %4061 = vmatprep.mubr.msk.f32.mxu0 %vm533_vm0, %v2302_v16  ;;  %4068 = vmatprep.mubr.msk.f32.mxu1 %vm533_vm0, %v2419_v18  ;;  %v4297_v27 = vpack.c.bf16 %v2529_v21, %v2528_v19  ;;  %v4301_v28 = vpack.c.bf16 %v2418_v23, %v2417_v22  ;;  %v2692_v15 = vmul.f32 %v5690_v20, %v5835_v14 }
 0xfab   :  { %v5849_v29 = vpack.c.bf16 %v2802_v25, %v2801_v24  ;;  %v5853_v39 = vpack.c.bf16 %v2996_v31, %v2995_v30  ;;  %v2693_v16 = vmul.f32 %v5690_v20, %v5869_v44  ;;  %v2886_v18 = vmul.f32 %v5633_v32, %v5835_v14 }
 0xfac   :  { %v4045_v33 = vpop.f32.mrb[14].mxu0  ;;  %v2887_v19 = vmul.f32 %v5633_v32, %v5869_v44 }
 0xfad   :  { %v2218_v37 = vadd.f32 %v4045_v33, %v3696_v26  ;;  %v2212_v38 = vpop.f32.mrb[15].mxu0 }
 0xfae   :  { %v2213_v40 = vadd.f32 %v3696_v26, %v2212_v38 }
 0xfb0   :  { %v5855_v43 = vpack.c.bf16 %v2218_v37, %v2213_v40 }
 0xfb2   :  { %4287 = vmatprep.subr.msk.bf16.mxu0 %vm5659_vm13, %v5855_v43  ;;  %4293 = vmatprep.subr.msk.bf16.mxu1 %vm5659_vm13, %v5855_v43 }
 0xfb3   :  { %4290 = vmatpush3.bf16.xpose.msk.msra.mxu0 %vm5659_vm13, %v5855_v43  ;;  %4296 = vmatpush3.bf16.xpose.msk.msra.mxu1 %vm5659_vm13, %v5855_v43 }
 0xfb4   :  { %4298 = vmatprep.subr.bf16.mxu1 %v4297_v27  ;;  %4302 = vmatprep.subr.bf16.mxu0 %v4301_v28 }
 0xfba   :  { %4062 = vmatmul.mubr.msk.f32.vlgmr.msra.gmra.mrb[16].mxu0 %vm533_vm0, %v2303_v45  ;;  %4069 = vmatmul.mubr.msk.f32.vlgmr.msra.gmra.mrb[12].mxu1 %vm533_vm0, %v2420_v46 }
 0xfbb   :  { %4300 = vmatpush3.bf16.msra.mxu1 %v4297_v27  ;;  %4304 = vmatpush3.bf16.msra.mxu0 %v4301_v28 }
 0xfbc   :  { %4307 = vmatprep.subr.msk.bf16.mxu1 %vm5659_vm13, %v5855_v43  ;;  %4312 = vmatprep.subr.bf16.mxu0 %v5849_v29 }
0x108d   :  { %v4063_v47 = vpop.f32.mrb[16].mxu0  ;;  %v4070_v50 = vpop.f32.mrb[12].mxu1 }
0x108e   :  { %v2503_v51 = vmul.f32 0.35355338, %v4070_v50  ;;  %v2382_v52 = vpop.f32.mrb[17].mxu0  ;;  %v2493_v4 = vpop.f32.mrb[13].mxu1  ;;  %v2392_v61 = vmul.f32 0.35355338, %v4063_v47 }
0x108f   :  { %v2502_v1 = vmul.f32 0.35355338, %v2493_v4  ;;  %v2391_v34 = vmul.f32 0.35355338, %v2382_v52 }
0x1090   :  { %v2505_v5 = vadd.f32 %v2503_v51, %v5722_v41  ;;  %v2394_v2 = vadd.f32 %v2392_v61, %v5722_v41 }
0x1091   :  { %v2504_v53 = vadd.f32 %v2502_v1, %v5724_v42  ;;  %v2393_v9 = vadd.f32 %v2391_v34, %v5724_v42 }
0x1092   :  { %v2509_v0 = vsel %vm933_vm1, %v2505_v5, -inf  ;;  %v2398_v8 = vsel %vm933_vm1, %v2394_v2, -inf }
0x1093   :  { %2510 = vmax.xlane.f32.xlu1 %v2509_v0  ;;  %v2506_v54 = vsel %vm933_vm1, %v2504_v53, -inf  ;;  %v2395_v10 = vsel %vm933_vm1, %v2393_v9, -inf }
0x1094   :  { %2507 = vmax.xlane.f32.xlu0 %v2506_v54 }
0x1120   :  { %v2511_v55 = vpop.xlane.xlu1 %2510 }
0x1121   :  { %v2513_v56 = vsub.f32 %v2505_v5, %v2511_v55  ;;  %v2508_v57 = vpop.xlane.xlu0 %2507 }
0x1122   :  { %v2512_v58 = vsub.f32 %v2504_v53, %v2508_v57 }
0x1123   :  { %v2516_v59 = vmul.f32 1.442695, %v2513_v56 }
0x1124   :  { %v2514_v60 = vmul.f32 1.442695, %v2512_v58 }
0x1125   :  { %4509 = vpow2.f32 %v2516_v59 }
0x1126   :  { %4511 = vpow2.f32 %v2514_v60 }
0x112f   :  { %v4510_v62 = vpop.eup %4509 }
0x1130   :  { %v4512_v63 = vpop.eup %4511  ;;  %v2521_v35 = vsel %vm933_vm1, %v4510_v62, 0.0 }
0x1131   :  { %2522 = vadd.xlane.f32.xlu1 %v2521_v35  ;;  %v2518_v3 = vsel %vm933_vm1, %v4512_v63, 0.0 }
0x1132   :  { %2519 = vadd.xlane.f32.xlu0 %v2518_v3 }
0x1135   :  { %2399 = vmax.xlane.f32.xlu1 %v2398_v8 }
0x1136   :  { %2396 = vmax.xlane.f32.xlu0 %v2395_v10 }
0x11be   :  { %v2523_v12 = vpop.xlane.xlu1 %2522 }
0x11bf   :  { %4513 = vrcp.f32 %v2523_v12  ;;  %v2520_v17 = vpop.xlane.xlu0 %2519 }
0x11c0   :  { %4515 = vrcp.f32 %v2520_v17 }
0x11c2   :  { %v2400_v22 = vpop.xlane.xlu1 %2399 }
0x11c3   :  { %v2397_v23 = vpop.xlane.xlu0 %2396  ;;  %v2402_v14 = vsub.f32 %v2394_v2, %v2400_v22  ;;  %v1977_v22 = vld [vmem:[%s6060_s24 + $0x8] sm:$0xff] }
0x11c4   :  { %v2401_v24 = vsub.f32 %v2393_v9, %v2397_v23 }
0x11c5   :  { %v2405_v25 = vmul.f32 1.442695, %v2402_v14 }
0x11c6   :  { %v2403_v27 = vmul.f32 1.442695, %v2401_v24 }
0x11c7   :  { %4517 = vpow2.f32 %v2405_v25 }
0x11c8   :  { %4519 = vpow2.f32 %v2403_v27 }
0x11c9   :  { %v4514_v48 = vpop.eup %4513 }
0x11ca   :  { %v4516_v49 = vpop.eup %4515  ;;  %v2527_v36 = vmul.f32 %v4514_v48, %v4510_v62 }
0x11cb   :  { %v2526_v13 = vmul.f32 %v4516_v49, %v4512_v63 }
0x11cd   :  { %4075 = vmatprep.mubr.msk.f32.mxu1 %vm933_vm1, %v2526_v13 }
0x11ce   :  { %4076 = vmatmul.mubr.msk.f32.vlgmr.msra.gmra.mrb[14].mxu1 %vm933_vm1, %v2527_v36 }
0x11cf   :  { %4310 = vmatpush3.bf16.xpose.msk.msra.mxu1 %vm5659_vm13, %v5855_v43  ;;  %4089 = vmatprep.mubr.msk.f32.mxu1 %vm533_vm0, %v2692_v15 }
0x11d0   :  { %4317 = vmatprep.subr.msk.bf16.mxu1 %vm5659_vm13, %v5855_v43 }
0x11d1   :  { %v4518_v50 = vpop.eup %4517 }
0x11d2   :  { %v4520_v52 = vpop.eup %4519  ;;  %v2410_v4 = vsel %vm933_vm1, %v4518_v50, 0.0 }
0x11d3   :  { %v2407_v1 = vsel %vm933_vm1, %v4520_v52, 0.0 }
0x11d6   :  { %4090 = vmatmul.mubr.msk.f32.vlgmr.msra.gmra.mrb[16].mxu1 %vm533_vm0, %v2693_v16 }
0x11d7   :  { %4320 = vmatpush3.bf16.xpose.msk.msra.mxu1 %vm5659_vm13, %v5855_v43  ;;  %4103 = vmatprep.mubr.msk.f32.mxu1 %vm533_vm0, %v2886_v18 }
0x11de   :  { %4104 = vmatmul.mubr.msk.f32.vlgmr.msra.gmra.mrb[18].mxu1 %vm533_vm0, %v2887_v19  ;;  %v1976_v19 = vld [vmem:[%s6060_s24] sm:$0xff] }
0x11df   :  { %v4325_v25 = vpack.c.bf16 %v1977_v22, %v1976_v19 }
0x12a1   :  { %v5914_v21 = vpop.f32.mrb[14].mxu1 }
0x12a2   :  { %v5916_v20 = vpop.f32.mrb[15].mxu1 }
0x12a9   :  { %v4091_v26 = vpop.f32.mrb[16].mxu1 }
0x12aa   :  { %v2776_v11 = vmul.f32 0.35355338, %v4091_v26  ;;  %v2766_v28 = vpop.f32.mrb[17].mxu1 }
0x12ab   :  { %v2775_v30 = vmul.f32 0.35355338, %v2766_v28  ;;  %v1978_v28 = vld [vmem:[%s6060_s24 + $0x10] sm:$0xff] }
0x12ac   :  { %v2778_v31 = vadd.f32 %v2776_v11, %v5722_v41 }
0x12ad   :  { %v2777_v32 = vadd.f32 %v2775_v30, %v5724_v42  ;;  %v1979_v30 = vld [vmem:[%s6060_s24 + $0x18] sm:$0xff] }
0x12ae   :  { %v2782_v33 = vsel %vm933_vm1, %v2778_v31, -inf }
0x12af   :  { %2783 = vmax.xlane.f32.xlu1 %v2782_v33  ;;  %v2779_v37 = vsel %vm933_vm1, %v2777_v32, -inf }
0x12b0   :  { %2780 = vmax.xlane.f32.xlu0 %v2779_v37 }
0x12b1   :  { %v4105_v38 = vpop.f32.mrb[18].mxu1 }
0x12b2   :  { %v2970_v40 = vmul.f32 0.35355338, %v4105_v38  ;;  %v2960_v43 = vpop.f32.mrb[19].mxu1  ;;  %v3728_v38 = vld [vmem:[#allocation32] ss:$0 sm:$0xff] }
0x12b3   :  { %v2969_v44 = vmul.f32 0.35355338, %v2960_v43 }
0x12b4   :  { %v2972_v45 = vadd.f32 %v2970_v40, %v5722_v41 }
0x12b5   :  { %v2971_v46 = vadd.f32 %v2969_v44, %v5724_v42 }
0x12b6   :  { %v2976_v47 = vsel %vm933_vm1, %v2972_v45, -inf }
0x12b7   :  { %2977 = vmax.xlane.f32.xlu1 %v2976_v47  ;;  %v2973_v51 = vsel %vm933_vm1, %v2971_v46, -inf }
0x12b8   :  { %2974 = vmax.xlane.f32.xlu0 %v2973_v51 }
0x12bb   :  { %2411 = vadd.xlane.f32.xlu1 %v2410_v4 }
0x12bc   :  { %2408 = vadd.xlane.f32.xlu0 %v2407_v1 }
0x133c   :  { %v2784_v5 = vpop.xlane.xlu1 %2783 }
0x133d   :  { %v2786_v53 = vsub.f32 %v2778_v31, %v2784_v5  ;;  %v2781_v0 = vpop.xlane.xlu0 %2780  ;;  %v4329_v31 = vpack.c.bf16 %v1979_v30, %v1978_v28  ;;  %v1992_v28 = vld [vmem:[%s6061_s0 + $0x20] sm:$0xff]  ;;  %v1993_v30 = vld [vmem:[%s6061_s0 + $0x28] sm:$0xff] }
0x133e   :  { %v2785_v41 = vsub.f32 %v2777_v32, %v2781_v0 }
0x133f   :  { %v2789_v54 = vmul.f32 1.442695, %v2786_v53 }
0x1340   :  { %v2787_v42 = vmul.f32 1.442695, %v2785_v41  ;;  %v1983_v41 = vld [vmem:[#allocation37] sm:$0xff] }
0x1341   :  { %4521 = vpow2.f32 %v2789_v54  ;;  %v1984_v54 = vld [vmem:[#allocation37 + $0x8] sm:$0xff] }
0x1342   :  { %4523 = vpow2.f32 %v2787_v42  ;;  %v1985_v42 = vld [vmem:[#allocation37 + $0x10] sm:$0xff] }
0x1344   :  { %v2978_v55 = vpop.xlane.xlu1 %2977 }
0x1345   :  { %v2980_v56 = vsub.f32 %v2972_v45, %v2978_v55  ;;  %v2975_v57 = vpop.xlane.xlu0 %2974  ;;  %v4333_v55 = vpack.c.bf16 %v1984_v54, %v1983_v41 }
0x1346   :  { %v2979_v58 = vsub.f32 %v2971_v46, %v2975_v57 }
0x1347   :  { %v2983_v59 = vmul.f32 1.442695, %v2980_v56  ;;  %v1986_v56 = vld [vmem:[#allocation37 + $0x18] sm:$0xff]  ;;  %4334 = vmatprep.subr.bf16.mxu1 %v4333_v55 }
0x1348   :  { %v2981_v60 = vmul.f32 1.442695, %v2979_v58  ;;  %v2412_v61 = vpop.xlane.xlu1 %2411  ;;  %v4337_v57 = vpack.c.bf16 %v1986_v56, %v1985_v42  ;;  %4336 = vmatpush3.bf16.msra.mxu1 %v4333_v55 }
0x1349   :  { %4525 = vpow2.f32 %v2983_v59  ;;  %v2409_v34 = vpop.xlane.xlu0 %2408 }
0x134a   :  { %4527 = vpow2.f32 %v2981_v60  ;;  %4338 = vmatprep.subr.bf16.mxu1 %v4337_v57 }
0x134b   :  { %v4522_v62 = vpop.eup %4521  ;;  %4529 = vrcp.f32 %v2412_v61 }
0x134c   :  { %v4524_v63 = vpop.eup %4523  ;;  %4531 = vrcp.f32 %v2409_v34  ;;  %v2794_v35 = vsel %vm933_vm1, %v4522_v62, 0.0  ;;  %4340 = vmatpush3.bf16.msra.mxu1 %v4337_v57 }
0x134d   :  { %2795 = vadd.xlane.f32.xlu1 %v2794_v35  ;;  %v2791_v2 = vsel %vm933_vm1, %v4524_v63, 0.0 }
0x134e   :  { %2792 = vadd.xlane.f32.xlu0 %v2791_v2 }
0x1353   :  { %v4526_v3 = vpop.eup %4525 }
0x1354   :  { %v4528_v9 = vpop.eup %4527  ;;  %v2988_v8 = vsel %vm933_vm1, %v4526_v3, 0.0 }
0x1355   :  { %v4530_v10 = vpop.eup %4529  ;;  %2989 = vadd.xlane.f32.xlu1 %v2988_v8  ;;  %v2985_v12 = vsel %vm933_vm1, %v4528_v9, 0.0 }
0x1356   :  { %v4532_v17 = vpop.eup %4531  ;;  %2986 = vadd.xlane.f32.xlu0 %v2985_v12  ;;  %v2416_v49 = vmul.f32 %v4530_v10, %v4518_v50 }
0x1357   :  { %v2415_v48 = vmul.f32 %v4532_v17, %v4520_v52 }
0x1359   :  { %4082 = vmatprep.mubr.msk.f32.mxu0 %vm933_vm1, %v2415_v48 }
0x135a   :  { %4083 = vmatmul.mubr.msk.f32.vlgmr.msra.gmra.mrb[18].mxu0 %vm933_vm1, %v2416_v49 }
0x135b   :  { %4314 = vmatpush3.bf16.msra.mxu0 %v5849_v29 }
0x135c   :  { %4322 = vmatprep.subr.bf16.mxu0 %v5853_v39 }
0x13da   :  { %v2796_v13 = vpop.xlane.xlu1 %2795 }
0x13db   :  { %4533 = vrcp.f32 %v2796_v13  ;;  %v2793_v36 = vpop.xlane.xlu0 %2792  ;;  %v3729_v13 = vld [vmem:[#allocation34] ss:$0 sm:$0xff] }
0x13dc   :  { %4535 = vrcp.f32 %v2793_v36 }
0x13e2   :  { %v2990_v15 = vpop.xlane.xlu1 %2989 }
0x13e3   :  { %4537 = vrcp.f32 %v2990_v15  ;;  %v2987_v16 = vpop.xlane.xlu0 %2986 }
0x13e4   :  { %4539 = vrcp.f32 %v2987_v16 }
0x13e5   :  { %v4534_v18 = vpop.eup %4533 }
0x13e6   :  { %v4536_v23 = vpop.eup %4535  ;;  %v2800_v24 = vmul.f32 %v4534_v18, %v4522_v62  ;;  %v3730_v18 = vld [vmem:[#allocation35] ss:$0 sm:$0xff] }
0x13e7   :  { %v2799_v14 = vmul.f32 %v4536_v23, %v4524_v63 }
0x13e9   :  { %4096 = vmatprep.mubr.msk.f32.mxu0 %vm933_vm1, %v2799_v14 }
0x13ea   :  { %4097 = vmatmul.mubr.msk.f32.vlgmr.msra.gmra.mrb[18].mxu0 %vm933_vm1, %v2800_v24  ;;  %v1988_v24 = vld [vmem:[%s6061_s0] sm:$0xff] }
0x13eb   :  { %4324 = vmatpush3.bf16.msra.mxu0 %v5853_v39 }
0x13ec   :  { %4326 = vmatprep.subr.bf16.mxu0 %v4325_v25 }
0x13ed   :  { %v4538_v29 = vpop.eup %4537 }
0x13ee   :  { %v4540_v26 = vpop.eup %4539  ;;  %v2994_v11 = vmul.f32 %v4538_v29, %v4526_v3 }
0x13ef   :  { %v2993_v27 = vmul.f32 %v4540_v26, %v4528_v9  ;;  %v1990_v26 = vld [vmem:[%s6061_s0 + $0x10] sm:$0xff] }
0x13f1   :  { %4110 = vmatprep.mubr.msk.f32.mxu0 %vm933_vm1, %v2993_v27  ;;  %v1991_v27 = vld [vmem:[%s6061_s0 + $0x18] sm:$0xff] }
0x13f2   :  { %4111 = vmatmul.mubr.msk.f32.vlgmr.msra.gmra.mrb[18].mxu0 %vm933_vm1, %v2994_v11  ;;  %v4345_v11 = vpack.c.bf16 %v1991_v27, %v1990_v26 }
0x13f3   :  { %4328 = vmatpush3.bf16.msra.mxu0 %v4325_v25  ;;  %v1989_v25 = vld [vmem:[%s6061_s0 + $0x8] sm:$0xff] }
0x13f4   :  { %4330 = vmatprep.subr.bf16.mxu0 %v4329_v31  ;;  %v4341_v29 = vpack.c.bf16 %v1989_v25, %v1988_v24 }
0x13f7   :  { %4332 = vmatpush3.bf16.msra.mxu0 %v4329_v31  ;;  %v4349_v31 = vpack.c.bf16 %v1993_v30, %v1992_v28 }
0x13f8   :  { %4342 = vmatprep.subr.bf16.mxu0 %v4341_v29 }
0x14c5   :  { %v4112_v32 = vpop.f32.mrb[18].mxu0 }
0x14c6   :  { %v4365_v33 = vadd.f32 %v4112_v32, %v5914_v21  ;;  %v3069_v37 = vpop.f32.mrb[19].mxu0  ;;  %v1994_v32 = vld [vmem:[%s6061_s0 + $0x30] sm:$0xff] }
0x14c7   :  { %v4366_v39 = vadd.f32 %v3069_v37, %v5916_v20 }
0x14c9   :  { %4121 = vmatprep.mubr.msk.f32.mxu0 %vm533_vm0, %v4366_v39  ;;  %v3731_v39 = vld [vmem:[#allocation38] ss:$0 sm:$0xff] }
0x14ca   :  { %4122 = vmatmul.mubr.msk.f32.vlgmr.msra.gmra.mrb[20].mxu0 %vm533_vm0, %v4365_v33  ;;  %v1995_v33 = vld [vmem:[%s6061_s0 + $0x38] sm:$0xff] }
0x14cb   :  { %4344 = vmatpush3.bf16.msra.mxu0 %v4341_v29  ;;  %v4353_v37 = vpack.c.bf16 %v1995_v33, %v1994_v32  ;;  %v3740_v32 = vld [vmem:[%s5440_s25] ss:$0 sm:$0xff] }
0x14cc   :  { %4346 = vmatprep.subr.bf16.mxu0 %v4345_v11 }
0x14cf   :  { %4348 = vmatpush3.bf16.msra.mxu0 %v4345_v11  ;;  %v3739_v11 = vld [vmem:[#allocation41] ss:$0 sm:$0xff] }
0x14d0   :  { %4350 = vmatprep.subr.bf16.mxu0 %v4349_v31 }
0x14d3   :  { %4352 = vmatpush3.bf16.msra.mxu0 %v4349_v31 }
0x14d4   :  { %4354 = vmatprep.subr.bf16.mxu0 %v4353_v37 }
0x14d7   :  { %4356 = vmatpush3.bf16.msra.mxu0 %v4353_v37 }
0x159d   :  { %v4123_v40 = vpop.f32.mrb[20].mxu0 }
0x159e   :  { %v3162_v43 = vadd.f32 %v4123_v40, %v5813_v6  ;;  %v3152_v44 = vpop.f32.mrb[21].mxu0 }
0x159f   :  { %v3161_v45 = vadd.f32 %v3152_v44, %v5815_v7 }
0x15a0   :  { %v5951_v46 = vadd.f32 %v3728_v38, %v3162_v43 }
0x15a1   :  { %v5953_v47 = vadd.f32 %v3728_v38, %v3161_v45 }
0x15a2   :  { %v3174_v21 = vsel %vm533_vm0, %v5951_v46, 0.0 }
0x15a3   :  { %3175 = vadd.xlane.f32.xlu1 %v3174_v21  ;;  %v3171_v20 = vsel %vm533_vm0, %v5953_v47, 0.0 }
0x15a4   :  { %3172 = vadd.xlane.f32.xlu0 %v3171_v20 }
0x1630   :  { %v3176_v50 = vpop.xlane.xlu1 %3175 }
0x1631   :  { %v3178_v51 = vmul.f32 0.03125, %v3176_v50  ;;  %v3173_v52 = vpop.xlane.xlu0 %3172 }
0x1632   :  { %v3177_v4 = vmul.f32 0.03125, %v3173_v52 }
0x1633   :  { %v3180_v6 = vsub.f32 %v5951_v46, %v3178_v51 }
0x1634   :  { %v3179_v7 = vsub.f32 %v5953_v47, %v3177_v4 }
0x1635   :  { %v3182_v1 = vmul.f32 %v3180_v6, %v3180_v6 }
0x1636   :  { %v3181_v5 = vmul.f32 %v3179_v7, %v3179_v7 }
0x1637   :  { %v3186_v53 = vsel %vm533_vm0, %v3182_v1, 0.0 }
0x1638   :  { %3187 = vadd.xlane.f32.xlu1 %v3186_v53  ;;  %v3183_v0 = vsel %vm533_vm0, %v3181_v5, 0.0  ;;  %v3738_v53 = vld [vmem:[#allocation40] ss:$0 sm:$0xff] }
0x1639   :  { %3184 = vadd.xlane.f32.xlu0 %v3183_v0 }
0x16c5   :  { %v3188_v58 = vpop.xlane.xlu1 %3187 }
0x16c6   :  { %v3190_v59 = vmul.f32 0.032258064, %v3188_v58  ;;  %v3185_v60 = vpop.xlane.xlu0 %3184 }
0x16c7   :  { %v3189_v61 = vmul.f32 0.032258064, %v3185_v60 }
0x16c8   :  { %4541 = vrsqrt.f32 %v3190_v59  ;;  %vm3200_vm11 = vcmp.eq.f32.partialorder %v3190_v59, inf  ;;  %v3203_v35 = vand.u32 2147483648, %v3190_v59  ;;  %vm3202_vm12 = vcmp.eq.f32.partialorder %v3190_v59, 0.0 }
0x16c9   :  { %4543 = vrsqrt.f32 %v3189_v61  ;;  %vm3193_vm13 = vcmp.eq.f32.partialorder %v3189_v61, inf  ;;  %v3196_v9 = vand.u32 2147483648, %v3189_v61  ;;  %vm3195_vm14 = vcmp.eq.f32.partialorder %v3189_v61, 0.0 }
0x16d2   :  { %v4542_v34 = vpop.eup %4541 }
0x16d3   :  { %v4544_v62 = vpop.eup %4543  ;;  %v3199_v63 = vmul.f32 %v4542_v34, %v3190_v59 }
0x16d4   :  { %v3192_v2 = vmul.f32 %v4544_v62, %v3189_v61 }
0x16d5   :  { %v3201_v3 = vsel %vm3200_vm11, %v3190_v59, %v3199_v63 }
0x16d6   :  { %v3204_v8 = vsel %vm3202_vm12, %v3203_v35, %v3201_v3  ;;  %v3194_v10 = vsel %vm3193_vm13, %v3189_v61, %v3192_v2  ;;  %v3421_v2 = vld [vmem:[%s5445_s20] sm:$0xff]  ;;  %v3422_v3 = vld [vmem:[%s5445_s20 + $0x8] sm:$0xff] }
0x16d7   :  { %v3206_v12 = vadd.f32 1e-05, %v3204_v8  ;;  %v3197_v17 = vsel %vm3195_vm14, %v3196_v9, %v3194_v10  ;;  %v3423_v9 = vld [vmem:[%s5445_s20 + $0x10] sm:$0xff]  ;;  %v4357_v8 = vpack.c.bf16 %v3422_v3, %v3421_v2  ;;  %v3424_v10 = vld [vmem:[%s5445_s20 + $0x18] sm:$0xff]  ;;  %s5256_s20 = smov [#allocation43]  }
0x16d8   :  { %v3205_v48 = vadd.f32 1e-05, %v3197_v17  ;;  %s3576_s15 = sshll.u32 %s5256_s20, 4  ;;  %s3577_s15 = int_to_ptr.vmem [resolvable:$true] %s3576_s15 }
0x16d9   :  { %4545 = vrcp.f32 %v3206_v12  ;;  %v4361_v12 = vpack.c.bf16 %v3424_v10, %v3423_v9  ;;  %4358 = vmatprep.subr.bf16.mxu1 %v4357_v8  ;;  %s5137_s27 = scalar_lea.vmem %s3577_s15, 256  ;;  %p5142_p13 = scmp.lt.s32.totalorder %s3577_s15, %s3577_s15 }
0x16da   :  { %4547 = vrcp.f32 %v3205_v48  ;;  %p5138_p12 = scmp.ne.s32.totalorder %s3577_s15, %s5137_s27  ;;  %p5143_p0 = scmp.lt.s32.totalorder %s5137_s27, %s5137_s27 }
0x16dc   :  { %p5144_p1 = por %p5143_p0, %p5142_p13 }
0x16de   :  { %p5145_p2 = pnand %p5144_p1, %p5138_p12 }
0x16e3   :  { %v4546_v49 = vpop.eup %4545 }
0x16e4   :  { %v4548_v36 = vpop.eup %4547  ;;  %v3210_v15 = vmul.f32 %v4546_v49, %v3180_v6 }
0x16e5   :  { %v3209_v16 = vmul.f32 %v4548_v36, %v3179_v7 }
0x16e6   :  { %v3218_v19 = vmul.f32 %v3729_v13, %v3210_v15 }
0x16e7   :  { %v3217_v22 = vmul.f32 %v3729_v13, %v3209_v16 }
0x16e8   :  { %v3226_v14 = vadd.f32 %v3730_v18, %v3218_v19 }
0x16e9   :  { %v3225_v23 = vadd.f32 %v3730_v18, %v3217_v22 }
0x16eb   :  { %4132 = vmatprep.mubr.msk.f32.mxu1 %vm533_vm0, %v3225_v23 }
0x16ec   :  { %4133 = vmatmul.mubr.msk.f32.vlgmr.msra.gmra.mrb[20].mxu1 %vm533_vm0, %v3226_v14 }
0x16ed   :  { %4360 = vmatpush3.bf16.msra.mxu1 %v4357_v8 }
0x16ee   :  { %4362 = vmatprep.subr.bf16.mxu1 %v4361_v12 }
0x16f1   :  { %4364 = vmatpush3.bf16.msra.mxu1 %v4361_v12 }
0x17bf   :  { %v4134_v38 = vpop.f32.mrb[20].mxu1 }
0x17c0   :  { %v3311_v40 = vadd.f32 %v4134_v38, %v3731_v39  ;;  %v3305_v43 = vpop.f32.mrb[21].mxu1 }
0x17c1   :  { %v3306_v44 = vadd.f32 %v3731_v39, %v3305_v43 }
0x17c2   :  { %v3735_v45 = vmul.f32 -1.442695, %v3311_v40 }
0x17c3   :  { %v3734_v21 = vmul.f32 -1.442695, %v3306_v44 }
0x17c4   :  { %4549 = vpow2.f32 %v3735_v45 }
0x17c5   :  { %4551 = vpow2.f32 %v3734_v21 }
0x17ce   :  { %v4550_v20 = vpop.eup %4549 }
0x17cf   :  { %v4552_v50 = vpop.eup %4551  ;;  %v3321_v51 = vadd.f32 1.0, %v4550_v20 }
0x17d0   :  { %v3320_v52 = vadd.f32 1.0, %v4552_v50 }
0x17d1   :  { %4553 = vrcp.f32 %v3321_v51 }
0x17d2   :  { %4555 = vrcp.f32 %v3320_v52 }
0x17db   :  { %v4554_v4 = vpop.eup %4553 }
0x17dc   :  { %v4556_v6 = vpop.eup %4555  ;;  %v3327_v1 = vmul.f32 %v4554_v4, %v3311_v40  ;;  %v3741_v40 = vld [vmem:[%s5450_s14] ss:$0 sm:$0xff] }
0x17dd   :  { %v3326_v7 = vmul.f32 %v4556_v6, %v3306_v44 }
0x17df   :  { %4151 = vmatprep.mubr.msk.f32.mxu0 %vm1867_vm6, %v3326_v7 }
0x17e0   :  { %4152 = vmatmul.mubr.msk.f32.vlgmr.msra.gmra.mrb[22].mxu0 %vm1867_vm6, %v3327_v1 }
0x18b3   :  { %v4153_v5 = vpop.f32.mrb[22].mxu0 }
0x18b4   :  { %v3410_v0 = vadd.f32 %v4153_v5, %v5951_v46  ;;  %v3400_v41 = vpop.f32.mrb[23].mxu0 }
0x18b5   :  { %v3409_v54 = vadd.f32 %v3400_v41, %v5953_v47 }
0x18b6   :  { %v3418_v42 = vadd.f32 %v3738_v53, %v3410_v0 }
0x18b7   :  { %v3417_v55 = vadd.f32 %v3738_v53, %v3409_v54 }
0x18b8   :  { %v3429_v56 = vsel %vm533_vm0, %v3418_v42, 0.0 }
0x18b9   :  { %3430 = vadd.xlane.f32.xlu1 %v3429_v56  ;;  %v3426_v57 = vsel %vm533_vm0, %v3417_v55, 0.0 }
0x18ba   :  { %3427 = vadd.xlane.f32.xlu0 %v3426_v57 }
0x1946   :  { %v3431_v58 = vpop.xlane.xlu1 %3430 }
0x1947   :  { %v3433_v59 = vmul.f32 0.03125, %v3431_v58  ;;  %v3428_v60 = vpop.xlane.xlu0 %3427 }
0x1948   :  { %v3432_v61 = vmul.f32 0.03125, %v3428_v60 }
0x1949   :  { %v3435_v46 = vsub.f32 %v3418_v42, %v3433_v59 }
0x194a   :  { %v3434_v34 = vsub.f32 %v3417_v55, %v3432_v61 }
0x194b   :  { %v3437_v62 = vmul.f32 %v3435_v46, %v3435_v46 }
0x194c   :  { %v3436_v47 = vmul.f32 %v3434_v34, %v3434_v34 }
0x194d   :  { %v3441_v63 = vsel %vm533_vm0, %v3437_v62, 0.0 }
0x194e   :  { %3442 = vadd.xlane.f32.xlu1 %v3441_v63  ;;  %v3438_v35 = vsel %vm533_vm0, %v3436_v47, 0.0 }
0x194f   :  { %3439 = vadd.xlane.f32.xlu0 %v3438_v35 }
0x19db   :  { %v3443_v17 = vpop.xlane.xlu1 %3442 }
0x19dc   :  { %v3445_v48 = vmul.f32 0.032258064, %v3443_v17  ;;  %v3440_v49 = vpop.xlane.xlu0 %3439 }
0x19dd   :  { %v3444_v13 = vmul.f32 0.032258064, %v3440_v49 }
0x19de   :  { %4557 = vrsqrt.f32 %v3445_v48  ;;  %vm3455_vm15 = vcmp.eq.f32.partialorder %v3445_v48, inf  ;;  %v3458_v18 = vand.u32 2147483648, %v3445_v48  ;;  %vm3457_vm1 = vcmp.eq.f32.partialorder %v3445_v48, 0.0 }
0x19df   :  { %4559 = vrsqrt.f32 %v3444_v13  ;;  %vm3448_vm2 = vcmp.eq.f32.partialorder %v3444_v13, inf  ;;  %v3451_v23 = vand.u32 2147483648, %v3444_v13  ;;  %vm3450_vm3 = vcmp.eq.f32.partialorder %v3444_v13, 0.0 }
0x19e8   :  { %v4558_v36 = vpop.eup %4557 }
0x19e9   :  { %v4560_v15 = vpop.eup %4559  ;;  %v3454_v16 = vmul.f32 %v4558_v36, %v3445_v48 }
0x19ea   :  { %v3447_v19 = vmul.f32 %v4560_v15, %v3444_v13 }
0x19eb   :  { %v3456_v22 = vsel %vm3455_vm15, %v3445_v48, %v3454_v16 }
0x19ec   :  { %v3459_v14 = vsel %vm3457_vm1, %v3458_v18, %v3456_v22  ;;  %v3449_v24 = vsel %vm3448_vm2, %v3444_v13, %v3447_v19 }
0x19ed   :  { %v3461_v25 = vadd.f32 1e-05, %v3459_v14  ;;  %v3452_v29 = vsel %vm3450_vm3, %v3451_v23, %v3449_v24 }
0x19ee   :  { %v3460_v26 = vadd.f32 1e-05, %v3452_v29 }
0x19ef   :  { %4561 = vrcp.f32 %v3461_v25 }
0x19f0   :  { %4563 = vrcp.f32 %v3460_v26 }
0x19f9   :  { %v4562_v27 = vpop.eup %4561 }
0x19fa   :  { %v4564_v28 = vpop.eup %4563  ;;  %v3465_v30 = vmul.f32 %v4562_v27, %v3435_v46 }
0x19fb   :  { %v3464_v31 = vmul.f32 %v4564_v28, %v3434_v34 }
0x19fc   :  { %v3473_v33 = vmul.f32 %v3739_v11, %v3465_v30 }
0x19fd   :  { %v3472_v37 = vmul.f32 %v3739_v11, %v3464_v31 }
0x19fe   :  { %v3481_v38 = vadd.f32 %v3740_v32, %v3473_v33 }
0x19ff   :  { %v3480_v39 = vadd.f32 %v3740_v32, %v3472_v37 }
0x1a01   :  { %4162 = vmatprep.mubr.msk.f32.mxu1 %vm533_vm0, %v3480_v39 }
0x1a02   :  { %4163 = vmatmul.mubr.msk.f32.vlgmr.msra.gmra.mrb[22].mxu1 %vm533_vm0, %v3481_v38 }
0x1ad5   :  { %v4164_v43 = vpop.f32.mrb[22].mxu1 }
0x1ad6   :  { %v3566_v44 = vadd.f32 %v4164_v43, %v3741_v40  ;;  %v3560_v45 = vpop.f32.mrb[23].mxu1 }
0x1ad7   :  { %v3561_v21 = vadd.f32 %v3741_v40, %v3560_v45 }
0x1ad8   :  { %3570 = vst [vmem:[#allocation43 + $0x8] sm:$0xff] %v3566_v44 }
0x1ad9   :  { %3569 = vst [vmem:[#allocation43] sm:$0xff] %v3561_v21 }
0x1ada   :  { %5148 = shalt.err (!%p5145_p2)
}
0x1adb   :  { %s5149_s25 = scalar_lea.hbm %s5455_s12, 256 }
0x1adc   :  { %p5150_p3 = scmp.ne.s32.totalorder %s5455_s12, %s5149_s25  ;;  %p5153_p4 = scmp.lt.u32.totalorder %s5149_s25, %s5455_s12 }
0x1ade   :  { %p5155_p5 = pnand %p5153_p4, %p5150_p3 }
0x1ae0   :  { %5158 = shalt.err (!%p5155_p5)
}
0x1ae1   :  { %3582 = dma.vmem_to_hbm [thread:$0]  %s3577_s15, 256, %s5455_s12, [#allocation4], %s5229_s26, %s5229_s26, %s5230_s28  }
0x1ae2   :  { %5187 = dma.done.wait [#allocation4], 256  }
0x1ae3   :  { %5188 = vsyncadd [#allocation4], 4294967040 }
0x1ae4   :  { %3586 = vsyncpa [#allocation3], 1 }
0x1ae5   :  { %3587 = vsyncpa [#allocation6], 1 }
0x1ae6   :  { %3588 = vsyncpa [#allocation9], 1 }
0x1ae7   :  { %3589 = vsyncpa [#allocation12], 1 }
0x1ae8   :  { %3590 = vsyncpa [#allocation15], 1 }
0x1ae9   :  { %3591 = vsyncpa [#allocation18], 1 }
0x1aea   :  { %3592 = vsyncpa [#allocation21], 1 }
0x1aeb   :  { %3593 = vsyncpa [#allocation24], 1 }
0x1aec   :  { %3594 = vsyncpa [#allocation27], 1 }
0x1aed   :  { %3595 = vsyncpa [#allocation30], 1 }
0x1aee   :  { %3596 = vsyncpa [#allocation33], 1 }
0x1aef   :  { %3597 = vsyncpa [#allocation36], 1 }
0x1af0   :  { %3598 = vsyncpa [#allocation39], 1 }
0x1af1   :  { %3599 = vsyncpa [#allocation42], 1 }
0x1af2   :  { %3600 = vsyncpa [#allocation4], 1 }

</bundles_post_ra>
